<compile_context>
chip_gen: v7x
topology: tpu7x:2x2x1
jax: 0.10.0
libtpu: 0.0.40
codegen_flags: <defaults>
</compile_context>

<pallas_src>
import functools

import numpy as np

import jax
import jax.numpy as jnp
from jax import lax
from jax.experimental import pallas as pl
from jax.experimental.pallas import tpu as pltpu


# ----------------------------------------------------------------------------
# Fused forward kernel (single block: everything lives in VMEM)
# ----------------------------------------------------------------------------
def _fused_forward_kernel(*refs, enc_acts, dec_acts, classify):
    """refs = [x2d] + [Rstk, Gstk, bias_row] per conv layer
              (+ [Sstk, W1stk, b1, W2, b2] if classify) + [out]."""
    out_ref = refs[-1]

    def conv_block(x_bf16, r_ref, g_ref, b_ref, act):
        n_tap, _, n_out = g_ref.shape
        m_out = r_ref.shape[0] // n_tap
        # Spatial row gather (stride-2 conv / zero-insertion deconv) as one
        # MXU matmul with a 0/1 selection matrix.
        y = jnp.dot(r_ref[...], x_bf16, preferred_element_type=jnp.float32)
        acc = jnp.zeros((m_out, n_out), jnp.float32)
        for t in range(n_tap):                       # static unroll: 3 row taps
            y_t = y[t * m_out:(t + 1) * m_out, :].astype(jnp.bfloat16)
            acc = acc + jnp.dot(y_t, g_ref[t], preferred_element_type=jnp.float32)
        acc = acc + b_ref[...]                       # f32 epilogue
        if act == "relu":
            acc = jnp.maximum(acc, 0.0)
        elif act == "sigmoid":
            acc = 1.0 / (1.0 + jnp.exp(-acc))
        return acc

    x = refs[0][...].astype(jnp.bfloat16)
    idx = 1
    acc = None
    for act in enc_acts + dec_acts:
        acc = conv_block(x, refs[idx], refs[idx + 1], refs[idx + 2], act)
        x = acc.astype(jnp.bfloat16)
        idx += 3

    if not classify:
        out_ref[...] = acc
        return

    # Classifier head fused after the encoder (feat never leaves VMEM).
    s_ref, w1_ref, b1_ref, w2_ref, b2_ref = refs[idx:idx + 5]
    n_grp, _, n_hidden = w1_ref.shape
    bsz = s_ref.shape[0] // n_grp
    # Per-batch row regroup (0/1 selection) + fc1 with the PyTorch NCHW-flatten
    # permutation folded into W1stk.
    xs = jnp.dot(s_ref[...], x, preferred_element_type=jnp.float32)
    h = jnp.zeros((bsz, n_hidden), jnp.float32)
    for i in range(n_grp):                           # static unroll: 4 rows
        x_i = xs[i * bsz:(i + 1) * bsz, :].astype(jnp.bfloat16)
        h = h + jnp.dot(x_i, w1_ref[i], preferred_element_type=jnp.float32)
    h = jnp.maximum(h + b1_ref[...], 0.0).astype(jnp.bfloat16)
    out_ref[...] = (jnp.dot(h, w2_ref[...], preferred_element_type=jnp.float32)
                    + b2_ref[...])


def _call_fused(ops, out_shape, **kernel_kwargs):
    kern = functools.partial(_fused_forward_kernel, **kernel_kwargs)
    vmem = pl.BlockSpec(memory_space=pltpu.MemorySpace.VMEM)
    return pl.pallas_call(
        kern,
        out_shape=jax.ShapeDtypeStruct(out_shape, jnp.float32),
        in_specs=[vmem] * len(ops),
        out_specs=vmem,
    )(*ops)


# ----------------------------------------------------------------------------
# Forward pass (matches Autoencoder.forward)
# ----------------------------------------------------------------------------
@functools.partial(jax.jit, static_argnames=("classify",))
def forward(params, x_nchw, classify=False):
    """x_nchw: [B, 1, H, W]; B must match the batch used in prepare_params."""
    B, C, H, W = x_nchw.shape
    assert C == 1
    # C=1: NCHW flatten gives exactly the (b,h) x (w*c) 2D activation layout.
    x2d = x_nchw.astype(jnp.float32).reshape(B * H, W)

    ops = [x2d]
    for triple in params["enc"]:
        ops.extend(triple)

    if classify:
        ops.extend([params["cls_s"], params["cls_w1"], params["cls_b1"],
                    params["cls_w2"], params["cls_b2"]])
        return _call_fused(ops, (B, params["cls_w2"].shape[1]),
                           enc_acts=("relu", "relu", "relu"), dec_acts=(),
                           classify=True)

    for triple in params["dec"]:
        ops.extend(triple)
    m_out = params["dec"][-1][0].shape[0] // 3       # B * H_out
    n_out = params["dec"][-1][1].shape[2]            # W_out * 1
    out2d = _call_fused(ops, (m_out, n_out),
                        enc_acts=("relu", "relu", "relu"),
                        dec_acts=("relu", "relu", "sigmoid"),
                        classify=False)
    return out2d.reshape(B, m_out // B, n_out)[:, None, :, :]    # -> NCHW (C=1)


# ----------------------------------------------------------------------------
# Parameters: raw PyTorch-layout init + one-time (hoisted) layout transforms
# ----------------------------------------------------------------------------
def init_raw_params(key, num_classes=47):
    """PyTorch-layout f32 params (Conv2d: [Cout,Cin,3,3]; ConvT: [Cin,Cout,3,3])."""
    ks = iter(jax.random.split(key, 16))

    def u(k, shape, fan_in):
        bound = 1.0 / (fan_in ** 0.5)
        return jax.random.uniform(k, shape, jnp.float32, -bound, bound)

    raw = {"enc": [], "dec": []}
    for cin, cout in [(1, 16), (16, 32), (32, 64)]:
        fan = cin * 9
        raw["enc"].append((u(next(ks), (cout, cin, 3, 3), fan),
                           u(next(ks), (cout,), fan)))
    for cin, cout in [(64, 32), (32, 16), (16, 1)]:
        fan = cout * 9
        raw["dec"].append((u(next(ks), (cin, cout, 3, 3), fan),
                           u(next(ks), (cout,), fan)))
    kin = 64 * 4 * 4
    raw["fc1_w"] = u(next(ks), (kin, 128), kin)      # stored [K, N]
    raw["fc1_b"] = u(next(ks), (128,), kin)
    raw["fc2_w"] = u(next(ks), (128, num_classes), 128)
    raw["fc2_b"] = u(next(ks), (num_classes,), 128)
    return raw


def _conv_rg(w, b, batch, h, w_sp):
    """Conv2d(k=3,s=2,p=1) -> (Rstk [3*B*Ho, B*H], Gstk [3, W*Cin, Wo*Cout],
    bias_row [1, Wo*Cout]) for the (b,h) x (w,c) 2D activation layout."""
    cout, cin = w.shape[0], w.shape[1]
    ho, wo = h // 2, w_sp // 2
    r_mat = np.zeros((3, batch * ho, batch * h), np.float32)
    g_mat = np.zeros((3, w_sp * cin, wo * cout), np.float32)
    for di in range(3):
        for bb in range(batch):
            for i in range(ho):
                r = 2 * i + di - 1
                if 0 <= r < h:
                    r_mat[di, bb * ho + i, bb * h + r] = 1.0
        for j in range(wo):
            for dj in range(3):
                s = 2 * j + dj - 1
                if 0 <= s < w_sp:
                    g_mat[di, s * cin:(s + 1) * cin,
                          j * cout:(j + 1) * cout] += w[:, :, di, dj].T
    bias_row = np.tile(b, wo).reshape(1, wo * cout)
    return (jnp.asarray(r_mat.reshape(3 * batch * ho, batch * h), jnp.bfloat16),
            jnp.asarray(g_mat, jnp.bfloat16),
            jnp.asarray(bias_row, jnp.float32))


def _convt_rg(w, b, batch, h, w_sp):
    """ConvTranspose2d(k=3,s=2,p=1,out_pad=1), weight [Cin,Cout,3,3]."""
    cin, cout = w.shape[0], w.shape[1]
    ho, wo = 2 * h, 2 * w_sp
    r_mat = np.zeros((3, batch * ho, batch * h), np.float32)
    g_mat = np.zeros((3, w_sp * cin, wo * cout), np.float32)
    for kh in range(3):
        for bb in range(batch):
            for ii in range(h):
                oi = 2 * ii - 1 + kh
                if 0 <= oi < ho:
                    r_mat[kh, bb * ho + oi, bb * h + ii] = 1.0
        for ij in range(w_sp):
            for kw in range(3):
                oj = 2 * ij - 1 + kw
                if 0 <= oj < wo:
                    g_mat[kh, ij * cin:(ij + 1) * cin,
                          oj * cout:(oj + 1) * cout] += w[:, :, kh, kw]
    bias_row = np.tile(b, wo).reshape(1, wo * cout)
    return (jnp.asarray(r_mat.reshape(3 * batch * ho, batch * h), jnp.bfloat16),
            jnp.asarray(g_mat, jnp.bfloat16),
            jnp.asarray(bias_row, jnp.float32))


def prepare_params(raw, batch, height=32, width=32):
    """One-time transform of PyTorch-layout params into the fused-kernel operands.
    (Row-selection matrices bake in the batch size.)"""
    p = {"enc": [], "dec": []}
    h, w = height, width
    for wgt, bias in raw["enc"]:
        p["enc"].append(_conv_rg(np.asarray(wgt, np.float32),
                                 np.asarray(bias, np.float32), batch, h, w))
        h, w = h // 2, w // 2
    h_enc, w_enc = h, w                               # encoder output spatial (4x4)
    for wgt, bias in raw["dec"]:
        p["dec"].append(_convt_rg(np.asarray(wgt, np.float32),
                                  np.asarray(bias, np.float32), batch, h, w))
        h, w = 2 * h, 2 * w

    # Classifier: fold the NCHW flatten permutation into fc1 and the per-batch
    # row regroup into a 0/1 selection matrix.
    cch = raw["enc"][-1][0].shape[0]                  # 64
    sel = np.zeros((h_enc, batch, batch * h_enc), np.float32)
    for i in range(h_enc):
        for bb in range(batch):
            sel[i, bb, bb * h_enc + i] = 1.0
    w1 = np.asarray(raw["fc1_w"], np.float32).reshape(cch, h_enc, w_enc, -1)
    w1stk = np.transpose(w1, (1, 2, 0, 3)).reshape(h_enc, w_enc * cch, -1)
    p["cls_s"] = jnp.asarray(sel.reshape(h_enc * batch, batch * h_enc), jnp.bfloat16)
    p["cls_w1"] = jnp.asarray(w1stk, jnp.bfloat16)
    p["cls_b1"] = jnp.asarray(np.asarray(raw["fc1_b"], np.float32).reshape(1, -1))
    p["cls_w2"] = jnp.asarray(np.asarray(raw["fc2_w"], np.float32), jnp.bfloat16)
    p["cls_b2"] = jnp.asarray(np.asarray(raw["fc2_b"], np.float32).reshape(1, -1))
    return p


# ----------------------------------------------------------------------------
# Pure-JAX f32 reference (exact PyTorch Conv2d / ConvTranspose2d semantics)
# ----------------------------------------------------------------------------
def reference_forward(raw, x_nchw, classify=False):
    x = jnp.transpose(x_nchw, (0, 2, 3, 1))
    for w, b in raw["enc"]:
        w_hwio = jnp.transpose(w, (2, 3, 1, 0))
        x = lax.conv_general_dilated(x, w_hwio, (2, 2), ((1, 1), (1, 1)),
                                     dimension_numbers=("NHWC", "HWIO", "NHWC"))
        x = jnp.maximum(x + b, 0.0)
    if classify:
        feat = jnp.transpose(x, (0, 3, 1, 2)).reshape(x.shape[0], -1)
        h = jnp.maximum(feat @ raw["fc1_w"] + raw["fc1_b"], 0.0)
        return h @ raw["fc2_w"] + raw["fc2_b"]
    for idx, (w, b) in enumerate(raw["dec"]):
        w_conv = jnp.transpose(w[:, :, ::-1, ::-1], (1, 0, 2, 3))  # [Cout,Cin,3,3]
        w_hwio = jnp.transpose(w_conv, (2, 3, 1, 0))
        x = lax.conv_general_dilated(x, w_hwio, (1, 1), ((1, 2), (1, 2)),
                                     lhs_dilation=(2, 2),
                                     dimension_numbers=("NHWC", "HWIO", "NHWC"))
        x = x + b
        x = jnp.maximum(x, 0.0) if idx < 2 else jax.nn.sigmoid(x)
    return jnp.transpose(x, (0, 3, 1, 2))


if __name__ == "__main__":
    key = jax.random.PRNGKey(0)
    pkey, xkey = jax.random.split(key)
    raw = init_raw_params(pkey)

    B = 2
    params = prepare_params(raw, batch=B, height=32, width=32)
    # 32x32 single-channel input (classifier expects 64*4*4: 32 -> 16 -> 8 -> 4)
    x = jax.random.uniform(xkey, (B, 1, 32, 32), jnp.float32)

    recon = jax.block_until_ready(forward(params, x, classify=False))
    logits = jax.block_until_ready(forward(params, x, classify=True))

    assert recon.shape == (2, 1, 32, 32), recon.shape
    assert logits.shape == (2, 47), logits.shape
    assert bool(jnp.all(jnp.isfinite(recon))) and bool(jnp.all(jnp.isfinite(logits)))

    # correctness vs pure-JAX f32 reference (generous tol for bf16 MXU inputs)
    recon_ref = reference_forward(raw, x, classify=False)
    logits_ref = reference_forward(raw, x, classify=True)
    assert float(jnp.max(jnp.abs(recon - recon_ref))) < 5e-2
    assert float(jnp.max(jnp.abs(logits - logits_ref))) < 1e-1

    print("KERNEL_OK")
</pallas_src>

<mosaic_0001>
module attributes {stable_mosaic.version = 11 : i64} {
  func.func @_fused_forward_kernel(%arg0: memref<64x32xf32, #tpu.memory_space<vmem>>, %arg1: memref<96x64xbf16, #tpu.memory_space<vmem>>, %arg2: memref<3x32x256xbf16, #tpu.memory_space<vmem>>, %arg3: memref<1x256xf32, #tpu.memory_space<vmem>>, %arg4: memref<48x32xbf16, #tpu.memory_space<vmem>>, %arg5: memref<3x256x256xbf16, #tpu.memory_space<vmem>>, %arg6: memref<1x256xf32, #tpu.memory_space<vmem>>, %arg7: memref<24x16xbf16, #tpu.memory_space<vmem>>, %arg8: memref<3x256x256xbf16, #tpu.memory_space<vmem>>, %arg9: memref<1x256xf32, #tpu.memory_space<vmem>>, %arg10: memref<48x8xbf16, #tpu.memory_space<vmem>>, %arg11: memref<3x256x256xbf16, #tpu.memory_space<vmem>>, %arg12: memref<1x256xf32, #tpu.memory_space<vmem>>, %arg13: memref<96x16xbf16, #tpu.memory_space<vmem>>, %arg14: memref<3x256x256xbf16, #tpu.memory_space<vmem>>, %arg15: memref<1x256xf32, #tpu.memory_space<vmem>>, %arg16: memref<192x32xbf16, #tpu.memory_space<vmem>>, %arg17: memref<3x256x32xbf16, #tpu.memory_space<vmem>>, %arg18: memref<1x32xf32, #tpu.memory_space<vmem>>, %arg19: memref<64x32xf32, #tpu.memory_space<vmem>>) attributes {dimension_semantics = [], scalar_prefetch = 0 : i64, scratch_operands = 0 : i64, tpu.core_type = #tpu.core_type<tc>} {
    %c0 = arith.constant 0 : index
    %c0_0 = arith.constant 0 : index
    %0 = vector.load %arg0[%c0, %c0_0] : memref<64x32xf32, #tpu.memory_space<vmem>>, vector<64x32xf32>
    %1 = arith.truncf %0 : vector<64x32xf32> to vector<64x32xbf16>
    %c0_1 = arith.constant 0 : index
    %c0_2 = arith.constant 0 : index
    %2 = vector.load %arg1[%c0_1, %c0_2] : memref<96x64xbf16, #tpu.memory_space<vmem>>, vector<96x64xbf16>
    %cst = arith.constant dense<0.000000e+00> : vector<96x32xf32>
    %3 = tpu.matmul %2, %1, %cst {dimension_numbers = #tpu.dot_dimension_numbers<[1], [0], [0], [1], [0, 0, 1, 1], [], []>} : vector<96x64xbf16>, vector<64x32xbf16>, vector<96x32xf32> -> vector<96x32xf32>
    %cst_3 = arith.constant 0.000000e+00 : f32
    %4 = vector.broadcast %cst_3 : f32 to vector<32x256xf32>
    %5 = vector.extract_strided_slice %3 {offsets = [0, 0], sizes = [32, 32], strides = [1, 1]} : vector<96x32xf32> to vector<32x32xf32>
    %6 = arith.truncf %5 : vector<32x32xf32> to vector<32x32xbf16>
    %c0_4 = arith.constant 0 : index
    %c0_5 = arith.constant 0 : index
    %c0_6 = arith.constant 0 : index
    %7 = vector.load %arg2[%c0_4, %c0_5, %c0_6] : memref<3x32x256xbf16, #tpu.memory_space<vmem>>, vector<1x32x256xbf16>
    %8 = vector.shape_cast %7 : vector<1x32x256xbf16> to vector<32x256xbf16>
    %cst_7 = arith.constant dense<0.000000e+00> : vector<32x256xf32>
    %9 = tpu.matmul %6, %8, %cst_7 {dimension_numbers = #tpu.dot_dimension_numbers<[1], [0], [0], [1], [0, 0, 1, 1], [], []>} : vector<32x32xbf16>, vector<32x256xbf16>, vector<32x256xf32> -> vector<32x256xf32>
    %10 = arith.addf %4, %9 : vector<32x256xf32>
    %11 = vector.extract_strided_slice %3 {offsets = [32, 0], sizes = [32, 32], strides = [1, 1]} : vector<96x32xf32> to vector<32x32xf32>
    %12 = arith.truncf %11 : vector<32x32xf32> to vector<32x32xbf16>
    %c1 = arith.constant 1 : index
    %c0_8 = arith.constant 0 : index
    %c0_9 = arith.constant 0 : index
    %13 = vector.load %arg2[%c1, %c0_8, %c0_9] : memref<3x32x256xbf16, #tpu.memory_space<vmem>>, vector<1x32x256xbf16>
    %14 = vector.shape_cast %13 : vector<1x32x256xbf16> to vector<32x256xbf16>
    %cst_10 = arith.constant dense<0.000000e+00> : vector<32x256xf32>
    %15 = tpu.matmul %12, %14, %cst_10 {dimension_numbers = #tpu.dot_dimension_numbers<[1], [0], [0], [1], [0, 0, 1, 1], [], []>} : vector<32x32xbf16>, vector<32x256xbf16>, vector<32x256xf32> -> vector<32x256xf32>
    %16 = arith.addf %10, %15 : vector<32x256xf32>
    %17 = vector.extract_strided_slice %3 {offsets = [64, 0], sizes = [32, 32], strides = [1, 1]} : vector<96x32xf32> to vector<32x32xf32>
    %18 = arith.truncf %17 : vector<32x32xf32> to vector<32x32xbf16>
    %c2 = arith.constant 2 : index
    %c0_11 = arith.constant 0 : index
    %c0_12 = arith.constant 0 : index
    %19 = vector.load %arg2[%c2, %c0_11, %c0_12] : memref<3x32x256xbf16, #tpu.memory_space<vmem>>, vector<1x32x256xbf16>
    %20 = vector.shape_cast %19 : vector<1x32x256xbf16> to vector<32x256xbf16>
    %cst_13 = arith.constant dense<0.000000e+00> : vector<32x256xf32>
    %21 = tpu.matmul %18, %20, %cst_13 {dimension_numbers = #tpu.dot_dimension_numbers<[1], [0], [0], [1], [0, 0, 1, 1], [], []>} : vector<32x32xbf16>, vector<32x256xbf16>, vector<32x256xf32> -> vector<32x256xf32>
    %22 = arith.addf %16, %21 : vector<32x256xf32>
    %c0_14 = arith.constant 0 : index
    %c0_15 = arith.constant 0 : index
    %23 = vector.load %arg3[%c0_14, %c0_15] : memref<1x256xf32, #tpu.memory_space<vmem>>, vector<1x256xf32>
    %24 = vector.broadcast %23 : vector<1x256xf32> to vector<32x256xf32>
    %25 = arith.addf %22, %24 : vector<32x256xf32>
    %cst_16 = arith.constant 0.000000e+00 : f32
    %26 = vector.broadcast %cst_16 : f32 to vector<32x256xf32>
    %27 = arith.maximumf %25, %26 : vector<32x256xf32>
    %28 = arith.truncf %27 : vector<32x256xf32> to vector<32x256xbf16>
    %c0_17 = arith.constant 0 : index
    %c0_18 = arith.constant 0 : index
    %29 = vector.load %arg4[%c0_17, %c0_18] : memref<48x32xbf16, #tpu.memory_space<vmem>>, vector<48x32xbf16>
    %cst_19 = arith.constant dense<0.000000e+00> : vector<48x256xf32>
    %30 = tpu.matmul %29, %28, %cst_19 {dimension_numbers = #tpu.dot_dimension_numbers<[1], [0], [0], [1], [0, 0, 1, 1], [], []>} : vector<48x32xbf16>, vector<32x256xbf16>, vector<48x256xf32> -> vector<48x256xf32>
    %cst_20 = arith.constant 0.000000e+00 : f32
    %31 = vector.broadcast %cst_20 : f32 to vector<16x256xf32>
    %32 = vector.extract_strided_slice %30 {offsets = [0, 0], sizes = [16, 256], strides = [1, 1]} : vector<48x256xf32> to vector<16x256xf32>
    %33 = arith.truncf %32 : vector<16x256xf32> to vector<16x256xbf16>
    %c0_21 = arith.constant 0 : index
    %c0_22 = arith.constant 0 : index
    %c0_23 = arith.constant 0 : index
    %34 = vector.load %arg5[%c0_21, %c0_22, %c0_23] : memref<3x256x256xbf16, #tpu.memory_space<vmem>>, vector<1x256x256xbf16>
    %35 = vector.shape_cast %34 : vector<1x256x256xbf16> to vector<256x256xbf16>
    %cst_24 = arith.constant dense<0.000000e+00> : vector<16x256xf32>
    %36 = tpu.matmul %33, %35, %cst_24 {dimension_numbers = #tpu.dot_dimension_numbers<[1], [0], [0], [1], [0, 0, 1, 1], [], []>} : vector<16x256xbf16>, vector<256x256xbf16>, vector<16x256xf32> -> vector<16x256xf32>
    %37 = arith.addf %31, %36 : vector<16x256xf32>
    %38 = vector.extract_strided_slice %30 {offsets = [16, 0], sizes = [16, 256], strides = [1, 1]} : vector<48x256xf32> to vector<16x256xf32>
    %39 = arith.truncf %38 : vector<16x256xf32> to vector<16x256xbf16>
    %c1_25 = arith.constant 1 : index
    %c0_26 = arith.constant 0 : index
    %c0_27 = arith.constant 0 : index
    %40 = vector.load %arg5[%c1_25, %c0_26, %c0_27] : memref<3x256x256xbf16, #tpu.memory_space<vmem>>, vector<1x256x256xbf16>
    %41 = vector.shape_cast %40 : vector<1x256x256xbf16> to vector<256x256xbf16>
    %cst_28 = arith.constant dense<0.000000e+00> : vector<16x256xf32>
    %42 = tpu.matmul %39, %41, %cst_28 {dimension_numbers = #tpu.dot_dimension_numbers<[1], [0], [0], [1], [0, 0, 1, 1], [], []>} : vector<16x256xbf16>, vector<256x256xbf16>, vector<16x256xf32> -> vector<16x256xf32>
    %43 = arith.addf %37, %42 : vector<16x256xf32>
    %44 = vector.extract_strided_slice %30 {offsets = [32, 0], sizes = [16, 256], strides = [1, 1]} : vector<48x256xf32> to vector<16x256xf32>
    %45 = arith.truncf %44 : vector<16x256xf32> to vector<16x256xbf16>
    %c2_29 = arith.constant 2 : index
    %c0_30 = arith.constant 0 : index
    %c0_31 = arith.constant 0 : index
    %46 = vector.load %arg5[%c2_29, %c0_30, %c0_31] : memref<3x256x256xbf16, #tpu.memory_space<vmem>>, vector<1x256x256xbf16>
    %47 = vector.shape_cast %46 : vector<1x256x256xbf16> to vector<256x256xbf16>
    %cst_32 = arith.constant dense<0.000000e+00> : vector<16x256xf32>
    %48 = tpu.matmul %45, %47, %cst_32 {dimension_numbers = #tpu.dot_dimension_numbers<[1], [0], [0], [1], [0, 0, 1, 1], [], []>} : vector<16x256xbf16>, vector<256x256xbf16>, vector<16x256xf32> -> vector<16x256xf32>
    %49 = arith.addf %43, %48 : vector<16x256xf32>
    %c0_33 = arith.constant 0 : index
    %c0_34 = arith.constant 0 : index
    %50 = vector.load %arg6[%c0_33, %c0_34] : memref<1x256xf32, #tpu.memory_space<vmem>>, vector<1x256xf32>
    %51 = vector.broadcast %50 : vector<1x256xf32> to vector<16x256xf32>
    %52 = arith.addf %49, %51 : vector<16x256xf32>
    %cst_35 = arith.constant 0.000000e+00 : f32
    %53 = vector.broadcast %cst_35 : f32 to vector<16x256xf32>
    %54 = arith.maximumf %52, %53 : vector<16x256xf32>
    %55 = arith.truncf %54 : vector<16x256xf32> to vector<16x256xbf16>
    %c0_36 = arith.constant 0 : index
    %c0_37 = arith.constant 0 : index
    %56 = vector.load %arg7[%c0_36, %c0_37] : memref<24x16xbf16, #tpu.memory_space<vmem>>, vector<24x16xbf16>
    %cst_38 = arith.constant dense<0.000000e+00> : vector<24x256xf32>
    %57 = tpu.matmul %56, %55, %cst_38 {dimension_numbers = #tpu.dot_dimension_numbers<[1], [0], [0], [1], [0, 0, 1, 1], [], []>} : vector<24x16xbf16>, vector<16x256xbf16>, vector<24x256xf32> -> vector<24x256xf32>
    %cst_39 = arith.constant 0.000000e+00 : f32
    %58 = vector.broadcast %cst_39 : f32 to vector<8x256xf32>
    %59 = vector.extract_strided_slice %57 {offsets = [0, 0], sizes = [8, 256], strides = [1, 1]} : vector<24x256xf32> to vector<8x256xf32>
    %60 = arith.truncf %59 : vector<8x256xf32> to vector<8x256xbf16>
    %c0_40 = arith.constant 0 : index
    %c0_41 = arith.constant 0 : index
    %c0_42 = arith.constant 0 : index
    %61 = vector.load %arg8[%c0_40, %c0_41, %c0_42] : memref<3x256x256xbf16, #tpu.memory_space<vmem>>, vector<1x256x256xbf16>
    %62 = vector.shape_cast %61 : vector<1x256x256xbf16> to vector<256x256xbf16>
    %cst_43 = arith.constant dense<0.000000e+00> : vector<8x256xf32>
    %63 = tpu.matmul %60, %62, %cst_43 {dimension_numbers = #tpu.dot_dimension_numbers<[1], [0], [0], [1], [0, 0, 1, 1], [], []>} : vector<8x256xbf16>, vector<256x256xbf16>, vector<8x256xf32> -> vector<8x256xf32>
    %64 = arith.addf %58, %63 : vector<8x256xf32>
    %65 = vector.extract_strided_slice %57 {offsets = [8, 0], sizes = [8, 256], strides = [1, 1]} : vector<24x256xf32> to vector<8x256xf32>
    %66 = arith.truncf %65 : vector<8x256xf32> to vector<8x256xbf16>
    %c1_44 = arith.constant 1 : index
    %c0_45 = arith.constant 0 : index
    %c0_46 = arith.constant 0 : index
    %67 = vector.load %arg8[%c1_44, %c0_45, %c0_46] : memref<3x256x256xbf16, #tpu.memory_space<vmem>>, vector<1x256x256xbf16>
    %68 = vector.shape_cast %67 : vector<1x256x256xbf16> to vector<256x256xbf16>
    %cst_47 = arith.constant dense<0.000000e+00> : vector<8x256xf32>
    %69 = tpu.matmul %66, %68, %cst_47 {dimension_numbers = #tpu.dot_dimension_numbers<[1], [0], [0], [1], [0, 0, 1, 1], [], []>} : vector<8x256xbf16>, vector<256x256xbf16>, vector<8x256xf32> -> vector<8x256xf32>
    %70 = arith.addf %64, %69 : vector<8x256xf32>
    %71 = vector.extract_strided_slice %57 {offsets = [16, 0], sizes = [8, 256], strides = [1, 1]} : vector<24x256xf32> to vector<8x256xf32>
    %72 = arith.truncf %71 : vector<8x256xf32> to vector<8x256xbf16>
    %c2_48 = arith.constant 2 : index
    %c0_49 = arith.constant 0 : index
    %c0_50 = arith.constant 0 : index
    %73 = vector.load %arg8[%c2_48, %c0_49, %c0_50] : memref<3x256x256xbf16, #tpu.memory_space<vmem>>, vector<1x256x256xbf16>
    %74 = vector.shape_cast %73 : vector<1x256x256xbf16> to vector<256x256xbf16>
    %cst_51 = arith.constant dense<0.000000e+00> : vector<8x256xf32>
    %75 = tpu.matmul %72, %74, %cst_51 {dimension_numbers = #tpu.dot_dimension_numbers<[1], [0], [0], [1], [0, 0, 1, 1], [], []>} : vector<8x256xbf16>, vector<256x256xbf16>, vector<8x256xf32> -> vector<8x256xf32>
    %76 = arith.addf %70, %75 : vector<8x256xf32>
    %c0_52 = arith.constant 0 : index
    %c0_53 = arith.constant 0 : index
    %77 = vector.load %arg9[%c0_52, %c0_53] : memref<1x256xf32, #tpu.memory_space<vmem>>, vector<1x256xf32>
    %78 = vector.broadcast %77 : vector<1x256xf32> to vector<8x256xf32>
    %79 = arith.addf %76, %78 : vector<8x256xf32>
    %cst_54 = arith.constant 0.000000e+00 : f32
    %80 = vector.broadcast %cst_54 : f32 to vector<8x256xf32>
    %81 = arith.maximumf %79, %80 : vector<8x256xf32>
    %82 = arith.truncf %81 : vector<8x256xf32> to vector<8x256xbf16>
    %c0_55 = arith.constant 0 : index
    %c0_56 = arith.constant 0 : index
    %83 = vector.load %arg10[%c0_55, %c0_56] : memref<48x8xbf16, #tpu.memory_space<vmem>>, vector<48x8xbf16>
    %cst_57 = arith.constant dense<0.000000e+00> : vector<48x256xf32>
    %84 = tpu.matmul %83, %82, %cst_57 {dimension_numbers = #tpu.dot_dimension_numbers<[1], [0], [0], [1], [0, 0, 1, 1], [], []>} : vector<48x8xbf16>, vector<8x256xbf16>, vector<48x256xf32> -> vector<48x256xf32>
    %cst_58 = arith.constant 0.000000e+00 : f32
    %85 = vector.broadcast %cst_58 : f32 to vector<16x256xf32>
    %86 = vector.extract_strided_slice %84 {offsets = [0, 0], sizes = [16, 256], strides = [1, 1]} : vector<48x256xf32> to vector<16x256xf32>
    %87 = arith.truncf %86 : vector<16x256xf32> to vector<16x256xbf16>
    %c0_59 = arith.constant 0 : index
    %c0_60 = arith.constant 0 : index
    %c0_61 = arith.constant 0 : index
    %88 = vector.load %arg11[%c0_59, %c0_60, %c0_61] : memref<3x256x256xbf16, #tpu.memory_space<vmem>>, vector<1x256x256xbf16>
    %89 = vector.shape_cast %88 : vector<1x256x256xbf16> to vector<256x256xbf16>
    %cst_62 = arith.constant dense<0.000000e+00> : vector<16x256xf32>
    %90 = tpu.matmul %87, %89, %cst_62 {dimension_numbers = #tpu.dot_dimension_numbers<[1], [0], [0], [1], [0, 0, 1, 1], [], []>} : vector<16x256xbf16>, vector<256x256xbf16>, vector<16x256xf32> -> vector<16x256xf32>
    %91 = arith.addf %85, %90 : vector<16x256xf32>
    %92 = vector.extract_strided_slice %84 {offsets = [16, 0], sizes = [16, 256], strides = [1, 1]} : vector<48x256xf32> to vector<16x256xf32>
    %93 = arith.truncf %92 : vector<16x256xf32> to vector<16x256xbf16>
    %c1_63 = arith.constant 1 : index
    %c0_64 = arith.constant 0 : index
    %c0_65 = arith.constant 0 : index
    %94 = vector.load %arg11[%c1_63, %c0_64, %c0_65] : memref<3x256x256xbf16, #tpu.memory_space<vmem>>, vector<1x256x256xbf16>
    %95 = vector.shape_cast %94 : vector<1x256x256xbf16> to vector<256x256xbf16>
    %cst_66 = arith.constant dense<0.000000e+00> : vector<16x256xf32>
    %96 = tpu.matmul %93, %95, %cst_66 {dimension_numbers = #tpu.dot_dimension_numbers<[1], [0], [0], [1], [0, 0, 1, 1], [], []>} : vector<16x256xbf16>, vector<256x256xbf16>, vector<16x256xf32> -> vector<16x256xf32>
    %97 = arith.addf %91, %96 : vector<16x256xf32>
    %98 = vector.extract_strided_slice %84 {offsets = [32, 0], sizes = [16, 256], strides = [1, 1]} : vector<48x256xf32> to vector<16x256xf32>
    %99 = arith.truncf %98 : vector<16x256xf32> to vector<16x256xbf16>
    %c2_67 = arith.constant 2 : index
    %c0_68 = arith.constant 0 : index
    %c0_69 = arith.constant 0 : index
    %100 = vector.load %arg11[%c2_67, %c0_68, %c0_69] : memref<3x256x256xbf16, #tpu.memory_space<vmem>>, vector<1x256x256xbf16>
    %101 = vector.shape_cast %100 : vector<1x256x256xbf16> to vector<256x256xbf16>
    %cst_70 = arith.constant dense<0.000000e+00> : vector<16x256xf32>
    %102 = tpu.matmul %99, %101, %cst_70 {dimension_numbers = #tpu.dot_dimension_numbers<[1], [0], [0], [1], [0, 0, 1, 1], [], []>} : vector<16x256xbf16>, vector<256x256xbf16>, vector<16x256xf32> -> vector<16x256xf32>
    %103 = arith.addf %97, %102 : vector<16x256xf32>
    %c0_71 = arith.constant 0 : index
    %c0_72 = arith.constant 0 : index
    %104 = vector.load %arg12[%c0_71, %c0_72] : memref<1x256xf32, #tpu.memory_space<vmem>>, vector<1x256xf32>
    %105 = vector.broadcast %104 : vector<1x256xf32> to vector<16x256xf32>
    %106 = arith.addf %103, %105 : vector<16x256xf32>
    %cst_73 = arith.constant 0.000000e+00 : f32
    %107 = vector.broadcast %cst_73 : f32 to vector<16x256xf32>
    %108 = arith.maximumf %106, %107 : vector<16x256xf32>
    %109 = arith.truncf %108 : vector<16x256xf32> to vector<16x256xbf16>
    %c0_74 = arith.constant 0 : index
    %c0_75 = arith.constant 0 : index
    %110 = vector.load %arg13[%c0_74, %c0_75] : memref<96x16xbf16, #tpu.memory_space<vmem>>, vector<96x16xbf16>
    %cst_76 = arith.constant dense<0.000000e+00> : vector<96x256xf32>
    %111 = tpu.matmul %110, %109, %cst_76 {dimension_numbers = #tpu.dot_dimension_numbers<[1], [0], [0], [1], [0, 0, 1, 1], [], []>} : vector<96x16xbf16>, vector<16x256xbf16>, vector<96x256xf32> -> vector<96x256xf32>
    %cst_77 = arith.constant 0.000000e+00 : f32
    %112 = vector.broadcast %cst_77 : f32 to vector<32x256xf32>
    %113 = vector.extract_strided_slice %111 {offsets = [0, 0], sizes = [32, 256], strides = [1, 1]} : vector<96x256xf32> to vector<32x256xf32>
    %114 = arith.truncf %113 : vector<32x256xf32> to vector<32x256xbf16>
    %c0_78 = arith.constant 0 : index
    %c0_79 = arith.constant 0 : index
    %c0_80 = arith.constant 0 : index
    %115 = vector.load %arg14[%c0_78, %c0_79, %c0_80] : memref<3x256x256xbf16, #tpu.memory_space<vmem>>, vector<1x256x256xbf16>
    %116 = vector.shape_cast %115 : vector<1x256x256xbf16> to vector<256x256xbf16>
    %cst_81 = arith.constant dense<0.000000e+00> : vector<32x256xf32>
    %117 = tpu.matmul %114, %116, %cst_81 {dimension_numbers = #tpu.dot_dimension_numbers<[1], [0], [0], [1], [0, 0, 1, 1], [], []>} : vector<32x256xbf16>, vector<256x256xbf16>, vector<32x256xf32> -> vector<32x256xf32>
    %118 = arith.addf %112, %117 : vector<32x256xf32>
    %119 = vector.extract_strided_slice %111 {offsets = [32, 0], sizes = [32, 256], strides = [1, 1]} : vector<96x256xf32> to vector<32x256xf32>
    %120 = arith.truncf %119 : vector<32x256xf32> to vector<32x256xbf16>
    %c1_82 = arith.constant 1 : index
    %c0_83 = arith.constant 0 : index
    %c0_84 = arith.constant 0 : index
    %121 = vector.load %arg14[%c1_82, %c0_83, %c0_84] : memref<3x256x256xbf16, #tpu.memory_space<vmem>>, vector<1x256x256xbf16>
    %122 = vector.shape_cast %121 : vector<1x256x256xbf16> to vector<256x256xbf16>
    %cst_85 = arith.constant dense<0.000000e+00> : vector<32x256xf32>
    %123 = tpu.matmul %120, %122, %cst_85 {dimension_numbers = #tpu.dot_dimension_numbers<[1], [0], [0], [1], [0, 0, 1, 1], [], []>} : vector<32x256xbf16>, vector<256x256xbf16>, vector<32x256xf32> -> vector<32x256xf32>
    %124 = arith.addf %118, %123 : vector<32x256xf32>
    %125 = vector.extract_strided_slice %111 {offsets = [64, 0], sizes = [32, 256], strides = [1, 1]} : vector<96x256xf32> to vector<32x256xf32>
    %126 = arith.truncf %125 : vector<32x256xf32> to vector<32x256xbf16>
    %c2_86 = arith.constant 2 : index
    %c0_87 = arith.constant 0 : index
    %c0_88 = arith.constant 0 : index
    %127 = vector.load %arg14[%c2_86, %c0_87, %c0_88] : memref<3x256x256xbf16, #tpu.memory_space<vmem>>, vector<1x256x256xbf16>
    %128 = vector.shape_cast %127 : vector<1x256x256xbf16> to vector<256x256xbf16>
    %cst_89 = arith.constant dense<0.000000e+00> : vector<32x256xf32>
    %129 = tpu.matmul %126, %128, %cst_89 {dimension_numbers = #tpu.dot_dimension_numbers<[1], [0], [0], [1], [0, 0, 1, 1], [], []>} : vector<32x256xbf16>, vector<256x256xbf16>, vector<32x256xf32> -> vector<32x256xf32>
    %130 = arith.addf %124, %129 : vector<32x256xf32>
    %c0_90 = arith.constant 0 : index
    %c0_91 = arith.constant 0 : index
    %131 = vector.load %arg15[%c0_90, %c0_91] : memref<1x256xf32, #tpu.memory_space<vmem>>, vector<1x256xf32>
    %132 = vector.broadcast %131 : vector<1x256xf32> to vector<32x256xf32>
    %133 = arith.addf %130, %132 : vector<32x256xf32>
    %cst_92 = arith.constant 0.000000e+00 : f32
    %134 = vector.broadcast %cst_92 : f32 to vector<32x256xf32>
    %135 = arith.maximumf %133, %134 : vector<32x256xf32>
    %136 = arith.truncf %135 : vector<32x256xf32> to vector<32x256xbf16>
    %c0_93 = arith.constant 0 : index
    %c0_94 = arith.constant 0 : index
    %137 = vector.load %arg16[%c0_93, %c0_94] : memref<192x32xbf16, #tpu.memory_space<vmem>>, vector<192x32xbf16>
    %cst_95 = arith.constant dense<0.000000e+00> : vector<192x256xf32>
    %138 = tpu.matmul %137, %136, %cst_95 {dimension_numbers = #tpu.dot_dimension_numbers<[1], [0], [0], [1], [0, 0, 1, 1], [], []>} : vector<192x32xbf16>, vector<32x256xbf16>, vector<192x256xf32> -> vector<192x256xf32>
    %cst_96 = arith.constant 0.000000e+00 : f32
    %139 = vector.broadcast %cst_96 : f32 to vector<64x32xf32>
    %140 = vector.extract_strided_slice %138 {offsets = [0, 0], sizes = [64, 256], strides = [1, 1]} : vector<192x256xf32> to vector<64x256xf32>
    %141 = arith.truncf %140 : vector<64x256xf32> to vector<64x256xbf16>
    %c0_97 = arith.constant 0 : index
    %c0_98 = arith.constant 0 : index
    %c0_99 = arith.constant 0 : index
    %142 = vector.load %arg17[%c0_97, %c0_98, %c0_99] : memref<3x256x32xbf16, #tpu.memory_space<vmem>>, vector<1x256x32xbf16>
    %143 = vector.shape_cast %142 : vector<1x256x32xbf16> to vector<256x32xbf16>
    %cst_100 = arith.constant dense<0.000000e+00> : vector<64x32xf32>
    %144 = tpu.matmul %141, %143, %cst_100 {dimension_numbers = #tpu.dot_dimension_numbers<[1], [0], [0], [1], [0, 0, 1, 1], [], []>} : vector<64x256xbf16>, vector<256x32xbf16>, vector<64x32xf32> -> vector<64x32xf32>
    %145 = arith.addf %139, %144 : vector<64x32xf32>
    %146 = vector.extract_strided_slice %138 {offsets = [64, 0], sizes = [64, 256], strides = [1, 1]} : vector<192x256xf32> to vector<64x256xf32>
    %147 = arith.truncf %146 : vector<64x256xf32> to vector<64x256xbf16>
    %c1_101 = arith.constant 1 : index
    %c0_102 = arith.constant 0 : index
    %c0_103 = arith.constant 0 : index
    %148 = vector.load %arg17[%c1_101, %c0_102, %c0_103] : memref<3x256x32xbf16, #tpu.memory_space<vmem>>, vector<1x256x32xbf16>
    %149 = vector.shape_cast %148 : vector<1x256x32xbf16> to vector<256x32xbf16>
    %cst_104 = arith.constant dense<0.000000e+00> : vector<64x32xf32>
    %150 = tpu.matmul %147, %149, %cst_104 {dimension_numbers = #tpu.dot_dimension_numbers<[1], [0], [0], [1], [0, 0, 1, 1], [], []>} : vector<64x256xbf16>, vector<256x32xbf16>, vector<64x32xf32> -> vector<64x32xf32>
    %151 = arith.addf %145, %150 : vector<64x32xf32>
    %152 = vector.extract_strided_slice %138 {offsets = [128, 0], sizes = [64, 256], strides = [1, 1]} : vector<192x256xf32> to vector<64x256xf32>
    %153 = arith.truncf %152 : vector<64x256xf32> to vector<64x256xbf16>
    %c2_105 = arith.constant 2 : index
    %c0_106 = arith.constant 0 : index
    %c0_107 = arith.constant 0 : index
    %154 = vector.load %arg17[%c2_105, %c0_106, %c0_107] : memref<3x256x32xbf16, #tpu.memory_space<vmem>>, vector<1x256x32xbf16>
    %155 = vector.shape_cast %154 : vector<1x256x32xbf16> to vector<256x32xbf16>
    %cst_108 = arith.constant dense<0.000000e+00> : vector<64x32xf32>
    %156 = tpu.matmul %153, %155, %cst_108 {dimension_numbers = #tpu.dot_dimension_numbers<[1], [0], [0], [1], [0, 0, 1, 1], [], []>} : vector<64x256xbf16>, vector<256x32xbf16>, vector<64x32xf32> -> vector<64x32xf32>
    %157 = arith.addf %151, %156 : vector<64x32xf32>
    %c0_109 = arith.constant 0 : index
    %c0_110 = arith.constant 0 : index
    %158 = vector.load %arg18[%c0_109, %c0_110] : memref<1x32xf32, #tpu.memory_space<vmem>>, vector<1x32xf32>
    %159 = vector.broadcast %158 : vector<1x32xf32> to vector<64x32xf32>
    %160 = arith.addf %157, %159 : vector<64x32xf32>
    %cst_111 = arith.constant 0.000000e+00 : f32
    %161 = vector.broadcast %cst_111 : f32 to vector<64x32xf32>
    %162 = arith.subf %161, %160 : vector<64x32xf32>
    %163 = math.exp %162 : vector<64x32xf32>
    %cst_112 = arith.constant 1.000000e+00 : f32
    %164 = vector.broadcast %cst_112 : f32 to vector<64x32xf32>
    %165 = arith.addf %164, %163 : vector<64x32xf32>
    %cst_113 = arith.constant 1.000000e+00 : f32
    %166 = vector.broadcast %cst_113 : f32 to vector<64x32xf32>
    %167 = arith.divf %166, %165 : vector<64x32xf32>
    %c0_114 = arith.constant 0 : index
    %c0_115 = arith.constant 0 : index
    %168 = vector.load %arg19[%c0_114, %c0_115] : memref<64x32xf32, #tpu.memory_space<vmem>>, vector<64x32xf32>
    tpu.vector_store %arg19[%c0_114, %c0_115], %167 {strides = array<i32>} : memref<64x32xf32, #tpu.memory_space<vmem>>, vector<64x32xf32>,
    return
  }
}

</mosaic_0001>

<bundles_post_ra>
// kernel: forward.1
= control target key start
LH: loop header
LB: loop body
LE: loop exit
PB: predicated region body
PF: predicated region fallthrough
CT: control target
= control target key end

     0   :  { %s7735_s0 = inlined_call_operand.hbm [shape: f32[64,32], index: 0, kind: input, shape index: {}]   ;;  %s7736_s1 = inlined_call_operand.vmem [shape: bf16[96,64], index: 1, kind: input, shape index: {}]   ;;  %s7737_s2 = inlined_call_operand.vmem [shape: bf16[3,32,256], index: 2, kind: input, shape index: {}]   ;;  %s7738_s3 = inlined_call_operand.vmem [shape: f32[1,256], index: 3, kind: input, shape index: {}]   ;;  %s7739_s4 = inlined_call_operand.vmem [shape: bf16[48,32], index: 4, kind: input, shape index: {}]   ;;  %s7740_s5 = inlined_call_operand.vmem [shape: bf16[3,256,256], index: 5, kind: input, shape index: {}]   ;;  %s7741_s6 = inlined_call_operand.vmem [shape: f32[1,256], index: 6, kind: input, shape index: {}]   ;;  %s7742_s7 = inlined_call_operand.vmem [shape: bf16[24,16], index: 7, kind: input, shape index: {}]   ;;  %s7743_s8 = inlined_call_operand.hbm [shape: bf16[3,256,256], index: 8, kind: input, shape index: {}]   ;;  %s7744_s9 = inlined_call_operand.vmem [shape: f32[1,256], index: 9, kind: input, shape index: {}]   ;;  %s7745_s10 = inlined_call_operand.vmem [shape: bf16[48,8], index: 10, kind: input, shape index: {}]   ;;  %s7746_s11 = inlined_call_operand.hbm [shape: bf16[3,256,256], index: 11, kind: input, shape index: {}]   ;;  %s7747_s12 = inlined_call_operand.vmem [shape: f32[1,256], index: 12, kind: input, shape index: {}]   ;;  %s7748_s13 = inlined_call_operand.vmem [shape: bf16[96,16], index: 13, kind: input, shape index: {}]   ;;  %s7749_s14 = inlined_call_operand.hbm [shape: bf16[3,256,256], index: 14, kind: input, shape index: {}]   ;;  %s7750_s15 = inlined_call_operand.vmem [shape: f32[1,256], index: 15, kind: input, shape index: {}]   ;;  %s7751_s16 = inlined_call_operand.vmem [shape: bf16[192,32], index: 16, kind: input, shape index: {}]   ;;  %s7752_s17 = inlined_call_operand.vmem [shape: bf16[3,256,32], index: 17, kind: input, shape index: {}]   ;;  %s7753_s18 = inlined_call_operand.vmem [shape: f32[1,32], index: 18, kind: input, shape index: {}]   ;;  %s7754_s19 = inlined_call_operand.hbm [shape: f32[64,32], index: 19, kind: output, shape index: {}]  }
   0x1   :  { %7759 = sst [smem:[#allocation15_spill]] %s7735_s0 }
   0x2   :  { %7760 = sst [smem:[#allocation16_spill]] %s7736_s1 }
   0x3   :  { %7761 = sst [smem:[#allocation17_spill]] %s7737_s2 }
   0x4   :  { %7762 = sst [smem:[#allocation18_spill]] %s7738_s3 }
   0x5   :  { %7763 = sst [smem:[#allocation19_spill]] %s7754_s19 }
   0x6   :  { %24 = vsyncpa [#allocation3], 0 }
   0x7   :  { %25 = vsyncpa [#allocation6], 0 }
   0x8   :  { %26 = vsyncpa [#allocation9], 0 }
   0x9   :  { %27 = vsyncpa [#allocation4], 0  ;;  %s6647_s0 = smov [#allocation5]   ;;  %s6648_s20 = smov [#allocation2]  }
   0xa   :  { %s59_s30 = sshll.u32 %s6647_s0, 4  ;;  %s33_s21 = sshll.u32 %s6648_s20, 4  ;;  %s60_s30 = int_to_ptr.vmem [resolvable:$true] %s59_s30  ;;  %s6755_s21 = int_to_ptr.vmem [resolvable:$true] %s33_s21 }
   0xb   :  { %s6529_s2 = scalar_lea.hbm %s7743_s8, 12288 }
   0xc   :  { %p6530_p0 = scmp.ne.s32.totalorder %s7743_s8, %s6529_s2  ;;  %p6533_p1 = scmp.lt.u32.totalorder %s6529_s2, %s7743_s8 }
   0xe   :  { %p6535_p2 = pnand %p6533_p1, %p6530_p0 }
  0x10   :  { %6538 = shalt.err (!%p6535_p2)
}
  0x11   :  { %s6539_s26 = scalar_lea.vmem %s60_s30, 12288  ;;  %p6544_p4 = scmp.lt.s32.totalorder %s60_s30, %s60_s30 }
  0x12   :  { %p6540_p3 = scmp.ne.s32.totalorder %s60_s30, %s6539_s26  ;;  %p6545_p5 = scmp.lt.s32.totalorder %s6539_s26, %s6539_s26 }
  0x14   :  { %p6546_p6 = por %p6545_p5, %p6544_p4 }
  0x16   :  { %p6547_p7 = pnand %p6546_p6, %p6540_p3 }
  0x18   :  { %6550 = shalt.err (!%p6547_p7)
}
  0x19   :  { %s6649_s27 = smov 128   ;;  %s6650_s28 = smov 8  }
  0x1a   :  { %65 = dma.hbm_to_vmem [thread:$0]  %s7743_s8, 12288, %s60_s30, [#allocation6], %s6649_s27, %s6649_s27, %s6650_s28  }
  0x1b   :  { %s7764_s22 = sld [smem:[#allocation15_spill]] }
  0x21   :  { %s6551_s2 = scalar_lea.hbm %s7764_s22, 1024 }
  0x22   :  { %p6552_p8 = scmp.ne.s32.totalorder %s7764_s22, %s6551_s2  ;;  %p6555_p9 = scmp.lt.u32.totalorder %s6551_s2, %s7764_s22 }
  0x24   :  { %p6557_p10 = pnand %p6555_p9, %p6552_p8 }
  0x26   :  { %6560 = shalt.err (!%p6557_p10)
}
  0x27   :  { %s6561_s26 = scalar_lea.vmem %s6755_s21, 1024  ;;  %p6566_p12 = scmp.lt.s32.totalorder %s6755_s21, %s6755_s21 }
  0x28   :  { %p6562_p11 = scmp.ne.s32.totalorder %s6755_s21, %s6561_s26  ;;  %p6567_p13 = scmp.lt.s32.totalorder %s6561_s26, %s6561_s26 }
  0x2a   :  { %p6568_p0 = por %p6567_p13, %p6566_p12 }
  0x2c   :  { %p6569_p1 = pnand %p6568_p0, %p6562_p11 }
  0x2e   :  { %6572 = shalt.err (!%p6569_p1)
}
  0x2f   :  { %39 = dma.hbm_to_vmem [thread:$0]  %s7764_s22, 1024, %s6755_s21, [#allocation3], %s6649_s27, %s6649_s27, %s6650_s28  }
  0x30   :  { %s6651_s29 = smov [#allocation7]   ;;  %s6652_s20 = smov [#allocation8]  }
  0x31   :  { %s75_s0 = sshll.u32 %s6651_s29, 4  ;;  %s91_s1 = sshll.u32 %s6652_s20, 4  ;;  %s76_s0 = int_to_ptr.vmem [resolvable:$true] %s75_s0  ;;  %s6792_s1 = int_to_ptr.vmem [resolvable:$true] %s91_s1 }
  0x32   :  { %s6573_s24 = scalar_lea.hbm %s7746_s11, 12288 }
  0x33   :  { %p6574_p2 = scmp.ne.s32.totalorder %s7746_s11, %s6573_s24  ;;  %p6577_p3 = scmp.lt.u32.totalorder %s6573_s24, %s7746_s11 }
  0x35   :  { %p6579_p4 = pnand %p6577_p3, %p6574_p2 }
  0x37   :  { %6582 = shalt.err (!%p6579_p4)
}
  0x38   :  { %s6583_s21 = scalar_lea.vmem %s76_s0, 12288  ;;  %p6588_p6 = scmp.lt.s32.totalorder %s76_s0, %s76_s0 }
  0x39   :  { %p6584_p5 = scmp.ne.s32.totalorder %s76_s0, %s6583_s21  ;;  %p6589_p7 = scmp.lt.s32.totalorder %s6583_s21, %s6583_s21 }
  0x3b   :  { %p6590_p8 = por %p6589_p7, %p6588_p6 }
  0x3d   :  { %p6591_p9 = pnand %p6590_p8, %p6584_p5 }
  0x3f   :  { %6594 = shalt.err (!%p6591_p9)
}
  0x40   :  { %81 = dma.hbm_to_vmem [thread:$0]  %s7746_s11, 12288, %s76_s0, [#allocation6], %s6649_s27, %s6649_s27, %s6650_s28  }
  0x41   :  { %s6595_s19 = scalar_lea.hbm %s7749_s14, 12288 }
  0x42   :  { %p6596_p10 = scmp.ne.s32.totalorder %s7749_s14, %s6595_s19  ;;  %p6599_p11 = scmp.lt.u32.totalorder %s6595_s19, %s7749_s14 }
  0x44   :  { %p6601_p12 = pnand %p6599_p11, %p6596_p10 }
  0x46   :  { %6604 = shalt.err (!%p6601_p12)
}
  0x47   :  { %s6605_s25 = scalar_lea.vmem %s6792_s1, 12288  ;;  %p6610_p0 = scmp.lt.s32.totalorder %s6792_s1, %s6792_s1 }
  0x48   :  { %p6606_p13 = scmp.ne.s32.totalorder %s6792_s1, %s6605_s25  ;;  %p6611_p1 = scmp.lt.s32.totalorder %s6605_s25, %s6605_s25 }
  0x4a   :  { %p6612_p2 = por %p6611_p1, %p6610_p0 }
  0x4c   :  { %p6613_p3 = pnand %p6612_p2, %p6606_p13 }
  0x4e   :  { %6616 = shalt.err (!%p6613_p3)
}
  0x4f   :  { %97 = dma.hbm_to_vmem [thread:$0]  %s7749_s14, 12288, %s6792_s1, [#allocation9], %s6649_s27, %s6649_s27, %s6650_s28  }
  0x50   :  { %6639 = dma.done.wait [#allocation3], 1024  }
  0x51   :  { %6640 = vsyncadd [#allocation3], 4294966272 }
  0x52   :  { %6641 = dma.done.wait [#allocation6], 24576  }
  0x53   :  { %6642 = vsyncadd [#allocation6], 4294942720 }
  0x54   :  { %6643 = dma.done.wait [#allocation9], 12288  }
  0x55   :  { %6644 = vsyncadd [#allocation9], 4294955008  ;;  %v119_v0 = vld [vmem:[#allocation2] sm:$0xff]  ;;  %v120_v1 = vld [vmem:[#allocation2 + $0x8] sm:$0xff]  ;;  %vm173_vm0 = vcmask 523264   ;;  %s7765_s21 = sld [smem:[#allocation16_spill]]  ;;  %v541_v49 = vlaneseq }
  0x56   :  { %v121_v2 = vld [vmem:[#allocation2 + $0x10] sm:$0xff]  ;;  %v127_v3 = vpack.c.bf16 %v120_v1, %v119_v0  ;;  %v122_v4 = vld [vmem:[#allocation2 + $0x18] sm:$0xff]  ;;  %v123_v6 = vld [vmem:[#allocation2 + $0x20] sm:$0xff]  ;;  %s7766_s11 = sld [smem:[#allocation17_spill]]  ;;  %v6653_v22 = vmov 0   ;;  %vm306_vm1 = vcmask 261120  }
  0x57   :  { %v128_v5 = vpack.c.bf16 %v122_v4, %v121_v2  ;;  %v124_v7 = vld [vmem:[#allocation2 + $0x28] sm:$0xff]  ;;  %v125_v10 = vld [vmem:[#allocation2 + $0x30] sm:$0xff]  ;;  %v126_v11 = vld [vmem:[#allocation2 + $0x38] sm:$0xff]  ;;  %v542_v50 = vshrl.u32 %v541_v49, 7  ;;  %s7767_s8 = sld [smem:[#allocation18_spill]]  ;;  %vm1414_vm2 = vcmask 130048  }
  0x58   :  { %5739 = vmatprep.subr.bf16.mxu0 %v127_v3  ;;  %5759 = vmatprep.subr.bf16.mxu1 %v127_v3  ;;  %v129_v9 = vpack.c.bf16 %v124_v7, %v123_v6  ;;  %v130_v13 = vpack.c.bf16 %v126_v11, %v125_v10  ;;  %v5886_v49 = vld [vmem:[%s7740_s5 + $0x1c0] ss:$8 sps:$4 sm:$0xff]   ;;  %vm2230_vm3 = vcmask 1043456   ;;  %vm2220_vm4 = vcmask 64512  }
  0x59   :  { %5740 = vmatpush3.bf16.msra.mxu0 %v127_v3  ;;  %5763 = vmatpush3.bf16.msra.mxu1 %v127_v3  ;;  %v6903_v51 = vsub.s32 0, %v542_v50  ;;  %v6908_v53 = vsub.s32 1, %v542_v50  ;;  %v5891_v50 = vld [vmem:[%s7740_s5 + $0x1d4] ss:$8 sps:$4 sm:$0xff]  }
  0x5a   :  { %5741 = vmatprep.subr.bf16.mxu0 %v128_v5  ;;  %5760 = vmatprep.subr.bf16.mxu1 %v128_v5 }
  0x5b   :  { %v5823_v8 = vld [vmem:[%s7765_s21] sm:$0xff]   ;;  %v5824_v14 = vld [vmem:[%s7765_s21 + $0x8] sm:$0xff]   ;;  %v5825_v16 = vld [vmem:[%s7765_s21 + $0x10] sm:$0xff]  }
  0x5c   :  { %5747 = vmatprep.mubr.msk.bf16.mxu0 %vm173_vm0, %v5823_v8  ;;  %v5827_v12 = vld [vmem:[%s7765_s21 + $0x20] sm:$0xff]   ;;  %v5828_v15 = vld [vmem:[%s7765_s21 + $0x28] sm:$0xff]   ;;  %v5826_v17 = vld [vmem:[%s7765_s21 + $0x18] sm:$0xff]  }
  0x5d   :  { %5742 = vmatpush3.bf16.msra.mxu0 %v128_v5  ;;  %5764 = vmatpush3.bf16.msra.mxu1 %v128_v5  ;;  %v5829_v18 = vld [vmem:[%s7766_s11 + $0x20] ss:$8 sps:$4 sm:$0xff]   ;;  %v5831_v19 = vld [vmem:[%s7766_s11 + $0x24] ss:$8 sps:$4 sm:$0xff]   ;;  %v5834_v20 = vld [vmem:[%s7766_s11 + $0x34] ss:$8 sps:$4 sm:$0xff]  }
  0x5e   :  { %5743 = vmatprep.subr.bf16.mxu0 %v129_v9  ;;  %5761 = vmatprep.subr.bf16.mxu1 %v129_v9  ;;  %v5832_v21 = vld [vmem:[%s7766_s11 + $0x30] ss:$8 sps:$4 sm:$0xff]   ;;  %v5837_v23 = vld [vmem:[%s7766_s11 + $0x4] ss:$8 sps:$4 sm:$0xff]   ;;  %v5835_v41 = vld [vmem:[%s7766_s11] ss:$8 sps:$4 sm:$0xff]  }
  0x5f   :  { %5755 = vmatprep.mubr.msk.bf16.mxu1 %vm173_vm0, %v5827_v12  ;;  %v5840_v43 = vld [vmem:[%s7766_s11 + $0x14] ss:$8 sps:$4 sm:$0xff]   ;;  %v5838_v44 = vld [vmem:[%s7766_s11 + $0x10] ss:$8 sps:$4 sm:$0xff]   ;;  %v5843_v45 = vld [vmem:[%s7766_s11 + $0x44] ss:$8 sps:$4 sm:$0xff]  }
  0x60   :  { %v5841_v46 = vld [vmem:[%s7766_s11 + $0x40] ss:$8 sps:$4 sm:$0xff]   ;;  %v5846_v47 = vld [vmem:[%s7766_s11 + $0x54] ss:$8 sps:$4 sm:$0xff]   ;;  %v5844_v48 = vld [vmem:[%s7766_s11 + $0x50] ss:$8 sps:$4 sm:$0xff]  }
  0x61   :  { %5744 = vmatpush3.bf16.msra.mxu0 %v129_v9  ;;  %5765 = vmatpush3.bf16.msra.mxu1 %v129_v9  ;;  %v539_v52 = vld [vmem:[%s7767_s8] sm:$0x3] }
  0x62   :  { %5745 = vmatprep.subr.bf16.mxu0 %v130_v13  ;;  %5762 = vmatprep.subr.bf16.mxu1 %v130_v13  ;;  %v544_v54 = vrot.slane %v539_v52, %v6903_v51  ;;  %v548_v55 = vrot.slane %v539_v52, %v6908_v53  ;;  %v5889_v52 = vld [vmem:[%s7740_s5 + $0x1d0] ss:$8 sps:$4 sm:$0xff]  }
  0x65   :  { %5746 = vmatpush3.bf16.msra.mxu0 %v130_v13  ;;  %5766 = vmatpush3.bf16.msra.mxu1 %v130_v13 }
  0x66   :  { %313 = vmatprep.subr.bf16.mxu1 %v5831_v19 }
  0x68   :  { %5748 = vmatmul.mubr.msk.bf16.vlgmr.msra.gmra.mrb[0].mxu0 %vm173_vm0, %v5824_v14  ;;  %5756 = vmatmul.mubr.msk.bf16.vlgmr.msra.gmra.mrb[0].mxu1 %vm173_vm0, %v5828_v15 }
  0x69   :  { %5751 = vmatprep.mubr.msk.bf16.mxu0 %vm173_vm0, %v5825_v16  ;;  %314 = vmatpush1.bf16.msra.mxu1 %v5829_v18 }
  0x6a   :  { %315 = vmatprep.subr.bf16.mxu1 %v5834_v20  ;;  %345 = vmatprep.mubr.bf16.mxu1 %v6653_v22  ;;  %v5852_v20 = vld [vmem:[%s7740_s5 + $0x104] ss:$8 sps:$4 sm:$0xff]  }
  0x6d   :  { %316 = vmatpush1.bf16.msra.mxu1 %v5832_v21  ;;  %v5847_v21 = vld [vmem:[%s7739_s4] sm:$0xff]  }
  0x6e   :  { %392 = vmatprep.subr.bf16.mxu1 %v5837_v23  ;;  %v5850_v23 = vld [vmem:[%s7740_s5 + $0x100] ss:$8 sps:$4 sm:$0xff]  }
  0x70   :  { %5752 = vmatmul.mubr.msk.bf16.gmra.mrb[4].mxu0 %vm173_vm0, %v5826_v17 }
  0x71   :  { %633 = vmatprep.mubr.bf16.mxu0 %v6653_v22 }
 0x13b   :  { %v5749_v24 = vpop.f32.mrb[0].mxu0  ;;  %v5757_v25 = vpop.f32.mrb[0].mxu1 }
 0x13c   :  { %v226_v26 = vpop.f32.mrb[1].mxu0  ;;  %v258_v27 = vpop.f32.mrb[1].mxu1 }
 0x13d   :  { %v5750_v28 = vpop.f32.mrb[2].mxu0  ;;  %v5758_v29 = vpop.f32.mrb[2].mxu1 }
 0x13e   :  { %v274_v30 = vpack.c.bf16 %v5750_v28, %v5749_v24  ;;  %v229_v31 = vpop.f32.mrb[3].mxu0  ;;  %v446_v32 = vpack.c.bf16 %v5758_v29, %v5757_v25  ;;  %v261_v33 = vpop.f32.mrb[3].mxu1  ;;  %v5855_v24 = vld [vmem:[%s7740_s5 + $0x114] ss:$8 sps:$4 sm:$0xff]   ;;  %v5853_v25 = vld [vmem:[%s7740_s5 + $0x110] ss:$8 sps:$4 sm:$0xff]  }
 0x13f   :  { %v273_v34 = vpack.c.bf16 %v229_v31, %v226_v26  ;;  %v445_v35 = vpack.c.bf16 %v261_v33, %v258_v27  ;;  %v5858_v26 = vld [vmem:[%s7740_s5 + $0x124] ss:$8 sps:$4 sm:$0xff]   ;;  %v5856_v28 = vld [vmem:[%s7740_s5 + $0x120] ss:$8 sps:$4 sm:$0xff]   ;;  %v5861_v29 = vld [vmem:[%s7740_s5 + $0x134] ss:$8 sps:$4 sm:$0xff]  }
 0x140   :  { %v5848_v27 = vld [vmem:[%s7739_s4 + $0x8] sm:$0xff]  }
 0x141   :  { %v5864_v31 = vld [vmem:[%s7740_s5 + $0x144] ss:$8 sps:$4 sm:$0xff]   ;;  %v5862_v33 = vld [vmem:[%s7740_s5 + $0x140] ss:$8 sps:$4 sm:$0xff]  }
 0x143   :  { %v5753_v36 = vpop.f32.mrb[4].mxu0 }
 0x144   :  { %v242_v37 = vpop.f32.mrb[5].mxu0 }
 0x145   :  { %v5754_v38 = vpop.f32.mrb[6].mxu0 }
 0x146   :  { %v280_v39 = vpack.c.bf16 %v5754_v38, %v5753_v36  ;;  %v245_v40 = vpop.f32.mrb[7].mxu0  ;;  %v5870_v36 = vld [vmem:[%s7740_s5 + $0x164] ss:$8 sps:$4 sm:$0xff]   ;;  %v5873_v38 = vld [vmem:[%s7740_s5 + $0x174] ss:$8 sps:$4 sm:$0xff]  }
 0x147   :  { %v279_v42 = vpack.c.bf16 %v245_v40, %v242_v37  ;;  %v5868_v37 = vld [vmem:[%s7740_s5 + $0x160] ss:$8 sps:$4 sm:$0xff]   ;;  %v5876_v40 = vld [vmem:[%s7740_s5 + $0x184] ss:$8 sps:$4 sm:$0xff]  }
 0x149   :  { %4977 = vmatmul.mubr.msk.bf16.vlgmr.msra.gmra.mrb[4].mxu1 %vm306_vm1, %v279_v42  ;;  %v5879_v42 = vld [vmem:[%s7740_s5 + $0x194] ss:$8 sps:$4 sm:$0xff]  }
 0x14a   :  { %355 = vmatprep.mubr.bf16.mxu1 %v6653_v22  ;;  %393 = vmatpush1.bf16.msra.mxu1 %v5835_v41  ;;  %v5874_v41 = vld [vmem:[%s7740_s5 + $0x180] ss:$8 sps:$4 sm:$0xff]  }
 0x14b   :  { %394 = vmatprep.subr.bf16.mxu1 %v5840_v43  ;;  %v5877_v43 = vld [vmem:[%s7740_s5 + $0x190] ss:$8 sps:$4 sm:$0xff]  }
 0x14e   :  { %395 = vmatpush1.bf16.msra.mxu1 %v5838_v44  ;;  %v5882_v44 = vld [vmem:[%s7740_s5 + $0x1a4] ss:$8 sps:$4 sm:$0xff]  }
 0x14f   :  { %478 = vmatprep.subr.bf16.mxu1 %v5843_v45  ;;  %v5880_v45 = vld [vmem:[%s7740_s5 + $0x1a0] ss:$8 sps:$4 sm:$0xff]  }
 0x151   :  { %4978 = vmatmul.mubr.msk.bf16.gmra.mrb[8].mxu1 %vm306_vm1, %v280_v39  ;;  %v5871_v39 = vld [vmem:[%s7740_s5 + $0x170] ss:$8 sps:$4 sm:$0xff]  }
 0x152   :  { %424 = vmatprep.mubr.bf16.mxu1 %v6653_v22 }
 0x159   :  { %4983 = vmatmul.mubr.msk.bf16.vlgmr.msra.gmra.mrb[4].mxu1 %vm306_vm1, %v273_v34  ;;  %v5867_v34 = vld [vmem:[%s7740_s5 + $0x154] ss:$8 sps:$4 sm:$0xff]  }
 0x15a   :  { %434 = vmatprep.mubr.bf16.mxu1 %v6653_v22  ;;  %479 = vmatpush1.bf16.msra.mxu1 %v5841_v46  ;;  %v5885_v46 = vld [vmem:[%s7740_s5 + $0x1b4] ss:$8 sps:$4 sm:$0xff]  }
 0x15b   :  { %480 = vmatprep.subr.bf16.mxu1 %v5846_v47  ;;  %v5883_v47 = vld [vmem:[%s7740_s5 + $0x1b0] ss:$8 sps:$4 sm:$0xff]  }
 0x15e   :  { %481 = vmatpush1.bf16.msra.mxu1 %v5844_v48  ;;  %v5888_v48 = vld [vmem:[%s7740_s5 + $0x1c4] ss:$8 sps:$4 sm:$0xff]  }
 0x161   :  { %4984 = vmatmul.mubr.msk.bf16.gmra.mrb[8].mxu1 %vm306_vm1, %v274_v30  ;;  %v5859_v30 = vld [vmem:[%s7740_s5 + $0x130] ss:$8 sps:$4 sm:$0xff]  }
 0x162   :  { %510 = vmatprep.mubr.bf16.mxu1 %v6653_v22 }
 0x169   :  { %4993 = vmatmul.mubr.msk.bf16.vlgmr.msra.gmra.mrb[4].mxu1 %vm306_vm1, %v445_v35  ;;  %v5865_v35 = vld [vmem:[%s7740_s5 + $0x150] ss:$8 sps:$4 sm:$0xff]  }
 0x16a   :  { %520 = vmatprep.mubr.bf16.mxu1 %v6653_v22 }
 0x171   :  { %4994 = vmatmul.mubr.msk.bf16.gmra.mrb[8].mxu1 %vm306_vm1, %v446_v32  ;;  %v5849_v32 = vld [vmem:[%s7739_s4 + $0x10] sm:$0xff]  }
 0x172   :  { %1453 = vmatprep.mubr.bf16.mxu1 %v6653_v22 }
 0x23c   :  { %v512_v56 = vpop.f32.mrb[4].mxu1 }
 0x23d   :  { %v551_v57 = vadd.f32 %v544_v54, %v512_v56  ;;  %v514_v58 = vpop.f32.mrb[5].mxu1  ;;  %v5897_v56 = vld [vmem:[%s7740_s5 + $0x1f4] ss:$8 sps:$4 sm:$0xff]  }
 0x23e   :  { %v552_v59 = vadd.f32 %v548_v55, %v514_v58  ;;  %v516_v60 = vpop.f32.mrb[6].mxu1  ;;  %v5900_v58 = vld [vmem:[%s7740_s5 + $0x4] ss:$8 sps:$4 sm:$0xff]  }
 0x23f   :  { %v553_v61 = vadd.f32 %v544_v54, %v516_v60  ;;  %v518_v62 = vpop.f32.mrb[7].mxu1  ;;  %v559_v0 = vmax.f32 %v551_v57, 0.0  ;;  %v5895_v57 = vld [vmem:[%s7740_s5 + $0x1f0] ss:$8 sps:$4 sm:$0xff]  }
 0x240   :  { %v554_v63 = vadd.f32 %v548_v55, %v518_v62  ;;  %v560_v2 = vmax.f32 %v552_v59, 0.0 }
 0x241   :  { %v561_v1 = vmax.f32 %v553_v61, 0.0 }
 0x242   :  { %v562_v3 = vmax.f32 %v554_v63, 0.0 }
 0x243   :  { %v567_v4 = vpack.c.bf16 %v561_v1, %v559_v0 }
 0x244   :  { %v568_v5 = vpack.c.bf16 %v562_v3, %v560_v2  ;;  %v522_v6 = vpop.f32.mrb[8].mxu1 }
 0x245   :  { %v555_v7 = vadd.f32 %v544_v54, %v522_v6  ;;  %v524_v8 = vpop.f32.mrb[9].mxu1 }
 0x246   :  { %v556_v9 = vadd.f32 %v548_v55, %v524_v8  ;;  %v526_v10 = vpop.f32.mrb[10].mxu1  ;;  %601 = vmatprep.subr.bf16.mxu0 %v568_v5  ;;  %v5903_v8 = vld [vmem:[%s7740_s5 + $0x14] ss:$8 sps:$4 sm:$0xff]  }
 0x247   :  { %v557_v11 = vadd.f32 %v544_v54, %v526_v10  ;;  %v528_v12 = vpop.f32.mrb[11].mxu1  ;;  %602 = vmatpush1.bf16.msra.mxu0 %v567_v4  ;;  %v563_v14 = vmax.f32 %v555_v7, 0.0  ;;  %v5892_v54 = vld [vmem:[%s7740_s5 + $0x1e0] ss:$8 sps:$4 sm:$0xff]  }
 0x248   :  { %v558_v13 = vadd.f32 %v548_v55, %v528_v12  ;;  %v564_v16 = vmax.f32 %v556_v9, 0.0  ;;  %v5894_v55 = vld [vmem:[%s7740_s5 + $0x1e4] ss:$8 sps:$4 sm:$0xff]   ;;  %v5898_v7 = vld [vmem:[%s7740_s5] ss:$8 sps:$4 sm:$0xff]  }
 0x249   :  { %v565_v15 = vmax.f32 %v557_v11, 0.0  ;;  %v5901_v9 = vld [vmem:[%s7740_s5 + $0x10] ss:$8 sps:$4 sm:$0xff]   ;;  %v5906_v11 = vld [vmem:[%s7740_s5 + $0x24] ss:$8 sps:$4 sm:$0xff]  }
 0x24a   :  { %v566_v17 = vmax.f32 %v558_v13, 0.0 }
 0x24b   :  { %v569_v18 = vpack.c.bf16 %v565_v15, %v563_v14 }
 0x24c   :  { %v570_v19 = vpack.c.bf16 %v566_v17, %v564_v16  ;;  %v5904_v16 = vld [vmem:[%s7740_s5 + $0x20] ss:$8 sps:$4 sm:$0xff]  }
 0x24e   :  { %603 = vmatprep.subr.bf16.mxu0 %v570_v19  ;;  %v5907_v19 = vld [vmem:[%s7740_s5 + $0x30] ss:$8 sps:$4 sm:$0xff]  }
 0x24f   :  { %604 = vmatpush1.bf16.msra.mxu0 %v569_v18  ;;  %v5909_v18 = vld [vmem:[%s7740_s5 + $0x34] ss:$8 sps:$4 sm:$0xff]  }
 0x250   :  { %893 = vmatprep.subr.bf16.mxu0 %v5852_v20  ;;  %v5912_v20 = vld [vmem:[%s7740_s5 + $0x44] ss:$8 sps:$4 sm:$0xff]  }
 0x252   :  { %4998 = vmatmul.mubr.msk.bf16.vlgmr.msra.gmra.mrb[8].mxu0 %vm306_vm1, %v5847_v21  ;;  %v5910_v21 = vld [vmem:[%s7740_s5 + $0x40] ss:$8 sps:$4 sm:$0xff]  }
 0x253   :  { %643 = vmatprep.mubr.bf16.mxu0 %v6653_v22  ;;  %894 = vmatpush1.bf16.msra.mxu0 %v5850_v23  ;;  %v5915_v23 = vld [vmem:[%s7740_s5 + $0x54] ss:$8 sps:$4 sm:$0xff]  }
 0x254   :  { %895 = vmatprep.subr.bf16.mxu0 %v5855_v24  ;;  %v5913_v24 = vld [vmem:[%s7740_s5 + $0x50] ss:$8 sps:$4 sm:$0xff]  }
 0x257   :  { %896 = vmatpush1.bf16.msra.mxu0 %v5853_v25  ;;  %v5918_v25 = vld [vmem:[%s7740_s5 + $0x64] ss:$8 sps:$4 sm:$0xff]  }
 0x258   :  { %897 = vmatprep.subr.bf16.mxu0 %v5858_v26  ;;  %v5916_v26 = vld [vmem:[%s7740_s5 + $0x60] ss:$8 sps:$4 sm:$0xff]  }
 0x25a   :  { %4999 = vmatmul.mubr.msk.bf16.gmra.mrb[12].mxu0 %vm306_vm1, %v5848_v27  ;;  %v5921_v27 = vld [vmem:[%s7740_s5 + $0x74] ss:$8 sps:$4 sm:$0xff]  }
 0x25b   :  { %653 = vmatprep.mubr.bf16.mxu0 %v6653_v22  ;;  %898 = vmatpush1.bf16.msra.mxu0 %v5856_v28  ;;  %v5919_v28 = vld [vmem:[%s7740_s5 + $0x70] ss:$8 sps:$4 sm:$0xff]  }
 0x25c   :  { %899 = vmatprep.subr.bf16.mxu0 %v5861_v29  ;;  %v5924_v29 = vld [vmem:[%s7740_s5 + $0x84] ss:$8 sps:$4 sm:$0xff]  }
 0x25f   :  { %900 = vmatpush1.bf16.msra.mxu0 %v5859_v30  ;;  %v5922_v30 = vld [vmem:[%s7740_s5 + $0x80] ss:$8 sps:$4 sm:$0xff]  }
 0x260   :  { %901 = vmatprep.subr.bf16.mxu0 %v5864_v31  ;;  %v5927_v31 = vld [vmem:[%s7740_s5 + $0x94] ss:$8 sps:$4 sm:$0xff]  }
 0x262   :  { %5000 = vmatmul.mubr.msk.bf16.gmra.mrb[16].mxu0 %vm306_vm1, %v5849_v32  ;;  %v5925_v32 = vld [vmem:[%s7740_s5 + $0x90] ss:$8 sps:$4 sm:$0xff]  }
 0x263   :  { %902 = vmatpush1.bf16.msra.mxu0 %v5862_v33  ;;  %v5930_v33 = vld [vmem:[%s7740_s5 + $0xa4] ss:$8 sps:$4 sm:$0xff]  }
 0x264   :  { %903 = vmatprep.subr.bf16.mxu0 %v5867_v34  ;;  %v5928_v34 = vld [vmem:[%s7740_s5 + $0xa0] ss:$8 sps:$4 sm:$0xff]  }
 0x267   :  { %904 = vmatpush1.bf16.msra.mxu0 %v5865_v35  ;;  %v5933_v35 = vld [vmem:[%s7740_s5 + $0xb4] ss:$8 sps:$4 sm:$0xff]  }
 0x268   :  { %905 = vmatprep.subr.bf16.mxu0 %v5870_v36  ;;  %v5931_v36 = vld [vmem:[%s7740_s5 + $0xb0] ss:$8 sps:$4 sm:$0xff]  }
 0x26b   :  { %906 = vmatpush1.bf16.msra.mxu0 %v5868_v37  ;;  %v5936_v37 = vld [vmem:[%s7740_s5 + $0xc4] ss:$8 sps:$4 sm:$0xff]  }
 0x26c   :  { %907 = vmatprep.subr.bf16.mxu0 %v5873_v38  ;;  %v5934_v38 = vld [vmem:[%s7740_s5 + $0xc0] ss:$8 sps:$4 sm:$0xff]  }
 0x26f   :  { %908 = vmatpush1.bf16.msra.mxu0 %v5871_v39  ;;  %v5939_v39 = vld [vmem:[%s7740_s5 + $0xd4] ss:$8 sps:$4 sm:$0xff]  }
 0x270   :  { %909 = vmatprep.subr.bf16.mxu0 %v5876_v40  ;;  %v5937_v40 = vld [vmem:[%s7740_s5 + $0xd0] ss:$8 sps:$4 sm:$0xff]  }
 0x273   :  { %910 = vmatpush1.bf16.msra.mxu0 %v5874_v41  ;;  %v5942_v41 = vld [vmem:[%s7740_s5 + $0xe4] ss:$8 sps:$4 sm:$0xff]  }
 0x274   :  { %911 = vmatprep.subr.bf16.mxu0 %v5879_v42  ;;  %v5940_v42 = vld [vmem:[%s7740_s5 + $0xe0] ss:$8 sps:$4 sm:$0xff]  }
 0x277   :  { %912 = vmatpush1.bf16.msra.mxu0 %v5877_v43  ;;  %v5945_v43 = vld [vmem:[%s7740_s5 + $0xf4] ss:$8 sps:$4 sm:$0xff]  }
 0x278   :  { %913 = vmatprep.subr.bf16.mxu0 %v5882_v44  ;;  %v5943_v44 = vld [vmem:[%s7740_s5 + $0xf0] ss:$8 sps:$4 sm:$0xff]  }
 0x27b   :  { %914 = vmatpush1.bf16.msra.mxu0 %v5880_v45  ;;  %v5948_v45 = vld [vmem:[%s7740_s5 + $0x204] ss:$8 sps:$4 sm:$0xff]  }
 0x27c   :  { %915 = vmatprep.subr.bf16.mxu0 %v5885_v46  ;;  %v5946_v46 = vld [vmem:[%s7740_s5 + $0x200] ss:$8 sps:$4 sm:$0xff]  }
 0x27f   :  { %916 = vmatpush1.bf16.msra.mxu0 %v5883_v47  ;;  %v5951_v47 = vld [vmem:[%s7740_s5 + $0x214] ss:$8 sps:$4 sm:$0xff]  }
 0x280   :  { %917 = vmatprep.subr.bf16.mxu0 %v5888_v48  ;;  %v5949_v48 = vld [vmem:[%s7740_s5 + $0x210] ss:$8 sps:$4 sm:$0xff]  }
 0x283   :  { %918 = vmatpush1.bf16.msra.mxu0 %v5886_v49  ;;  %v5954_v49 = vld [vmem:[%s7740_s5 + $0x224] ss:$8 sps:$4 sm:$0xff]  }
 0x284   :  { %919 = vmatprep.subr.bf16.mxu0 %v5891_v50  ;;  %v5952_v50 = vld [vmem:[%s7740_s5 + $0x220] ss:$8 sps:$4 sm:$0xff]  }
 0x287   :  { %920 = vmatpush1.bf16.msra.mxu0 %v5889_v52  ;;  %v5957_v52 = vld [vmem:[%s7740_s5 + $0x234] ss:$8 sps:$4 sm:$0xff]  }
 0x288   :  { %921 = vmatprep.subr.bf16.mxu0 %v5894_v55  ;;  %v5960_v55 = vld [vmem:[%s7740_s5 + $0x244] ss:$8 sps:$4 sm:$0xff]  }
 0x28b   :  { %922 = vmatpush1.bf16.msra.mxu0 %v5892_v54  ;;  %v5955_v54 = vld [vmem:[%s7740_s5 + $0x230] ss:$8 sps:$4 sm:$0xff]  }
 0x28c   :  { %923 = vmatprep.subr.bf16.mxu0 %v5897_v56  ;;  %v5958_v56 = vld [vmem:[%s7740_s5 + $0x240] ss:$8 sps:$4 sm:$0xff]  }
 0x28f   :  { %924 = vmatpush1.bf16.msra.mxu0 %v5895_v57  ;;  %v5963_v57 = vld [vmem:[%s7740_s5 + $0x254] ss:$8 sps:$4 sm:$0xff]  }
 0x290   :  { %1096 = vmatprep.subr.bf16.mxu0 %v5900_v58  ;;  %v5961_v58 = vld [vmem:[%s7740_s5 + $0x250] ss:$8 sps:$4 sm:$0xff]  }
 0x325   :  { %v7025_v59 = vpop.f32.mrb[8].mxu0 }
 0x326   :  { %v637_v60 = vpop.f32.mrb[9].mxu0 }
 0x327   :  { %v7027_v61 = vpop.f32.mrb[10].mxu0 }
 0x328   :  { %v664_v62 = vpack.c.bf16 %v7027_v61, %v7025_v59  ;;  %v641_v63 = vpop.f32.mrb[11].mxu0  ;;  %v5966_v59 = vld [vmem:[%s7740_s5 + $0x264] ss:$8 sps:$4 sm:$0xff]   ;;  %v5969_v61 = vld [vmem:[%s7740_s5 + $0x274] ss:$8 sps:$4 sm:$0xff]  }
 0x329   :  { %v665_v0 = vpack.c.bf16 %v641_v63, %v637_v60  ;;  %v5964_v60 = vld [vmem:[%s7740_s5 + $0x260] ss:$8 sps:$4 sm:$0xff]   ;;  %v5972_v63 = vld [vmem:[%s7740_s5 + $0x284] ss:$8 sps:$4 sm:$0xff]  }
 0x32d   :  { %v645_v1 = vpop.f32.mrb[12].mxu0 }
 0x32e   :  { %v647_v2 = vpop.f32.mrb[13].mxu0 }
 0x32f   :  { %v649_v3 = vpop.f32.mrb[14].mxu0 }
 0x330   :  { %v698_v4 = vpack.c.bf16 %v649_v3, %v645_v1  ;;  %v651_v5 = vpop.f32.mrb[15].mxu0  ;;  %v5975_v1 = vld [vmem:[%s7740_s5 + $0x294] ss:$8 sps:$4 sm:$0xff]   ;;  %v5978_v3 = vld [vmem:[%s7740_s5 + $0x2a4] ss:$8 sps:$4 sm:$0xff]  }
 0x331   :  { %v699_v6 = vpack.c.bf16 %v651_v5, %v647_v2  ;;  %v5973_v2 = vld [vmem:[%s7740_s5 + $0x290] ss:$8 sps:$4 sm:$0xff]   ;;  %v5981_v5 = vld [vmem:[%s7740_s5 + $0x2b4] ss:$8 sps:$4 sm:$0xff]  }
 0x333   :  { %925 = vmatprep.mubr.bf16.mxu0 %v699_v6  ;;  %v5979_v6 = vld [vmem:[%s7740_s5 + $0x2b0] ss:$8 sps:$4 sm:$0xff]  }
 0x334   :  { %926 = vmatmul.mubr.bf16.vlgmr.msra.gmra.mrb[20].mxu0 %v698_v4  ;;  %v5976_v4 = vld [vmem:[%s7740_s5 + $0x2a0] ss:$8 sps:$4 sm:$0xff]  }
 0x335   :  { %1097 = vmatpush1.bf16.msra.mxu0 %v5898_v7  ;;  %1128 = vmatprep.mubr.bf16.mxu0 %v665_v0  ;;  %v7040_v10 = vpop.f32.mrb[16].mxu0  ;;  %v5970_v0 = vld [vmem:[%s7740_s5 + $0x280] ss:$8 sps:$4 sm:$0xff]   ;;  %v5984_v7 = vld [vmem:[%s7740_s5 + $0x2c4] ss:$8 sps:$4 sm:$0xff]  }
 0x336   :  { %1098 = vmatprep.subr.bf16.mxu0 %v5903_v8  ;;  %v7045_v12 = vpop.f32.mrb[17].mxu0  ;;  %v5982_v8 = vld [vmem:[%s7740_s5 + $0x2c0] ss:$8 sps:$4 sm:$0xff]  }
 0x337   :  { %v7047_v13 = vpop.f32.mrb[18].mxu0 }
 0x338   :  { %v1139_v14 = vpack.c.bf16 %v7047_v13, %v7040_v10  ;;  %v7051_v15 = vpop.f32.mrb[19].mxu0 }
 0x339   :  { %1099 = vmatpush1.bf16.msra.mxu0 %v5901_v9  ;;  %v1140_v17 = vpack.c.bf16 %v7051_v15, %v7045_v12  ;;  %v5987_v9 = vld [vmem:[%s7740_s5 + $0x2d4] ss:$8 sps:$4 sm:$0xff]   ;;  %v5990_v12 = vld [vmem:[%s7740_s5 + $0x2e4] ss:$8 sps:$4 sm:$0xff]   ;;  %v5988_v15 = vld [vmem:[%s7740_s5 + $0x2e0] ss:$8 sps:$4 sm:$0xff]  }
 0x33a   :  { %1100 = vmatprep.subr.bf16.mxu0 %v5906_v11  ;;  %v5985_v11 = vld [vmem:[%s7740_s5 + $0x2d0] ss:$8 sps:$4 sm:$0xff]  }
 0x33d   :  { %1101 = vmatpush1.bf16.msra.mxu0 %v5904_v16  ;;  %v5993_v16 = vld [vmem:[%s7740_s5 + $0x2f4] ss:$8 sps:$4 sm:$0xff]  }
 0x33e   :  { %1102 = vmatprep.subr.bf16.mxu0 %v5909_v18  ;;  %v1381_v18 = vld [vmem:[%s7741_s6] sm:$0x3] }
 0x341   :  { %1103 = vmatpush1.bf16.msra.mxu0 %v5907_v19  ;;  %v1386_v19 = vrot.slane %v1381_v18, %v6903_v51 }
 0x342   :  { %1104 = vmatprep.subr.bf16.mxu0 %v5912_v20  ;;  %v1390_v20 = vrot.slane %v1381_v18, %v6908_v53  ;;  %v6047_v18 = vld [vmem:[#allocation5 + $0x10] ss:$8 sps:$4 sm:$0xff]  }
 0x345   :  { %1105 = vmatpush1.bf16.msra.mxu0 %v5910_v21 }
 0x346   :  { %1106 = vmatprep.subr.bf16.mxu0 %v5915_v23 }
 0x349   :  { %1107 = vmatpush1.bf16.msra.mxu0 %v5913_v24 }
 0x34a   :  { %1108 = vmatprep.subr.bf16.mxu0 %v5918_v25 }
 0x34d   :  { %1109 = vmatpush1.bf16.msra.mxu0 %v5916_v26 }
 0x34e   :  { %1110 = vmatprep.subr.bf16.mxu0 %v5921_v27 }
 0x351   :  { %1111 = vmatpush1.bf16.msra.mxu0 %v5919_v28 }
 0x352   :  { %1112 = vmatprep.subr.bf16.mxu0 %v5924_v29 }
 0x355   :  { %1113 = vmatpush1.bf16.msra.mxu0 %v5922_v30 }
 0x356   :  { %1114 = vmatprep.subr.bf16.mxu0 %v5927_v31 }
 0x359   :  { %1115 = vmatpush1.bf16.msra.mxu0 %v5925_v32 }
 0x35a   :  { %1116 = vmatprep.subr.bf16.mxu0 %v5930_v33  ;;  %v5998_v33 = vld [vmem:[#allocation5 + $0x104] ss:$8 sps:$4 sm:$0xff]  }
 0x35d   :  { %1117 = vmatpush1.bf16.msra.mxu0 %v5928_v34  ;;  %v5994_v34 = vld [vmem:[%s7742_s7] sm:$0xff]  }
 0x35e   :  { %1118 = vmatprep.subr.bf16.mxu0 %v5933_v35  ;;  %v5996_v35 = vld [vmem:[#allocation5 + $0x100] ss:$8 sps:$4 sm:$0xff]  }
 0x361   :  { %1119 = vmatpush1.bf16.msra.mxu0 %v5931_v36  ;;  %v6001_v36 = vld [vmem:[#allocation5 + $0x114] ss:$8 sps:$4 sm:$0xff]  }
 0x362   :  { %1120 = vmatprep.subr.bf16.mxu0 %v5936_v37  ;;  %v5999_v37 = vld [vmem:[#allocation5 + $0x110] ss:$8 sps:$4 sm:$0xff]  }
 0x365   :  { %1121 = vmatpush1.bf16.msra.mxu0 %v5934_v38  ;;  %v6004_v38 = vld [vmem:[#allocation5 + $0x124] ss:$8 sps:$4 sm:$0xff]  }
 0x366   :  { %1122 = vmatprep.subr.bf16.mxu0 %v5939_v39  ;;  %v5995_v39 = vld [vmem:[%s7742_s7 + $0x8] ss:$0 sps:$4 sm:$0xff]  }
 0x369   :  { %1123 = vmatpush1.bf16.msra.mxu0 %v5937_v40  ;;  %v6002_v40 = vld [vmem:[#allocation5 + $0x120] ss:$8 sps:$4 sm:$0xff]  }
 0x36a   :  { %1124 = vmatprep.subr.bf16.mxu0 %v5942_v41  ;;  %v6007_v41 = vld [vmem:[#allocation5 + $0x134] ss:$8 sps:$4 sm:$0xff]  }
 0x36d   :  { %1125 = vmatpush1.bf16.msra.mxu0 %v5940_v42  ;;  %v6005_v42 = vld [vmem:[#allocation5 + $0x130] ss:$8 sps:$4 sm:$0xff]  }
 0x36e   :  { %1126 = vmatprep.subr.bf16.mxu0 %v5945_v43  ;;  %v6010_v43 = vld [vmem:[#allocation5 + $0x144] ss:$8 sps:$4 sm:$0xff]  }
 0x371   :  { %1127 = vmatpush1.bf16.msra.mxu0 %v5943_v44  ;;  %v6008_v44 = vld [vmem:[#allocation5 + $0x140] ss:$8 sps:$4 sm:$0xff]  }
 0x372   :  { %1334 = vmatprep.subr.bf16.mxu0 %v5948_v45  ;;  %v6013_v45 = vld [vmem:[#allocation5 + $0x154] ss:$8 sps:$4 sm:$0xff]  }
 0x374   :  { %1129 = vmatmul.mubr.bf16.vlgmr.msra.gmra.mrb[20].mxu0 %v664_v62  ;;  %v5967_v62 = vld [vmem:[%s7740_s5 + $0x270] ss:$8 sps:$4 sm:$0xff]  }
 0x375   :  { %1335 = vmatpush1.bf16.msra.mxu0 %v5946_v46  ;;  %1366 = vmatprep.mubr.bf16.mxu0 %v1140_v17  ;;  %v5991_v17 = vld [vmem:[%s7740_s5 + $0x2f0] ss:$8 sps:$4 sm:$0xff]  }
 0x376   :  { %1336 = vmatprep.subr.bf16.mxu0 %v5951_v47  ;;  %v6011_v46 = vld [vmem:[#allocation5 + $0x150] ss:$8 sps:$4 sm:$0xff]   ;;  %v6016_v47 = vld [vmem:[#allocation5 + $0x164] ss:$8 sps:$4 sm:$0xff]  }
 0x379   :  { %1337 = vmatpush1.bf16.msra.mxu0 %v5949_v48  ;;  %v6014_v48 = vld [vmem:[#allocation5 + $0x160] ss:$8 sps:$4 sm:$0xff]  }
 0x37a   :  { %1338 = vmatprep.subr.bf16.mxu0 %v5954_v49  ;;  %v6019_v49 = vld [vmem:[#allocation5 + $0x174] ss:$8 sps:$4 sm:$0xff]  }
 0x37d   :  { %1339 = vmatpush1.bf16.msra.mxu0 %v5952_v50  ;;  %v6017_v50 = vld [vmem:[#allocation5 + $0x170] ss:$8 sps:$4 sm:$0xff]  }
 0x37e   :  { %1340 = vmatprep.subr.bf16.mxu0 %v5957_v52  ;;  %v6022_v52 = vld [vmem:[#allocation5 + $0x184] ss:$8 sps:$4 sm:$0xff]  }
 0x381   :  { %1341 = vmatpush1.bf16.msra.mxu0 %v5955_v54  ;;  %v6020_v54 = vld [vmem:[#allocation5 + $0x180] ss:$8 sps:$4 sm:$0xff]  }
 0x382   :  { %1342 = vmatprep.subr.bf16.mxu0 %v5960_v55  ;;  %v6025_v55 = vld [vmem:[#allocation5 + $0x194] ss:$8 sps:$4 sm:$0xff]  }
 0x385   :  { %1343 = vmatpush1.bf16.msra.mxu0 %v5958_v56  ;;  %v6023_v56 = vld [vmem:[#allocation5 + $0x190] ss:$8 sps:$4 sm:$0xff]  }
 0x386   :  { %1344 = vmatprep.subr.bf16.mxu0 %v5963_v57  ;;  %v6028_v57 = vld [vmem:[#allocation5 + $0x1a4] ss:$8 sps:$4 sm:$0xff]  }
 0x389   :  { %1345 = vmatpush1.bf16.msra.mxu0 %v5961_v58  ;;  %v6026_v58 = vld [vmem:[#allocation5 + $0x1a0] ss:$8 sps:$4 sm:$0xff]  }
 0x38a   :  { %1346 = vmatprep.subr.bf16.mxu0 %v5966_v59  ;;  %v6031_v59 = vld [vmem:[#allocation5 + $0x1b4] ss:$8 sps:$4 sm:$0xff]  }
 0x38d   :  { %1347 = vmatpush1.bf16.msra.mxu0 %v5964_v60  ;;  %v6029_v60 = vld [vmem:[#allocation5 + $0x1b0] ss:$8 sps:$4 sm:$0xff]  }
 0x38e   :  { %1348 = vmatprep.subr.bf16.mxu0 %v5969_v61  ;;  %v6034_v61 = vld [vmem:[#allocation5 + $0x1c4] ss:$8 sps:$4 sm:$0xff]  }
 0x391   :  { %1349 = vmatpush1.bf16.msra.mxu0 %v5967_v62  ;;  %v6032_v62 = vld [vmem:[#allocation5 + $0x1c0] ss:$8 sps:$4 sm:$0xff]  }
 0x392   :  { %1350 = vmatprep.subr.bf16.mxu0 %v5972_v63  ;;  %v6037_v63 = vld [vmem:[#allocation5 + $0x1d4] ss:$8 sps:$4 sm:$0xff]  }
 0x395   :  { %1351 = vmatpush1.bf16.msra.mxu0 %v5970_v0  ;;  %v6035_v0 = vld [vmem:[#allocation5 + $0x1d0] ss:$8 sps:$4 sm:$0xff]  }
 0x396   :  { %1352 = vmatprep.subr.bf16.mxu0 %v5975_v1  ;;  %v6040_v1 = vld [vmem:[#allocation5 + $0x1e4] ss:$8 sps:$4 sm:$0xff]  }
 0x399   :  { %1353 = vmatpush1.bf16.msra.mxu0 %v5973_v2  ;;  %v6038_v2 = vld [vmem:[#allocation5 + $0x1e0] ss:$8 sps:$4 sm:$0xff]  }
 0x39a   :  { %1354 = vmatprep.subr.bf16.mxu0 %v5978_v3  ;;  %v6043_v3 = vld [vmem:[#allocation5 + $0x1f4] ss:$8 sps:$4 sm:$0xff]  }
 0x39d   :  { %1355 = vmatpush1.bf16.msra.mxu0 %v5976_v4  ;;  %v6041_v4 = vld [vmem:[#allocation5 + $0x1f0] ss:$8 sps:$4 sm:$0xff]  }
 0x39e   :  { %1356 = vmatprep.subr.bf16.mxu0 %v5981_v5  ;;  %v6046_v5 = vld [vmem:[#allocation5 + $0x4] ss:$8 sps:$4 sm:$0xff]  }
 0x3a1   :  { %1357 = vmatpush1.bf16.msra.mxu0 %v5979_v6 }
 0x3a2   :  { %1358 = vmatprep.subr.bf16.mxu0 %v5984_v7 }
 0x3a5   :  { %1359 = vmatpush1.bf16.msra.mxu0 %v5982_v8 }
 0x3a6   :  { %1360 = vmatprep.subr.bf16.mxu0 %v5987_v9 }
 0x3a9   :  { %1361 = vmatpush1.bf16.msra.mxu0 %v5985_v11 }
 0x3aa   :  { %1362 = vmatprep.subr.bf16.mxu0 %v5990_v12  ;;  %v6044_v12 = vld [vmem:[#allocation5] ss:$8 sps:$4 sm:$0xff]  }
 0x3ad   :  { %1363 = vmatpush1.bf16.msra.mxu0 %v5988_v15 }
 0x3ae   :  { %1364 = vmatprep.subr.bf16.mxu0 %v5993_v16  ;;  %v6049_v16 = vld [vmem:[#allocation5 + $0x14] ss:$8 sps:$4 sm:$0xff]  }
 0x3b1   :  { %1365 = vmatpush1.bf16.msra.mxu0 %v5991_v17 }
 0x3b4   :  { %1367 = vmatmul.mubr.bf16.vlgmr.msra.gmra.mrb[20].mxu0 %v1139_v14 }
 0x3b5   :  { %2269 = vmatprep.mubr.bf16.mxu0 %v6653_v22 }
 0x487   :  { %v1368_v21 = vpop.f32.mrb[20].mxu0 }
 0x488   :  { %v1393_v23 = vadd.f32 %v1386_v19, %v1368_v21  ;;  %v1370_v24 = vpop.f32.mrb[21].mxu0 }
 0x489   :  { %v1394_v25 = vadd.f32 %v1390_v20, %v1370_v24  ;;  %v1372_v26 = vpop.f32.mrb[22].mxu0 }
 0x48a   :  { %v1395_v27 = vadd.f32 %v1386_v19, %v1372_v26  ;;  %v1374_v28 = vpop.f32.mrb[23].mxu0  ;;  %v1397_v10 = vmax.f32 %v1393_v23, 0.0  ;;  %v6055_v26 = vld [vmem:[#allocation5 + $0x34] ss:$8 sps:$4 sm:$0xff]  }
 0x48b   :  { %v1396_v29 = vadd.f32 %v1390_v20, %v1374_v28  ;;  %v1398_v14 = vmax.f32 %v1394_v25, 0.0  ;;  %v6052_v20 = vld [vmem:[#allocation5 + $0x24] ss:$8 sps:$4 sm:$0xff]   ;;  %v6050_v25 = vld [vmem:[#allocation5 + $0x20] ss:$8 sps:$4 sm:$0xff]  }
 0x48c   :  { %v1399_v13 = vmax.f32 %v1395_v27, 0.0  ;;  %v6053_v27 = vld [vmem:[#allocation5 + $0x30] ss:$8 sps:$4 sm:$0xff]   ;;  %v6058_v28 = vld [vmem:[#allocation5 + $0x44] ss:$8 sps:$4 sm:$0xff]  }
 0x48d   :  { %v1400_v30 = vmax.f32 %v1396_v29, 0.0  ;;  %v6056_v29 = vld [vmem:[#allocation5 + $0x40] ss:$8 sps:$4 sm:$0xff]  }
 0x48e   :  { %v1401_v31 = vpack.c.bf16 %v1399_v13, %v1397_v10  ;;  %v6061_v10 = vld [vmem:[#allocation5 + $0x54] ss:$8 sps:$4 sm:$0xff]   ;;  %v6059_v13 = vld [vmem:[#allocation5 + $0x50] ss:$8 sps:$4 sm:$0xff]  }
 0x48f   :  { %v1402_v32 = vpack.c.bf16 %v1400_v30, %v1398_v14  ;;  %v6064_v14 = vld [vmem:[#allocation5 + $0x64] ss:$8 sps:$4 sm:$0xff]   ;;  %v6062_v30 = vld [vmem:[#allocation5 + $0x60] ss:$8 sps:$4 sm:$0xff]  }
 0x491   :  { %1421 = vmatprep.subr.bf16.mxu1 %v1402_v32  ;;  %v6065_v32 = vld [vmem:[#allocation5 + $0x70] ss:$8 sps:$4 sm:$0xff]  }
 0x492   :  { %1422 = vmatpush1.bf16.msra.mxu1 %v1401_v31  ;;  %v6067_v31 = vld [vmem:[#allocation5 + $0x74] ss:$8 sps:$4 sm:$0xff]  }
 0x493   :  { %1701 = vmatprep.subr.bf16.mxu1 %v5998_v33  ;;  %v6070_v33 = vld [vmem:[#allocation5 + $0x84] ss:$8 sps:$4 sm:$0xff]  }
 0x495   :  { %5163 = vmatmul.mubr.msk.bf16.vlgmr.msra.gmra.mrb[12].mxu1 %vm1414_vm2, %v5994_v34  ;;  %v6068_v34 = vld [vmem:[#allocation5 + $0x80] ss:$8 sps:$4 sm:$0xff]  }
 0x496   :  { %1463 = vmatprep.mubr.bf16.mxu1 %v6653_v22  ;;  %1702 = vmatpush1.bf16.msra.mxu1 %v5996_v35  ;;  %v6073_v35 = vld [vmem:[#allocation5 + $0x94] ss:$8 sps:$4 sm:$0xff]  }
 0x497   :  { %1703 = vmatprep.subr.bf16.mxu1 %v6001_v36  ;;  %v6071_v36 = vld [vmem:[#allocation5 + $0x90] ss:$8 sps:$4 sm:$0xff]  }
 0x49a   :  { %1704 = vmatpush1.bf16.msra.mxu1 %v5999_v37  ;;  %v6076_v37 = vld [vmem:[#allocation5 + $0xa4] ss:$8 sps:$4 sm:$0xff]  }
 0x49b   :  { %1705 = vmatprep.subr.bf16.mxu1 %v6004_v38  ;;  %v6074_v38 = vld [vmem:[#allocation5 + $0xa0] ss:$8 sps:$4 sm:$0xff]  }
 0x49d   :  { %5164 = vmatmul.mubr.msk.bf16.gmra.mrb[16].mxu1 %vm1414_vm2, %v5995_v39  ;;  %v6079_v39 = vld [vmem:[#allocation5 + $0xb4] ss:$8 sps:$4 sm:$0xff]  }
 0x49e   :  { %1706 = vmatpush1.bf16.msra.mxu1 %v6002_v40  ;;  %v6077_v40 = vld [vmem:[#allocation5 + $0xb0] ss:$8 sps:$4 sm:$0xff]  }
 0x49f   :  { %1707 = vmatprep.subr.bf16.mxu1 %v6007_v41  ;;  %v6082_v41 = vld [vmem:[#allocation5 + $0xc4] ss:$8 sps:$4 sm:$0xff]  }
 0x4a2   :  { %1708 = vmatpush1.bf16.msra.mxu1 %v6005_v42  ;;  %v6080_v42 = vld [vmem:[#allocation5 + $0xc0] ss:$8 sps:$4 sm:$0xff]  }
 0x4a3   :  { %1709 = vmatprep.subr.bf16.mxu1 %v6010_v43  ;;  %v6085_v43 = vld [vmem:[#allocation5 + $0xd4] ss:$8 sps:$4 sm:$0xff]  }
 0x4a6   :  { %1710 = vmatpush1.bf16.msra.mxu1 %v6008_v44  ;;  %v6083_v44 = vld [vmem:[#allocation5 + $0xd0] ss:$8 sps:$4 sm:$0xff]  }
 0x4a7   :  { %1711 = vmatprep.subr.bf16.mxu1 %v6013_v45  ;;  %v6088_v45 = vld [vmem:[#allocation5 + $0xe4] ss:$8 sps:$4 sm:$0xff]  }
 0x4aa   :  { %1712 = vmatpush1.bf16.msra.mxu1 %v6011_v46  ;;  %v6086_v46 = vld [vmem:[#allocation5 + $0xe0] ss:$8 sps:$4 sm:$0xff]  }
 0x4ab   :  { %1713 = vmatprep.subr.bf16.mxu1 %v6016_v47  ;;  %v6091_v47 = vld [vmem:[#allocation5 + $0xf4] ss:$8 sps:$4 sm:$0xff]  }
 0x4ae   :  { %1714 = vmatpush1.bf16.msra.mxu1 %v6014_v48  ;;  %v6089_v48 = vld [vmem:[#allocation5 + $0xf0] ss:$8 sps:$4 sm:$0xff]  }
 0x4af   :  { %1715 = vmatprep.subr.bf16.mxu1 %v6019_v49  ;;  %v6094_v49 = vld [vmem:[#allocation5 + $0x204] ss:$8 sps:$4 sm:$0xff]  }
 0x4b2   :  { %1716 = vmatpush1.bf16.msra.mxu1 %v6017_v50  ;;  %v6092_v50 = vld [vmem:[#allocation5 + $0x200] ss:$8 sps:$4 sm:$0xff]  }
 0x4b3   :  { %1717 = vmatprep.subr.bf16.mxu1 %v6022_v52 }
 0x4b6   :  { %1718 = vmatpush1.bf16.msra.mxu1 %v6020_v54 }
 0x4b7   :  { %1719 = vmatprep.subr.bf16.mxu1 %v6025_v55  ;;  %v6097_v55 = vld [vmem:[#allocation5 + $0x214] ss:$8 sps:$4 sm:$0xff]  }
 0x4ba   :  { %1720 = vmatpush1.bf16.msra.mxu1 %v6023_v56  ;;  %v6095_v56 = vld [vmem:[#allocation5 + $0x210] ss:$8 sps:$4 sm:$0xff]  }
 0x4bb   :  { %1721 = vmatprep.subr.bf16.mxu1 %v6028_v57  ;;  %v6100_v57 = vld [vmem:[#allocation5 + $0x224] ss:$8 sps:$4 sm:$0xff]  }
 0x4be   :  { %1722 = vmatpush1.bf16.msra.mxu1 %v6026_v58  ;;  %v6098_v58 = vld [vmem:[#allocation5 + $0x220] ss:$8 sps:$4 sm:$0xff]  }
 0x4bf   :  { %1723 = vmatprep.subr.bf16.mxu1 %v6031_v59  ;;  %v6103_v59 = vld [vmem:[#allocation5 + $0x234] ss:$8 sps:$4 sm:$0xff]  }
 0x4c2   :  { %1724 = vmatpush1.bf16.msra.mxu1 %v6029_v60  ;;  %v6101_v60 = vld [vmem:[#allocation5 + $0x230] ss:$8 sps:$4 sm:$0xff]  }
 0x4c3   :  { %1725 = vmatprep.subr.bf16.mxu1 %v6034_v61  ;;  %v6106_v61 = vld [vmem:[#allocation5 + $0x244] ss:$8 sps:$4 sm:$0xff]  }
 0x4c6   :  { %1726 = vmatpush1.bf16.msra.mxu1 %v6032_v62  ;;  %v6104_v62 = vld [vmem:[#allocation5 + $0x240] ss:$8 sps:$4 sm:$0xff]  }
 0x4c7   :  { %1727 = vmatprep.subr.bf16.mxu1 %v6037_v63  ;;  %v6109_v63 = vld [vmem:[#allocation5 + $0x254] ss:$8 sps:$4 sm:$0xff]  }
 0x4ca   :  { %1728 = vmatpush1.bf16.msra.mxu1 %v6035_v0  ;;  %v6107_v0 = vld [vmem:[#allocation5 + $0x250] ss:$8 sps:$4 sm:$0xff]  }
 0x4cb   :  { %1729 = vmatprep.subr.bf16.mxu1 %v6040_v1  ;;  %v6112_v1 = vld [vmem:[#allocation5 + $0x264] ss:$8 sps:$4 sm:$0xff]  }
 0x4ce   :  { %1730 = vmatpush1.bf16.msra.mxu1 %v6038_v2  ;;  %v6110_v2 = vld [vmem:[#allocation5 + $0x260] ss:$8 sps:$4 sm:$0xff]  }
 0x4cf   :  { %1731 = vmatprep.subr.bf16.mxu1 %v6043_v3  ;;  %v6115_v3 = vld [vmem:[#allocation5 + $0x274] ss:$8 sps:$4 sm:$0xff]  }
 0x4d2   :  { %1732 = vmatpush1.bf16.msra.mxu1 %v6041_v4  ;;  %v6113_v4 = vld [vmem:[#allocation5 + $0x270] ss:$8 sps:$4 sm:$0xff]  }
 0x4d3   :  { %1902 = vmatprep.subr.bf16.mxu1 %v6046_v5  ;;  %v6118_v5 = vld [vmem:[#allocation5 + $0x284] ss:$8 sps:$4 sm:$0xff]  }
 0x568   :  { %v7253_v6 = vpop.f32.mrb[12].mxu1 }
 0x569   :  { %v1457_v7 = vpop.f32.mrb[13].mxu1  ;;  %v1472_v54 = vpack.c.bf16 %v7253_v6, %v7253_v6  ;;  %v6116_v6 = vld [vmem:[#allocation5 + $0x280] ss:$8 sps:$4 sm:$0xff]  }
 0x56a   :  { %v1459_v8 = vpop.f32.mrb[14].mxu1  ;;  %v1473_v17 = vpack.c.bf16 %v1457_v7, %v1457_v7  ;;  %v6121_v7 = vld [vmem:[#allocation5 + $0x294] ss:$8 sps:$4 sm:$0xff]  }
 0x56b   :  { %v1461_v9 = vpop.f32.mrb[15].mxu1  ;;  %v1506_v15 = vpack.c.bf16 %v1459_v8, %v1459_v8  ;;  %v6119_v8 = vld [vmem:[#allocation5 + $0x290] ss:$8 sps:$4 sm:$0xff]  }
 0x56c   :  { %v1507_v11 = vpack.c.bf16 %v1461_v9, %v1461_v9  ;;  %v6124_v9 = vld [vmem:[#allocation5 + $0x2a4] ss:$8 sps:$4 sm:$0xff]  }
 0x56e   :  { %1733 = vmatprep.mubr.bf16.mxu1 %v1507_v11  ;;  %v6122_v11 = vld [vmem:[#allocation5 + $0x2a0] ss:$8 sps:$4 sm:$0xff]  }
 0x56f   :  { %1734 = vmatmul.mubr.bf16.vlgmr.msra.gmra.mrb[20].mxu1 %v1506_v15  ;;  %v6125_v15 = vld [vmem:[#allocation5 + $0x2b0] ss:$8 sps:$4 sm:$0xff]  }
 0x570   :  { %1903 = vmatpush1.bf16.msra.mxu1 %v6044_v12  ;;  %1934 = vmatprep.mubr.bf16.mxu1 %v1473_v17  ;;  %v7255_v19 = vpop.f32.mrb[16].mxu1  ;;  %v6127_v12 = vld [vmem:[#allocation5 + $0x2b4] ss:$8 sps:$4 sm:$0xff]   ;;  %v6128_v17 = vld [vmem:[#allocation5 + $0x2c0] ss:$8 sps:$4 sm:$0xff]  }
 0x571   :  { %1904 = vmatprep.subr.bf16.mxu1 %v6049_v16  ;;  %v7257_v21 = vpop.f32.mrb[17].mxu1  ;;  %v6130_v16 = vld [vmem:[#allocation5 + $0x2c4] ss:$8 sps:$4 sm:$0xff]  }
 0x572   :  { %v1469_v23 = vpop.f32.mrb[18].mxu1  ;;  %v1944_v52 = vpack.c.bf16 %v7257_v21, %v7257_v21  ;;  %v6136_v21 = vld [vmem:[#allocation5 + $0x2e4] ss:$8 sps:$4 sm:$0xff]  }
 0x573   :  { %v1470_v24 = vpop.f32.mrb[19].mxu1  ;;  %v6134_v23 = vld [vmem:[#allocation5 + $0x2e0] ss:$8 sps:$4 sm:$0xff]  }
 0x574   :  { %1905 = vmatpush1.bf16.msra.mxu1 %v6047_v18  ;;  %v6133_v18 = vld [vmem:[#allocation5 + $0x2d4] ss:$8 sps:$4 sm:$0xff]  }
 0x575   :  { %1906 = vmatprep.subr.bf16.mxu1 %v6052_v20  ;;  %v6131_v20 = vld [vmem:[#allocation5 + $0x2d0] ss:$8 sps:$4 sm:$0xff]   ;;  %v6139_v24 = vld [vmem:[#allocation5 + $0x2f4] ss:$8 sps:$4 sm:$0xff]  }
 0x578   :  { %1907 = vmatpush1.bf16.msra.mxu1 %v6050_v25  ;;  %v6137_v25 = vld [vmem:[#allocation5 + $0x2f0] ss:$8 sps:$4 sm:$0xff]  }
 0x579   :  { %1908 = vmatprep.subr.bf16.mxu1 %v6055_v26  ;;  %v1943_v26 = vpack.c.bf16 %v7255_v19, %v7255_v19 }
 0x57c   :  { %1909 = vmatpush1.bf16.msra.mxu1 %v6053_v27 }
 0x57d   :  { %1910 = vmatprep.subr.bf16.mxu1 %v6058_v28 }
 0x580   :  { %1911 = vmatpush1.bf16.msra.mxu1 %v6056_v29 }
 0x581   :  { %1912 = vmatprep.subr.bf16.mxu1 %v6061_v10 }
 0x584   :  { %1913 = vmatpush1.bf16.msra.mxu1 %v6059_v13 }
 0x585   :  { %1914 = vmatprep.subr.bf16.mxu1 %v6064_v14 }
 0x588   :  { %1915 = vmatpush1.bf16.msra.mxu1 %v6062_v30 }
 0x589   :  { %1916 = vmatprep.subr.bf16.mxu1 %v6067_v31 }
 0x58c   :  { %1917 = vmatpush1.bf16.msra.mxu1 %v6065_v32 }
 0x58d   :  { %1918 = vmatprep.subr.bf16.mxu1 %v6070_v33 }
 0x590   :  { %1919 = vmatpush1.bf16.msra.mxu1 %v6068_v34  ;;  %v2181_v34 = vld [vmem:[%s7744_s9] sm:$0x3] }
 0x591   :  { %1920 = vmatprep.subr.bf16.mxu1 %v6073_v35  ;;  %v2186_v35 = vrot.slane %v2181_v34, %v6903_v51 }
 0x594   :  { %1921 = vmatpush1.bf16.msra.mxu1 %v6071_v36  ;;  %v2190_v36 = vrot.slane %v2181_v34, %v6908_v53 }
 0x595   :  { %1922 = vmatprep.subr.bf16.mxu1 %v6076_v37 }
 0x598   :  { %1923 = vmatpush1.bf16.msra.mxu1 %v6074_v38 }
 0x599   :  { %1924 = vmatprep.subr.bf16.mxu1 %v6079_v39 }
 0x59c   :  { %1925 = vmatpush1.bf16.msra.mxu1 %v6077_v40 }
 0x59d   :  { %1926 = vmatprep.subr.bf16.mxu1 %v6082_v41 }
 0x5a0   :  { %1927 = vmatpush1.bf16.msra.mxu1 %v6080_v42 }
 0x5a1   :  { %1928 = vmatprep.subr.bf16.mxu1 %v6085_v43 }
 0x5a4   :  { %1929 = vmatpush1.bf16.msra.mxu1 %v6083_v44 }
 0x5a5   :  { %1930 = vmatprep.subr.bf16.mxu1 %v6088_v45 }
 0x5a8   :  { %1931 = vmatpush1.bf16.msra.mxu1 %v6086_v46 }
 0x5a9   :  { %1932 = vmatprep.subr.bf16.mxu1 %v6091_v47 }
 0x5ac   :  { %1933 = vmatpush1.bf16.msra.mxu1 %v6089_v48  ;;  %v6145_v48 = vld [vmem:[#allocation7 + $0x104] ss:$8 sps:$4 sm:$0xff]  }
 0x5ad   :  { %2138 = vmatprep.subr.bf16.mxu1 %v6094_v49 }
 0x5af   :  { %1935 = vmatmul.mubr.bf16.vlgmr.msra.gmra.mrb[24].mxu1 %v1472_v54  ;;  %v6148_v54 = vld [vmem:[#allocation7 + $0x114] ss:$8 sps:$4 sm:$0xff]  }
 0x5b0   :  { %2139 = vmatpush1.bf16.msra.mxu1 %v6092_v50  ;;  %2170 = vmatprep.mubr.bf16.mxu1 %v1944_v52  ;;  %v6140_v50 = vld [vmem:[%s7745_s10] sm:$0xff]  }
 0x5b1   :  { %2140 = vmatprep.subr.bf16.mxu1 %v6097_v55  ;;  %v6143_v52 = vld [vmem:[#allocation7 + $0x100] ss:$8 sps:$4 sm:$0xff]   ;;  %v6146_v55 = vld [vmem:[#allocation7 + $0x110] ss:$8 sps:$4 sm:$0xff]  }
 0x5b4   :  { %2141 = vmatpush1.bf16.msra.mxu1 %v6095_v56  ;;  %v6151_v56 = vld [vmem:[#allocation7 + $0x124] ss:$8 sps:$4 sm:$0xff]  }
 0x5b5   :  { %2142 = vmatprep.subr.bf16.mxu1 %v6100_v57  ;;  %v6141_v57 = vld [vmem:[%s7745_s10 + $0x8] sm:$0xff]  }
 0x5b8   :  { %2143 = vmatpush1.bf16.msra.mxu1 %v6098_v58  ;;  %v6149_v58 = vld [vmem:[#allocation7 + $0x120] ss:$8 sps:$4 sm:$0xff]  }
 0x5b9   :  { %2144 = vmatprep.subr.bf16.mxu1 %v6103_v59  ;;  %v6154_v59 = vld [vmem:[#allocation7 + $0x134] ss:$8 sps:$4 sm:$0xff]  }
 0x5bc   :  { %2145 = vmatpush1.bf16.msra.mxu1 %v6101_v60  ;;  %v6152_v60 = vld [vmem:[#allocation7 + $0x130] ss:$8 sps:$4 sm:$0xff]  }
 0x5bd   :  { %2146 = vmatprep.subr.bf16.mxu1 %v6106_v61  ;;  %v6157_v61 = vld [vmem:[#allocation7 + $0x144] ss:$8 sps:$4 sm:$0xff]  }
 0x5c0   :  { %2147 = vmatpush1.bf16.msra.mxu1 %v6104_v62  ;;  %v6142_v62 = vld [vmem:[%s7745_s10 + $0x10] sm:$0xff]  }
 0x5c1   :  { %2148 = vmatprep.subr.bf16.mxu1 %v6109_v63  ;;  %v6155_v63 = vld [vmem:[#allocation7 + $0x140] ss:$8 sps:$4 sm:$0xff]  }
 0x5c4   :  { %2149 = vmatpush1.bf16.msra.mxu1 %v6107_v0  ;;  %v6160_v0 = vld [vmem:[#allocation7 + $0x154] ss:$8 sps:$4 sm:$0xff]  }
 0x5c5   :  { %2150 = vmatprep.subr.bf16.mxu1 %v6112_v1  ;;  %v6158_v1 = vld [vmem:[#allocation7 + $0x150] ss:$8 sps:$4 sm:$0xff]  }
 0x5c8   :  { %2151 = vmatpush1.bf16.msra.mxu1 %v6110_v2  ;;  %v6163_v2 = vld [vmem:[#allocation7 + $0x164] ss:$8 sps:$4 sm:$0xff]  }
 0x5c9   :  { %2152 = vmatprep.subr.bf16.mxu1 %v6115_v3  ;;  %v6161_v3 = vld [vmem:[#allocation7 + $0x160] ss:$8 sps:$4 sm:$0xff]  }
 0x5cc   :  { %2153 = vmatpush1.bf16.msra.mxu1 %v6113_v4  ;;  %v6166_v4 = vld [vmem:[#allocation7 + $0x174] ss:$8 sps:$4 sm:$0xff]  }
 0x5cd   :  { %2154 = vmatprep.subr.bf16.mxu1 %v6118_v5  ;;  %v6164_v5 = vld [vmem:[#allocation7 + $0x170] ss:$8 sps:$4 sm:$0xff]  }
 0x5d0   :  { %2155 = vmatpush1.bf16.msra.mxu1 %v6116_v6  ;;  %v6169_v6 = vld [vmem:[#allocation7 + $0x184] ss:$8 sps:$4 sm:$0xff]  }
 0x5d1   :  { %2156 = vmatprep.subr.bf16.mxu1 %v6121_v7  ;;  %v6167_v7 = vld [vmem:[#allocation7 + $0x180] ss:$8 sps:$4 sm:$0xff]  }
 0x5d4   :  { %2157 = vmatpush1.bf16.msra.mxu1 %v6119_v8  ;;  %v6172_v8 = vld [vmem:[#allocation7 + $0x194] ss:$8 sps:$4 sm:$0xff]  }
 0x5d5   :  { %2158 = vmatprep.subr.bf16.mxu1 %v6124_v9  ;;  %v6170_v9 = vld [vmem:[#allocation7 + $0x190] ss:$8 sps:$4 sm:$0xff]  }
 0x5d8   :  { %2159 = vmatpush1.bf16.msra.mxu1 %v6122_v11  ;;  %v6175_v11 = vld [vmem:[#allocation7 + $0x1a4] ss:$8 sps:$4 sm:$0xff]  }
 0x5d9   :  { %2160 = vmatprep.subr.bf16.mxu1 %v6127_v12  ;;  %v6173_v12 = vld [vmem:[#allocation7 + $0x1a0] ss:$8 sps:$4 sm:$0xff]  }
 0x5dc   :  { %2161 = vmatpush1.bf16.msra.mxu1 %v6125_v15  ;;  %v6178_v15 = vld [vmem:[#allocation7 + $0x1b4] ss:$8 sps:$4 sm:$0xff]  }
 0x5dd   :  { %2162 = vmatprep.subr.bf16.mxu1 %v6130_v16  ;;  %v6176_v16 = vld [vmem:[#allocation7 + $0x1b0] ss:$8 sps:$4 sm:$0xff]  }
 0x5e0   :  { %2163 = vmatpush1.bf16.msra.mxu1 %v6128_v17  ;;  %v6181_v17 = vld [vmem:[#allocation7 + $0x1c4] ss:$8 sps:$4 sm:$0xff]  }
 0x5e1   :  { %2164 = vmatprep.subr.bf16.mxu1 %v6133_v18  ;;  %v6179_v18 = vld [vmem:[#allocation7 + $0x1c0] ss:$8 sps:$4 sm:$0xff]  }
 0x5e4   :  { %2165 = vmatpush1.bf16.msra.mxu1 %v6131_v20  ;;  %v6184_v20 = vld [vmem:[#allocation7 + $0x1d4] ss:$8 sps:$4 sm:$0xff]  }
 0x5e5   :  { %2166 = vmatprep.subr.bf16.mxu1 %v6136_v21  ;;  %v6182_v21 = vld [vmem:[#allocation7 + $0x1d0] ss:$8 sps:$4 sm:$0xff]  }
 0x5e8   :  { %2167 = vmatpush1.bf16.msra.mxu1 %v6134_v23  ;;  %v6185_v23 = vld [vmem:[#allocation7 + $0x1e0] ss:$8 sps:$4 sm:$0xff]  }
 0x5e9   :  { %2168 = vmatprep.subr.bf16.mxu1 %v6139_v24  ;;  %v6187_v24 = vld [vmem:[#allocation7 + $0x1e4] ss:$8 sps:$4 sm:$0xff]  }
 0x5ec   :  { %2169 = vmatpush1.bf16.msra.mxu1 %v6137_v25  ;;  %v6190_v25 = vld [vmem:[#allocation7 + $0x1f4] ss:$8 sps:$4 sm:$0xff]  }
 0x5ef   :  { %2171 = vmatmul.mubr.bf16.vlgmr.msra.gmra.mrb[28].mxu1 %v1943_v26  ;;  %v6188_v26 = vld [vmem:[#allocation7 + $0x1f0] ss:$8 sps:$4 sm:$0xff]  }
 0x5f0   :  { %3131 = vmatprep.mubr.bf16.mxu1 %v6653_v22 }
 0x642   :  { %v1735_v27 = vpop.f32.mrb[20].mxu1 }
 0x643   :  { %v1737_v28 = vpop.f32.mrb[21].mxu1 }
 0x644   :  { %v1739_v29 = vpop.f32.mrb[22].mxu1 }
 0x645   :  { %v1740_v10 = vpop.f32.mrb[23].mxu1 }
 0x682   :  { %v1936_v13 = vpop.f32.mrb[24].mxu1 }
 0x683   :  { %v1937_v14 = vadd.f32 %v1936_v13, %v1735_v27  ;;  %v1938_v30 = vpop.f32.mrb[25].mxu1  ;;  %v6193_v27 = vld [vmem:[#allocation7 + $0x4] ss:$8 sps:$4 sm:$0xff]  }
 0x684   :  { %v1939_v31 = vadd.f32 %v1938_v30, %v1737_v28  ;;  %v1940_v32 = vpop.f32.mrb[26].mxu1 }
 0x685   :  { %v1941_v33 = vpop.f32.mrb[27].mxu1 }
 0x6c2   :  { %v2172_v19 = vpop.f32.mrb[28].mxu1 }
 0x6c3   :  { %v2179_v37 = vadd.f32 %v2172_v19, %v1937_v14  ;;  %v2174_v38 = vpop.f32.mrb[29].mxu1 }
 0x6c4   :  { %v2180_v39 = vadd.f32 %v2174_v38, %v1939_v31  ;;  %v2176_v40 = vpop.f32.mrb[30].mxu1  ;;  %v6194_v38 = vld [vmem:[#allocation7 + $0x10] ss:$8 sps:$4 sm:$0xff]  }
 0x6c5   :  { %v2193_v41 = vadd.f32 %v2186_v35, %v2179_v37  ;;  %v2177_v42 = vpop.f32.mrb[31].mxu1  ;;  %v6196_v37 = vld [vmem:[#allocation7 + $0x14] ss:$8 sps:$4 sm:$0xff]   ;;  %v6199_v40 = vld [vmem:[#allocation7 + $0x24] ss:$8 sps:$4 sm:$0xff]  }
 0x6c6   :  { %v2194_v43 = vadd.f32 %v2190_v36, %v2180_v39  ;;  %v6191_v36 = vld [vmem:[#allocation7] ss:$8 sps:$4 sm:$0xff]  }
 0x6c7   :  { %v2195_v44 = vmax.f32 %v2193_v41, 0.0 }
 0x6c8   :  { %v2196_v45 = vmax.f32 %v2194_v43, 0.0 }
 0x6c9   :  { %v2197_v46 = vpack.c.bf16 %v2195_v44, %v2195_v44 }
 0x6ca   :  { %v2198_v47 = vpack.c.bf16 %v2196_v45, %v2196_v45  ;;  %v6197_v45 = vld [vmem:[#allocation7 + $0x20] ss:$8 sps:$4 sm:$0xff]  }
 0x6cb   :  { %v2232_v49 = vsel %vm2230_vm3, %v2197_v46, 0 }
 0x6cc   :  { %5264 = vmatprep.subr.msk.bf16.mxu0 %vm2230_vm3, %v2198_v47  ;;  %v6202_v47 = vld [vmem:[#allocation7 + $0x34] ss:$8 sps:$4 sm:$0xff]  }
 0x6cd   :  { %2238 = vmatpush1.bf16.msra.mxu0 %v2232_v49  ;;  %v6205_v49 = vld [vmem:[#allocation7 + $0x44] ss:$8 sps:$4 sm:$0xff]  }
 0x6ce   :  { %2529 = vmatprep.subr.bf16.mxu0 %v6145_v48  ;;  %v6200_v48 = vld [vmem:[#allocation7 + $0x30] ss:$8 sps:$4 sm:$0xff]  }
 0x6d0   :  { %5265 = vmatmul.mubr.msk.bf16.vlgmr.msra.gmra.mrb[24].mxu0 %vm2220_vm4, %v6140_v50  ;;  %v6203_v50 = vld [vmem:[#allocation7 + $0x40] ss:$8 sps:$4 sm:$0xff]  }
 0x6d1   :  { %2279 = vmatprep.mubr.bf16.mxu0 %v6653_v22  ;;  %2530 = vmatpush1.bf16.msra.mxu0 %v6143_v52  ;;  %v6208_v52 = vld [vmem:[#allocation7 + $0x54] ss:$8 sps:$4 sm:$0xff]  }
 0x6d2   :  { %2531 = vmatprep.subr.bf16.mxu0 %v6148_v54  ;;  %v6206_v54 = vld [vmem:[#allocation7 + $0x50] ss:$8 sps:$4 sm:$0xff]  }
 0x6d5   :  { %2532 = vmatpush1.bf16.msra.mxu0 %v6146_v55  ;;  %v6211_v55 = vld [vmem:[#allocation7 + $0x64] ss:$8 sps:$4 sm:$0xff]  }
 0x6d6   :  { %2533 = vmatprep.subr.bf16.mxu0 %v6151_v56  ;;  %v6209_v56 = vld [vmem:[#allocation7 + $0x60] ss:$8 sps:$4 sm:$0xff]  }
 0x6d8   :  { %5266 = vmatmul.mubr.msk.bf16.gmra.mrb[28].mxu0 %vm2220_vm4, %v6141_v57  ;;  %v6214_v57 = vld [vmem:[#allocation7 + $0x74] ss:$8 sps:$4 sm:$0xff]  }
 0x6d9   :  { %2289 = vmatprep.mubr.bf16.mxu0 %v6653_v22  ;;  %2534 = vmatpush1.bf16.msra.mxu0 %v6149_v58  ;;  %v6212_v58 = vld [vmem:[#allocation7 + $0x70] ss:$8 sps:$4 sm:$0xff]  }
 0x6da   :  { %2535 = vmatprep.subr.bf16.mxu0 %v6154_v59  ;;  %v6217_v59 = vld [vmem:[#allocation7 + $0x84] ss:$8 sps:$4 sm:$0xff]  }
 0x6dd   :  { %2536 = vmatpush1.bf16.msra.mxu0 %v6152_v60  ;;  %v6215_v60 = vld [vmem:[#allocation7 + $0x80] ss:$8 sps:$4 sm:$0xff]  }
 0x6de   :  { %2537 = vmatprep.subr.bf16.mxu0 %v6157_v61  ;;  %v6220_v61 = vld [vmem:[#allocation7 + $0x94] ss:$8 sps:$4 sm:$0xff]  }
 0x6e0   :  { %5267 = vmatmul.mubr.msk.bf16.gmra.mrb[32].mxu0 %vm2220_vm4, %v6142_v62  ;;  %v6218_v62 = vld [vmem:[#allocation7 + $0x90] ss:$8 sps:$4 sm:$0xff]  }
 0x6e1   :  { %2538 = vmatpush1.bf16.msra.mxu0 %v6155_v63  ;;  %v6223_v63 = vld [vmem:[#allocation7 + $0xa4] ss:$8 sps:$4 sm:$0xff]  }
 0x6e2   :  { %2539 = vmatprep.subr.bf16.mxu0 %v6160_v0  ;;  %v6221_v0 = vld [vmem:[#allocation7 + $0xa0] ss:$8 sps:$4 sm:$0xff]  }
 0x6e5   :  { %2540 = vmatpush1.bf16.msra.mxu0 %v6158_v1  ;;  %v6226_v1 = vld [vmem:[#allocation7 + $0xb4] ss:$8 sps:$4 sm:$0xff]  }
 0x6e6   :  { %2541 = vmatprep.subr.bf16.mxu0 %v6163_v2  ;;  %v6224_v2 = vld [vmem:[#allocation7 + $0xb0] ss:$8 sps:$4 sm:$0xff]  }
 0x6e9   :  { %2542 = vmatpush1.bf16.msra.mxu0 %v6161_v3  ;;  %v6229_v3 = vld [vmem:[#allocation7 + $0xc4] ss:$8 sps:$4 sm:$0xff]  }
 0x6ea   :  { %2543 = vmatprep.subr.bf16.mxu0 %v6166_v4  ;;  %v6227_v4 = vld [vmem:[#allocation7 + $0xc0] ss:$8 sps:$4 sm:$0xff]  }
 0x6ed   :  { %2544 = vmatpush1.bf16.msra.mxu0 %v6164_v5  ;;  %v6232_v5 = vld [vmem:[#allocation7 + $0xd4] ss:$8 sps:$4 sm:$0xff]  }
 0x6ee   :  { %2545 = vmatprep.subr.bf16.mxu0 %v6169_v6  ;;  %v6230_v6 = vld [vmem:[#allocation7 + $0xd0] ss:$8 sps:$4 sm:$0xff]  }
 0x6f1   :  { %2546 = vmatpush1.bf16.msra.mxu0 %v6167_v7  ;;  %v6235_v7 = vld [vmem:[#allocation7 + $0xe4] ss:$8 sps:$4 sm:$0xff]  }
 0x6f2   :  { %2547 = vmatprep.subr.bf16.mxu0 %v6172_v8  ;;  %v6233_v8 = vld [vmem:[#allocation7 + $0xe0] ss:$8 sps:$4 sm:$0xff]  }
 0x6f5   :  { %2548 = vmatpush1.bf16.msra.mxu0 %v6170_v9  ;;  %v6238_v9 = vld [vmem:[#allocation7 + $0xf4] ss:$8 sps:$4 sm:$0xff]  }
 0x6f6   :  { %2549 = vmatprep.subr.bf16.mxu0 %v6175_v11  ;;  %v6236_v11 = vld [vmem:[#allocation7 + $0xf0] ss:$8 sps:$4 sm:$0xff]  }
 0x6f9   :  { %2550 = vmatpush1.bf16.msra.mxu0 %v6173_v12  ;;  %v6241_v12 = vld [vmem:[#allocation7 + $0x204] ss:$8 sps:$4 sm:$0xff]  }
 0x6fa   :  { %2551 = vmatprep.subr.bf16.mxu0 %v6178_v15  ;;  %v6239_v15 = vld [vmem:[#allocation7 + $0x200] ss:$8 sps:$4 sm:$0xff]  }
 0x6fd   :  { %2552 = vmatpush1.bf16.msra.mxu0 %v6176_v16  ;;  %v6244_v16 = vld [vmem:[#allocation7 + $0x214] ss:$8 sps:$4 sm:$0xff]  }
 0x6fe   :  { %2553 = vmatprep.subr.bf16.mxu0 %v6181_v17  ;;  %v6242_v17 = vld [vmem:[#allocation7 + $0x210] ss:$8 sps:$4 sm:$0xff]  }
 0x701   :  { %2554 = vmatpush1.bf16.msra.mxu0 %v6179_v18  ;;  %v6247_v18 = vld [vmem:[#allocation7 + $0x224] ss:$8 sps:$4 sm:$0xff]  }
 0x702   :  { %2555 = vmatprep.subr.bf16.mxu0 %v6184_v20  ;;  %v6245_v20 = vld [vmem:[#allocation7 + $0x220] ss:$8 sps:$4 sm:$0xff]  }
 0x705   :  { %2556 = vmatpush1.bf16.msra.mxu0 %v6182_v21  ;;  %v6250_v21 = vld [vmem:[#allocation7 + $0x234] ss:$8 sps:$4 sm:$0xff]  }
 0x706   :  { %2557 = vmatprep.subr.bf16.mxu0 %v6187_v24  ;;  %v6253_v24 = vld [vmem:[#allocation7 + $0x244] ss:$8 sps:$4 sm:$0xff]  }
 0x709   :  { %2558 = vmatpush1.bf16.msra.mxu0 %v6185_v23  ;;  %v6248_v23 = vld [vmem:[#allocation7 + $0x230] ss:$8 sps:$4 sm:$0xff]  }
 0x70a   :  { %2559 = vmatprep.subr.bf16.mxu0 %v6190_v25  ;;  %v6251_v25 = vld [vmem:[#allocation7 + $0x240] ss:$8 sps:$4 sm:$0xff]  }
 0x70d   :  { %2560 = vmatpush1.bf16.msra.mxu0 %v6188_v26  ;;  %v6256_v26 = vld [vmem:[#allocation7 + $0x254] ss:$8 sps:$4 sm:$0xff]  }
 0x70e   :  { %2732 = vmatprep.subr.bf16.mxu0 %v6193_v27  ;;  %v6254_v27 = vld [vmem:[#allocation7 + $0x250] ss:$8 sps:$4 sm:$0xff]  }
 0x7a3   :  { %v7285_v28 = vpop.f32.mrb[24].mxu0 }
 0x7a4   :  { %v2273_v29 = vpop.f32.mrb[25].mxu0 }
 0x7a5   :  { %v7287_v10 = vpop.f32.mrb[26].mxu0 }
 0x7a6   :  { %v2300_v13 = vpack.c.bf16 %v7287_v10, %v7285_v28  ;;  %v2277_v14 = vpop.f32.mrb[27].mxu0  ;;  %v6259_v28 = vld [vmem:[#allocation7 + $0x264] ss:$8 sps:$4 sm:$0xff]   ;;  %v6262_v10 = vld [vmem:[#allocation7 + $0x274] ss:$8 sps:$4 sm:$0xff]  }
 0x7a7   :  { %v2301_v30 = vpack.c.bf16 %v2277_v14, %v2273_v29  ;;  %v6257_v29 = vld [vmem:[#allocation7 + $0x260] ss:$8 sps:$4 sm:$0xff]   ;;  %v6265_v14 = vld [vmem:[#allocation7 + $0x284] ss:$8 sps:$4 sm:$0xff]  }
 0x7ab   :  { %v2281_v31 = vpop.f32.mrb[28].mxu0 }
 0x7ac   :  { %v2283_v32 = vpop.f32.mrb[29].mxu0 }
 0x7ad   :  { %v2285_v33 = vpop.f32.mrb[30].mxu0 }
 0x7ae   :  { %v2334_v34 = vpack.c.bf16 %v2285_v33, %v2281_v31  ;;  %v2287_v35 = vpop.f32.mrb[31].mxu0  ;;  %v6268_v31 = vld [vmem:[#allocation7 + $0x294] ss:$8 sps:$4 sm:$0xff]   ;;  %v6271_v33 = vld [vmem:[#allocation7 + $0x2a4] ss:$8 sps:$4 sm:$0xff]  }
 0x7af   :  { %v2335_v19 = vpack.c.bf16 %v2287_v35, %v2283_v32  ;;  %v6266_v32 = vld [vmem:[#allocation7 + $0x290] ss:$8 sps:$4 sm:$0xff]   ;;  %v6274_v35 = vld [vmem:[#allocation7 + $0x2b4] ss:$8 sps:$4 sm:$0xff]  }
 0x7b1   :  { %2561 = vmatprep.mubr.bf16.mxu0 %v2335_v19  ;;  %v6272_v19 = vld [vmem:[#allocation7 + $0x2b0] ss:$8 sps:$4 sm:$0xff]  }
 0x7b2   :  { %2562 = vmatmul.mubr.bf16.vlgmr.msra.gmra.mrb[36].mxu0 %v2334_v34  ;;  %v6269_v34 = vld [vmem:[#allocation7 + $0x2a0] ss:$8 sps:$4 sm:$0xff]  }
 0x7b3   :  { %2733 = vmatpush1.bf16.msra.mxu0 %v6191_v36  ;;  %2764 = vmatprep.mubr.bf16.mxu0 %v2301_v30  ;;  %v7291_v39 = vpop.f32.mrb[32].mxu0  ;;  %v6263_v30 = vld [vmem:[#allocation7 + $0x280] ss:$8 sps:$4 sm:$0xff]   ;;  %v6277_v36 = vld [vmem:[#allocation7 + $0x2c4] ss:$8 sps:$4 sm:$0xff]  }
 0x7b4   :  { %2734 = vmatprep.subr.bf16.mxu0 %v6196_v37  ;;  %v7293_v41 = vpop.f32.mrb[33].mxu0  ;;  %v6275_v37 = vld [vmem:[#allocation7 + $0x2c0] ss:$8 sps:$4 sm:$0xff]  }
 0x7b5   :  { %v7295_v42 = vpop.f32.mrb[34].mxu0 }
 0x7b6   :  { %v2775_v43 = vpack.c.bf16 %v7295_v42, %v7291_v39  ;;  %v7299_v44 = vpop.f32.mrb[35].mxu0 }
 0x7b7   :  { %2735 = vmatpush1.bf16.msra.mxu0 %v6194_v38  ;;  %v2776_v46 = vpack.c.bf16 %v7299_v44, %v7293_v41  ;;  %v6280_v38 = vld [vmem:[#allocation7 + $0x2d4] ss:$8 sps:$4 sm:$0xff]   ;;  %v6283_v41 = vld [vmem:[#allocation7 + $0x2e4] ss:$8 sps:$4 sm:$0xff]   ;;  %v6281_v44 = vld [vmem:[#allocation7 + $0x2e0] ss:$8 sps:$4 sm:$0xff]  }
 0x7b8   :  { %2736 = vmatprep.subr.bf16.mxu0 %v6199_v40  ;;  %v6278_v40 = vld [vmem:[#allocation7 + $0x2d0] ss:$8 sps:$4 sm:$0xff]  }
 0x7bb   :  { %2737 = vmatpush1.bf16.msra.mxu0 %v6197_v45  ;;  %v6286_v45 = vld [vmem:[#allocation7 + $0x2f4] ss:$8 sps:$4 sm:$0xff]  }
 0x7bc   :  { %2738 = vmatprep.subr.bf16.mxu0 %v6202_v47  ;;  %v3017_v47 = vld [vmem:[%s7747_s12] sm:$0x3] }
 0x7bf   :  { %2739 = vmatpush1.bf16.msra.mxu0 %v6200_v48  ;;  %v3022_v48 = vrot.slane %v3017_v47, %v6903_v51 }
 0x7c0   :  { %2740 = vmatprep.subr.bf16.mxu0 %v6205_v49  ;;  %v3026_v49 = vrot.slane %v3017_v47, %v6908_v53 }
 0x7c3   :  { %2741 = vmatpush1.bf16.msra.mxu0 %v6203_v50 }
 0x7c4   :  { %2742 = vmatprep.subr.bf16.mxu0 %v6208_v52 }
 0x7c7   :  { %2743 = vmatpush1.bf16.msra.mxu0 %v6206_v54 }
 0x7c8   :  { %2744 = vmatprep.subr.bf16.mxu0 %v6211_v55 }
 0x7cb   :  { %2745 = vmatpush1.bf16.msra.mxu0 %v6209_v56 }
 0x7cc   :  { %2746 = vmatprep.subr.bf16.mxu0 %v6214_v57 }
 0x7cf   :  { %2747 = vmatpush1.bf16.msra.mxu0 %v6212_v58 }
 0x7d0   :  { %2748 = vmatprep.subr.bf16.mxu0 %v6217_v59 }
 0x7d3   :  { %2749 = vmatpush1.bf16.msra.mxu0 %v6215_v60 }
 0x7d4   :  { %2750 = vmatprep.subr.bf16.mxu0 %v6220_v61 }
 0x7d7   :  { %2751 = vmatpush1.bf16.msra.mxu0 %v6218_v62 }
 0x7d8   :  { %2752 = vmatprep.subr.bf16.mxu0 %v6223_v63  ;;  %v6295_v63 = vld [vmem:[#allocation8 + $0x104] ss:$8 sps:$4 sm:$0xff]  }
 0x7db   :  { %2753 = vmatpush1.bf16.msra.mxu0 %v6221_v0  ;;  %v6287_v0 = vld [vmem:[%s7748_s13] sm:$0xff]  }
 0x7dc   :  { %2754 = vmatprep.subr.bf16.mxu0 %v6226_v1  ;;  %v6293_v1 = vld [vmem:[#allocation8 + $0x100] ss:$8 sps:$4 sm:$0xff]  }
 0x7df   :  { %2755 = vmatpush1.bf16.msra.mxu0 %v6224_v2  ;;  %v6298_v2 = vld [vmem:[#allocation8 + $0x114] ss:$8 sps:$4 sm:$0xff]  }
 0x7e0   :  { %2756 = vmatprep.subr.bf16.mxu0 %v6229_v3  ;;  %v6296_v3 = vld [vmem:[#allocation8 + $0x110] ss:$8 sps:$4 sm:$0xff]  }
 0x7e3   :  { %2757 = vmatpush1.bf16.msra.mxu0 %v6227_v4  ;;  %v6301_v4 = vld [vmem:[#allocation8 + $0x124] ss:$8 sps:$4 sm:$0xff]  }
 0x7e4   :  { %2758 = vmatprep.subr.bf16.mxu0 %v6232_v5  ;;  %v6288_v5 = vld [vmem:[%s7748_s13 + $0x8] sm:$0xff]  }
 0x7e7   :  { %2759 = vmatpush1.bf16.msra.mxu0 %v6230_v6  ;;  %v6299_v6 = vld [vmem:[#allocation8 + $0x120] ss:$8 sps:$4 sm:$0xff]  }
 0x7e8   :  { %2760 = vmatprep.subr.bf16.mxu0 %v6235_v7  ;;  %v6304_v7 = vld [vmem:[#allocation8 + $0x134] ss:$8 sps:$4 sm:$0xff]  }
 0x7eb   :  { %2761 = vmatpush1.bf16.msra.mxu0 %v6233_v8  ;;  %v6302_v8 = vld [vmem:[#allocation8 + $0x130] ss:$8 sps:$4 sm:$0xff]  }
 0x7ec   :  { %2762 = vmatprep.subr.bf16.mxu0 %v6238_v9  ;;  %v6307_v9 = vld [vmem:[#allocation8 + $0x144] ss:$8 sps:$4 sm:$0xff]  }
 0x7ef   :  { %2763 = vmatpush1.bf16.msra.mxu0 %v6236_v11  ;;  %v6289_v11 = vld [vmem:[%s7748_s13 + $0x10] sm:$0xff]  }
 0x7f0   :  { %2970 = vmatprep.subr.bf16.mxu0 %v6241_v12  ;;  %v6305_v12 = vld [vmem:[#allocation8 + $0x140] ss:$8 sps:$4 sm:$0xff]  }
 0x7f2   :  { %2765 = vmatmul.mubr.bf16.vlgmr.msra.gmra.mrb[36].mxu0 %v2300_v13  ;;  %v6260_v13 = vld [vmem:[#allocation7 + $0x270] ss:$8 sps:$4 sm:$0xff]  }
 0x7f3   :  { %2971 = vmatpush1.bf16.msra.mxu0 %v6239_v15  ;;  %3002 = vmatprep.mubr.bf16.mxu0 %v2776_v46  ;;  %v6284_v46 = vld [vmem:[#allocation7 + $0x2f0] ss:$8 sps:$4 sm:$0xff]   ;;  %v6310_v15 = vld [vmem:[#allocation8 + $0x154] ss:$8 sps:$4 sm:$0xff]  }
 0x7f4   :  { %2972 = vmatprep.subr.bf16.mxu0 %v6244_v16  ;;  %v6308_v16 = vld [vmem:[#allocation8 + $0x150] ss:$8 sps:$4 sm:$0xff]  }
 0x7f7   :  { %2973 = vmatpush1.bf16.msra.mxu0 %v6242_v17  ;;  %v6313_v17 = vld [vmem:[#allocation8 + $0x164] ss:$8 sps:$4 sm:$0xff]  }
 0x7f8   :  { %2974 = vmatprep.subr.bf16.mxu0 %v6247_v18  ;;  %v6290_v18 = vld [vmem:[%s7748_s13 + $0x18] sm:$0xff]  }
 0x7fb   :  { %2975 = vmatpush1.bf16.msra.mxu0 %v6245_v20  ;;  %v6311_v20 = vld [vmem:[#allocation8 + $0x160] ss:$8 sps:$4 sm:$0xff]  }
 0x7fc   :  { %2976 = vmatprep.subr.bf16.mxu0 %v6250_v21  ;;  %v6316_v21 = vld [vmem:[#allocation8 + $0x174] ss:$8 sps:$4 sm:$0xff]  }
 0x7ff   :  { %2977 = vmatpush1.bf16.msra.mxu0 %v6248_v23  ;;  %v6314_v23 = vld [vmem:[#allocation8 + $0x170] ss:$8 sps:$4 sm:$0xff]  }
 0x800   :  { %2978 = vmatprep.subr.bf16.mxu0 %v6253_v24  ;;  %v6319_v24 = vld [vmem:[#allocation8 + $0x184] ss:$8 sps:$4 sm:$0xff]  }
 0x803   :  { %2979 = vmatpush1.bf16.msra.mxu0 %v6251_v25  ;;  %v6291_v25 = vld [vmem:[%s7748_s13 + $0x20] sm:$0xff]  }
 0x804   :  { %2980 = vmatprep.subr.bf16.mxu0 %v6256_v26  ;;  %v6317_v26 = vld [vmem:[#allocation8 + $0x180] ss:$8 sps:$4 sm:$0xff]  }
 0x807   :  { %2981 = vmatpush1.bf16.msra.mxu0 %v6254_v27  ;;  %v6322_v27 = vld [vmem:[#allocation8 + $0x194] ss:$8 sps:$4 sm:$0xff]  }
 0x808   :  { %2982 = vmatprep.subr.bf16.mxu0 %v6259_v28  ;;  %v6320_v28 = vld [vmem:[#allocation8 + $0x190] ss:$8 sps:$4 sm:$0xff]  }
 0x80b   :  { %2983 = vmatpush1.bf16.msra.mxu0 %v6257_v29  ;;  %v6325_v29 = vld [vmem:[#allocation8 + $0x1a4] ss:$8 sps:$4 sm:$0xff]  }
 0x80c   :  { %2984 = vmatprep.subr.bf16.mxu0 %v6262_v10  ;;  %v6292_v10 = vld [vmem:[%s7748_s13 + $0x28] sm:$0xff]  }
 0x80f   :  { %2985 = vmatpush1.bf16.msra.mxu0 %v6260_v13  ;;  %v6323_v13 = vld [vmem:[#allocation8 + $0x1a0] ss:$8 sps:$4 sm:$0xff]  }
 0x810   :  { %2986 = vmatprep.subr.bf16.mxu0 %v6265_v14  ;;  %v6328_v14 = vld [vmem:[#allocation8 + $0x1b4] ss:$8 sps:$4 sm:$0xff]  }
 0x813   :  { %2987 = vmatpush1.bf16.msra.mxu0 %v6263_v30  ;;  %v6326_v30 = vld [vmem:[#allocation8 + $0x1b0] ss:$8 sps:$4 sm:$0xff]  }
 0x814   :  { %2988 = vmatprep.subr.bf16.mxu0 %v6268_v31  ;;  %v6331_v31 = vld [vmem:[#allocation8 + $0x1c4] ss:$8 sps:$4 sm:$0xff]  }
 0x817   :  { %2989 = vmatpush1.bf16.msra.mxu0 %v6266_v32  ;;  %v6329_v32 = vld [vmem:[#allocation8 + $0x1c0] ss:$8 sps:$4 sm:$0xff]  }
 0x818   :  { %2990 = vmatprep.subr.bf16.mxu0 %v6271_v33  ;;  %v6332_v33 = vld [vmem:[#allocation8 + $0x1d0] ss:$8 sps:$4 sm:$0xff]  }
 0x81b   :  { %2991 = vmatpush1.bf16.msra.mxu0 %v6269_v34  ;;  %v6334_v34 = vld [vmem:[#allocation8 + $0x1d4] ss:$8 sps:$4 sm:$0xff]  }
 0x81c   :  { %2992 = vmatprep.subr.bf16.mxu0 %v6274_v35  ;;  %v6335_v35 = vld [vmem:[#allocation8 + $0x1e0] ss:$8 sps:$4 sm:$0xff]  }
 0x81f   :  { %2993 = vmatpush1.bf16.msra.mxu0 %v6272_v19  ;;  %v6337_v19 = vld [vmem:[#allocation8 + $0x1e4] ss:$8 sps:$4 sm:$0xff]  }
 0x820   :  { %2994 = vmatprep.subr.bf16.mxu0 %v6277_v36  ;;  %v6340_v36 = vld [vmem:[#allocation8 + $0x1f4] ss:$8 sps:$4 sm:$0xff]  }
 0x823   :  { %2995 = vmatpush1.bf16.msra.mxu0 %v6275_v37  ;;  %v6338_v37 = vld [vmem:[#allocation8 + $0x1f0] ss:$8 sps:$4 sm:$0xff]  }
 0x824   :  { %2996 = vmatprep.subr.bf16.mxu0 %v6280_v38  ;;  %v6343_v38 = vld [vmem:[#allocation8 + $0x4] ss:$8 sps:$4 sm:$0xff]  }
 0x827   :  { %2997 = vmatpush1.bf16.msra.mxu0 %v6278_v40 }
 0x828   :  { %2998 = vmatprep.subr.bf16.mxu0 %v6283_v41 }
 0x82b   :  { %2999 = vmatpush1.bf16.msra.mxu0 %v6281_v44 }
 0x82c   :  { %3000 = vmatprep.subr.bf16.mxu0 %v6286_v45 }
 0x82f   :  { %3001 = vmatpush1.bf16.msra.mxu0 %v6284_v46 }
 0x832   :  { %3003 = vmatmul.mubr.bf16.vlgmr.msra.gmra.mrb[36].mxu0 %v2775_v43 }
 0x833   :  { %4133 = vmatprep.mubr.bf16.mxu0 %v6653_v22 }
 0x905   :  { %v3004_v50 = vpop.f32.mrb[36].mxu0 }
 0x906   :  { %v3029_v52 = vadd.f32 %v3022_v48, %v3004_v50  ;;  %v3006_v54 = vpop.f32.mrb[37].mxu0 }
 0x907   :  { %v3030_v55 = vadd.f32 %v3026_v49, %v3006_v54  ;;  %v3008_v56 = vpop.f32.mrb[38].mxu0 }
 0x908   :  { %v3031_v57 = vadd.f32 %v3022_v48, %v3008_v56  ;;  %v3010_v58 = vpop.f32.mrb[39].mxu0  ;;  %v3033_v39 = vmax.f32 %v3029_v52, 0.0 }
 0x909   :  { %v3032_v59 = vadd.f32 %v3026_v49, %v3010_v58  ;;  %v3034_v43 = vmax.f32 %v3030_v55, 0.0 }
 0x90a   :  { %v3035_v42 = vmax.f32 %v3031_v57, 0.0 }
 0x90b   :  { %v3036_v60 = vmax.f32 %v3032_v59, 0.0 }
 0x90c   :  { %v3037_v61 = vpack.c.bf16 %v3035_v42, %v3033_v39 }
 0x90d   :  { %v3038_v62 = vpack.c.bf16 %v3036_v60, %v3034_v43  ;;  %v6341_v43 = vld [vmem:[#allocation8] ss:$8 sps:$4 sm:$0xff]   ;;  %v6346_v60 = vld [vmem:[#allocation8 + $0x14] ss:$8 sps:$4 sm:$0xff]  }
 0x90f   :  { %3099 = vmatprep.subr.bf16.mxu1 %v3038_v62  ;;  %v6344_v62 = vld [vmem:[#allocation8 + $0x10] ss:$8 sps:$4 sm:$0xff]  }
 0x910   :  { %3100 = vmatpush1.bf16.msra.mxu1 %v3037_v61 }
 0x911   :  { %3425 = vmatprep.subr.bf16.mxu1 %v6295_v63 }
 0x913   :  { %5370 = vmatmul.mubr.msk.bf16.vlgmr.msra.gmra.mrb[32].mxu1 %vm1414_vm2, %v6287_v0  ;;  %v6349_v0 = vld [vmem:[#allocation8 + $0x24] ss:$8 sps:$4 sm:$0xff]  }
 0x914   :  { %3141 = vmatprep.mubr.bf16.mxu1 %v6653_v22  ;;  %3426 = vmatpush1.bf16.msra.mxu1 %v6293_v1 }
 0x915   :  { %3427 = vmatprep.subr.bf16.mxu1 %v6298_v2 }
 0x918   :  { %3428 = vmatpush1.bf16.msra.mxu1 %v6296_v3 }
 0x919   :  { %3429 = vmatprep.subr.bf16.mxu1 %v6301_v4 }
 0x91b   :  { %5371 = vmatmul.mubr.msk.bf16.gmra.mrb[36].mxu1 %vm1414_vm2, %v6288_v5  ;;  %v6347_v5 = vld [vmem:[#allocation8 + $0x20] ss:$8 sps:$4 sm:$0xff]  }
 0x91c   :  { %3151 = vmatprep.mubr.bf16.mxu1 %v6653_v22  ;;  %3430 = vmatpush1.bf16.msra.mxu1 %v6299_v6  ;;  %v6352_v6 = vld [vmem:[#allocation8 + $0x34] ss:$8 sps:$4 sm:$0xff]  }
 0x91d   :  { %3431 = vmatprep.subr.bf16.mxu1 %v6304_v7  ;;  %v6350_v7 = vld [vmem:[#allocation8 + $0x30] ss:$8 sps:$4 sm:$0xff]  }
 0x920   :  { %3432 = vmatpush1.bf16.msra.mxu1 %v6302_v8 }
 0x921   :  { %3433 = vmatprep.subr.bf16.mxu1 %v6307_v9  ;;  %v6355_v9 = vld [vmem:[#allocation8 + $0x44] ss:$8 sps:$4 sm:$0xff]  }
 0x923   :  { %5372 = vmatmul.mubr.msk.bf16.gmra.mrb[40].mxu1 %vm1414_vm2, %v6289_v11 }
 0x924   :  { %3161 = vmatprep.mubr.bf16.mxu1 %v6653_v22  ;;  %3434 = vmatpush1.bf16.msra.mxu1 %v6305_v12 }
 0x925   :  { %3435 = vmatprep.subr.bf16.mxu1 %v6310_v15 }
 0x928   :  { %3436 = vmatpush1.bf16.msra.mxu1 %v6308_v16 }
 0x929   :  { %3437 = vmatprep.subr.bf16.mxu1 %v6313_v17  ;;  %v6353_v17 = vld [vmem:[#allocation8 + $0x40] ss:$8 sps:$4 sm:$0xff]  }
 0x92b   :  { %5373 = vmatmul.mubr.msk.bf16.gmra.mrb[44].mxu1 %vm1414_vm2, %v6290_v18 }
 0x92c   :  { %3171 = vmatprep.mubr.bf16.mxu1 %v6653_v22  ;;  %3438 = vmatpush1.bf16.msra.mxu1 %v6311_v20  ;;  %v6358_v20 = vld [vmem:[#allocation8 + $0x54] ss:$8 sps:$4 sm:$0xff]  }
 0x92d   :  { %3439 = vmatprep.subr.bf16.mxu1 %v6316_v21  ;;  %v6356_v21 = vld [vmem:[#allocation8 + $0x50] ss:$8 sps:$4 sm:$0xff]  }
 0x930   :  { %3440 = vmatpush1.bf16.msra.mxu1 %v6314_v23 }
 0x931   :  { %3441 = vmatprep.subr.bf16.mxu1 %v6319_v24  ;;  %v6361_v24 = vld [vmem:[#allocation8 + $0x64] ss:$8 sps:$4 sm:$0xff]  }
 0x933   :  { %5374 = vmatmul.mubr.msk.bf16.gmra.mrb[48].mxu1 %vm1414_vm2, %v6291_v25 }
 0x934   :  { %3181 = vmatprep.mubr.bf16.mxu1 %v6653_v22  ;;  %3442 = vmatpush1.bf16.msra.mxu1 %v6317_v26 }
 0x935   :  { %3443 = vmatprep.subr.bf16.mxu1 %v6322_v27 }
 0x938   :  { %3444 = vmatpush1.bf16.msra.mxu1 %v6320_v28 }
 0x939   :  { %3445 = vmatprep.subr.bf16.mxu1 %v6325_v29  ;;  %v6359_v29 = vld [vmem:[#allocation8 + $0x60] ss:$8 sps:$4 sm:$0xff]  }
 0x93b   :  { %5375 = vmatmul.mubr.msk.bf16.gmra.mrb[52].mxu1 %vm1414_vm2, %v6292_v10 }
 0x93c   :  { %3446 = vmatpush1.bf16.msra.mxu1 %v6323_v13  ;;  %v6364_v13 = vld [vmem:[#allocation8 + $0x74] ss:$8 sps:$4 sm:$0xff]  }
 0x93d   :  { %3447 = vmatprep.subr.bf16.mxu1 %v6328_v14  ;;  %v6362_v14 = vld [vmem:[#allocation8 + $0x70] ss:$8 sps:$4 sm:$0xff]  }
 0x940   :  { %3448 = vmatpush1.bf16.msra.mxu1 %v6326_v30  ;;  %v6367_v30 = vld [vmem:[#allocation8 + $0x84] ss:$8 sps:$4 sm:$0xff]  }
 0x941   :  { %3449 = vmatprep.subr.bf16.mxu1 %v6331_v31  ;;  %v6365_v31 = vld [vmem:[#allocation8 + $0x80] ss:$8 sps:$4 sm:$0xff]  }
 0x944   :  { %3450 = vmatpush1.bf16.msra.mxu1 %v6329_v32  ;;  %v6370_v32 = vld [vmem:[#allocation8 + $0x94] ss:$8 sps:$4 sm:$0xff]  }
 0x945   :  { %3451 = vmatprep.subr.bf16.mxu1 %v6334_v34  ;;  %v6373_v34 = vld [vmem:[#allocation8 + $0xa4] ss:$8 sps:$4 sm:$0xff]  }
 0x948   :  { %3452 = vmatpush1.bf16.msra.mxu1 %v6332_v33  ;;  %v6368_v33 = vld [vmem:[#allocation8 + $0x90] ss:$8 sps:$4 sm:$0xff]  }
 0x949   :  { %3453 = vmatprep.subr.bf16.mxu1 %v6337_v19  ;;  %v6376_v19 = vld [vmem:[#allocation8 + $0xb4] ss:$8 sps:$4 sm:$0xff]  }
 0x94c   :  { %3454 = vmatpush1.bf16.msra.mxu1 %v6335_v35  ;;  %v6371_v35 = vld [vmem:[#allocation8 + $0xa0] ss:$8 sps:$4 sm:$0xff]  }
 0x94d   :  { %3455 = vmatprep.subr.bf16.mxu1 %v6340_v36  ;;  %v6374_v36 = vld [vmem:[#allocation8 + $0xb0] ss:$8 sps:$4 sm:$0xff]  }
 0x950   :  { %3456 = vmatpush1.bf16.msra.mxu1 %v6338_v37  ;;  %v6379_v37 = vld [vmem:[#allocation8 + $0xc4] ss:$8 sps:$4 sm:$0xff]  }
 0x951   :  { %3638 = vmatprep.subr.bf16.mxu1 %v6343_v38  ;;  %v6377_v38 = vld [vmem:[#allocation8 + $0xc0] ss:$8 sps:$4 sm:$0xff]  }
 0x9e6   :  { %v7344_v40 = vpop.f32.mrb[32].mxu1 }
 0x9e7   :  { %v3135_v41 = vpop.f32.mrb[33].mxu1 }
 0x9e8   :  { %v7346_v44 = vpop.f32.mrb[34].mxu1 }
 0x9e9   :  { %v3192_v45 = vpack.c.bf16 %v7346_v44, %v7344_v40  ;;  %v3139_v46 = vpop.f32.mrb[35].mxu1  ;;  %v6403_v40 = vld [vmem:[#allocation8 + $0x244] ss:$8 sps:$4 sm:$0xff]   ;;  %v6401_v44 = vld [vmem:[#allocation8 + $0x240] ss:$8 sps:$4 sm:$0xff]  }
 0x9ea   :  { %v3193_v47 = vpack.c.bf16 %v3139_v46, %v3135_v41  ;;  %v6382_v41 = vld [vmem:[#allocation8 + $0xd4] ss:$8 sps:$4 sm:$0xff]   ;;  %v6380_v46 = vld [vmem:[#allocation8 + $0xd0] ss:$8 sps:$4 sm:$0xff]  }
 0x9ee   :  { %v7350_v48 = vpop.f32.mrb[36].mxu1 }
 0x9ef   :  { %v7352_v49 = vpop.f32.mrb[37].mxu1 }
 0x9f0   :  { %v7354_v50 = vpop.f32.mrb[38].mxu1 }
 0x9f1   :  { %v3194_v52 = vpack.c.bf16 %v7354_v50, %v7350_v48  ;;  %v7358_v54 = vpop.f32.mrb[39].mxu1  ;;  %v6412_v48 = vld [vmem:[#allocation8 + $0x274] ss:$8 sps:$4 sm:$0xff]   ;;  %v6410_v50 = vld [vmem:[#allocation8 + $0x270] ss:$8 sps:$4 sm:$0xff]  }
 0x9f2   :  { %v3195_v55 = vpack.c.bf16 %v7358_v54, %v7352_v49  ;;  %v6404_v49 = vld [vmem:[#allocation8 + $0x250] ss:$8 sps:$4 sm:$0xff]   ;;  %v6409_v54 = vld [vmem:[#allocation8 + $0x264] ss:$8 sps:$4 sm:$0xff]  }
 0x9f6   :  { %v3153_v56 = vpop.f32.mrb[40].mxu1 }
 0x9f7   :  { %v3155_v57 = vpop.f32.mrb[41].mxu1 }
 0x9f8   :  { %v3157_v58 = vpop.f32.mrb[42].mxu1 }
 0x9f9   :  { %v3228_v59 = vpack.c.bf16 %v3157_v58, %v3153_v56  ;;  %v3159_v39 = vpop.f32.mrb[43].mxu1  ;;  %v6383_v56 = vld [vmem:[#allocation8 + $0xe0] ss:$8 sps:$4 sm:$0xff]   ;;  %v6386_v58 = vld [vmem:[#allocation8 + $0xf0] ss:$8 sps:$4 sm:$0xff]  }
 0x9fa   :  { %v3229_v42 = vpack.c.bf16 %v3159_v39, %v3155_v57  ;;  %v6388_v57 = vld [vmem:[#allocation8 + $0xf4] ss:$8 sps:$4 sm:$0xff]   ;;  %v6389_v39 = vld [vmem:[#allocation8 + $0x200] ss:$8 sps:$4 sm:$0xff]  }
 0x9fc   :  { %3457 = vmatprep.mubr.bf16.mxu1 %v3229_v42  ;;  %v6394_v42 = vld [vmem:[#allocation8 + $0x214] ss:$8 sps:$4 sm:$0xff]  }
 0x9fd   :  { %3458 = vmatmul.mubr.bf16.vlgmr.msra.gmra.mrb[56].mxu1 %v3228_v59  ;;  %v6391_v59 = vld [vmem:[#allocation8 + $0x204] ss:$8 sps:$4 sm:$0xff]  }
 0x9fe   :  { %3639 = vmatpush1.bf16.msra.mxu1 %v6341_v43  ;;  %v3163_v61 = vpop.f32.mrb[44].mxu1  ;;  %v6392_v43 = vld [vmem:[#allocation8 + $0x210] ss:$8 sps:$4 sm:$0xff]  }
 0x9ff   :  { %v3165_v63 = vpop.f32.mrb[45].mxu1  ;;  %3640 = vmatprep.subr.bf16.mxu1 %v6346_v60  ;;  %v6397_v60 = vld [vmem:[#allocation8 + $0x224] ss:$8 sps:$4 sm:$0xff]  }
 0xa00   :  { %v3167_v1 = vpop.f32.mrb[46].mxu1 }
 0xa01   :  { %v3230_v2 = vpack.c.bf16 %v3167_v1, %v3163_v61  ;;  %v3169_v3 = vpop.f32.mrb[47].mxu1  ;;  %v6395_v61 = vld [vmem:[#allocation8 + $0x220] ss:$8 sps:$4 sm:$0xff]   ;;  %v6418_v1 = vld [vmem:[#allocation8 + $0x294] ss:$8 sps:$4 sm:$0xff]  }
 0xa02   :  { %v3231_v4 = vpack.c.bf16 %v3169_v3, %v3165_v63  ;;  %3641 = vmatpush1.bf16.msra.mxu1 %v6344_v62  ;;  %v6400_v62 = vld [vmem:[#allocation8 + $0x234] ss:$8 sps:$4 sm:$0xff]   ;;  %v6398_v63 = vld [vmem:[#allocation8 + $0x230] ss:$8 sps:$4 sm:$0xff]   ;;  %v6421_v3 = vld [vmem:[#allocation8 + $0x2a4] ss:$8 sps:$4 sm:$0xff]  }
 0xa03   :  { %3642 = vmatprep.subr.bf16.mxu1 %v6349_v0  ;;  %v6413_v0 = vld [vmem:[#allocation8 + $0x280] ss:$8 sps:$4 sm:$0xff]  }
 0xa04   :  { %3467 = vmatprep.mubr.bf16.mxu1 %v3231_v4  ;;  %v6419_v4 = vld [vmem:[#allocation8 + $0x2a0] ss:$8 sps:$4 sm:$0xff]  }
 0xa05   :  { %3468 = vmatmul.mubr.bf16.gmra.mrb[60].mxu1 %v3230_v2  ;;  %v6416_v2 = vld [vmem:[#allocation8 + $0x290] ss:$8 sps:$4 sm:$0xff]  }
 0xa06   :  { %3643 = vmatpush1.bf16.msra.mxu1 %v6347_v5  ;;  %3670 = vmatprep.mubr.bf16.mxu1 %v3193_v47  ;;  %v7362_v8 = vpop.f32.mrb[48].mxu1  ;;  %v6385_v47 = vld [vmem:[#allocation8 + $0xe4] ss:$8 sps:$4 sm:$0xff]   ;;  %v6424_v5 = vld [vmem:[#allocation8 + $0x2b4] ss:$8 sps:$4 sm:$0xff]  }
 0xa07   :  { %3644 = vmatprep.subr.bf16.mxu1 %v6352_v6  ;;  %v7364_v11 = vpop.f32.mrb[49].mxu1  ;;  %v6422_v6 = vld [vmem:[#allocation8 + $0x2b0] ss:$8 sps:$4 sm:$0xff]  }
 0xa08   :  { %v7366_v12 = vpop.f32.mrb[50].mxu1 }
 0xa09   :  { %v3691_v15 = vpack.c.bf16 %v7366_v12, %v7362_v8  ;;  %v7370_v16 = vpop.f32.mrb[51].mxu1  ;;  %v3949_v8 = vld [vmem:[%s7750_s15] sm:$0x3] }
 0xa0a   :  { %3645 = vmatpush1.bf16.msra.mxu1 %v6350_v7  ;;  %v3692_v18 = vpack.c.bf16 %v7370_v16, %v7364_v11  ;;  %v6427_v7 = vld [vmem:[#allocation8 + $0x2c4] ss:$8 sps:$4 sm:$0xff]   ;;  %v6430_v11 = vld [vmem:[#allocation8 + $0x2d4] ss:$8 sps:$4 sm:$0xff]   ;;  %v6428_v16 = vld [vmem:[#allocation8 + $0x2d0] ss:$8 sps:$4 sm:$0xff]   ;;  %v3954_v12 = vrot.slane %v3949_v8, %v6903_v51 }
 0xa0b   :  { %3646 = vmatprep.subr.bf16.mxu1 %v6355_v9  ;;  %v6425_v9 = vld [vmem:[#allocation8 + $0x2c0] ss:$8 sps:$4 sm:$0xff]  }
 0xa0e   :  { %3647 = vmatpush1.bf16.msra.mxu1 %v6353_v17  ;;  %v7374_v23 = vpop.f32.mrb[52].mxu1  ;;  %v6433_v17 = vld [vmem:[#allocation8 + $0x2e4] ss:$8 sps:$4 sm:$0xff]  }
 0xa0f   :  { %3648 = vmatprep.subr.bf16.mxu1 %v6358_v20  ;;  %v7376_v25 = vpop.f32.mrb[53].mxu1  ;;  %v6436_v20 = vld [vmem:[#allocation8 + $0x2f4] ss:$8 sps:$4 sm:$0xff]  }
 0xa10   :  { %v7378_v26 = vpop.f32.mrb[54].mxu1 }
 0xa11   :  { %v3693_v27 = vpack.c.bf16 %v7378_v26, %v7374_v23  ;;  %v7382_v28 = vpop.f32.mrb[55].mxu1 }
 0xa12   :  { %3649 = vmatpush1.bf16.msra.mxu1 %v6356_v21  ;;  %v3694_v10 = vpack.c.bf16 %v7382_v28, %v7376_v25  ;;  %v6434_v21 = vld [vmem:[#allocation8 + $0x2f0] ss:$8 sps:$4 sm:$0xff]  }
 0xa13   :  { %3650 = vmatprep.subr.bf16.mxu1 %v6361_v24  ;;  %v6453_v24 = vld [vmem:[%s7752_s17 + $0xc0] sm:$0xff]  }
 0xa16   :  { %3651 = vmatpush1.bf16.msra.mxu1 %v6359_v29  ;;  %v6454_v29 = vld [vmem:[%s7752_s17 + $0x80] sm:$0xff]  }
 0xa17   :  { %3652 = vmatprep.subr.bf16.mxu1 %v6364_v13 }
 0xa1a   :  { %3653 = vmatpush1.bf16.msra.mxu1 %v6362_v14 }
 0xa1b   :  { %3654 = vmatprep.subr.bf16.mxu1 %v6367_v30 }
 0xa1e   :  { %3655 = vmatpush1.bf16.msra.mxu1 %v6365_v31 }
 0xa1f   :  { %3656 = vmatprep.subr.bf16.mxu1 %v6370_v32 }
 0xa22   :  { %3657 = vmatpush1.bf16.msra.mxu1 %v6368_v33 }
 0xa23   :  { %3658 = vmatprep.subr.bf16.mxu1 %v6373_v34 }
 0xa26   :  { %3659 = vmatpush1.bf16.msra.mxu1 %v6371_v35 }
 0xa27   :  { %3660 = vmatprep.subr.bf16.mxu1 %v6376_v19 }
 0xa2a   :  { %3661 = vmatpush1.bf16.msra.mxu1 %v6374_v36 }
 0xa2b   :  { %3662 = vmatprep.subr.bf16.mxu1 %v6379_v37 }
 0xa2e   :  { %3663 = vmatpush1.bf16.msra.mxu1 %v6377_v38 }
 0xa2f   :  { %3664 = vmatprep.subr.bf16.mxu1 %v6382_v41 }
 0xa32   :  { %3665 = vmatpush1.bf16.msra.mxu1 %v6380_v46 }
 0xa33   :  { %3666 = vmatprep.subr.bf16.mxu1 %v6385_v47 }
 0xa36   :  { %3667 = vmatpush1.bf16.msra.mxu1 %v6383_v56 }
 0xa37   :  { %3668 = vmatprep.subr.bf16.mxu1 %v6388_v57 }
 0xa3a   :  { %3669 = vmatpush1.bf16.msra.mxu1 %v6386_v58 }
 0xa3b   :  { %3888 = vmatprep.subr.bf16.mxu1 %v6391_v59 }
 0xa3d   :  { %3671 = vmatmul.mubr.bf16.vlgmr.msra.gmra.mrb[56].mxu1 %v3192_v45  ;;  %v6406_v45 = vld [vmem:[#allocation8 + $0x254] ss:$8 sps:$4 sm:$0xff]  }
 0xa3e   :  { %3680 = vmatprep.mubr.bf16.mxu1 %v3195_v55  ;;  %3889 = vmatpush1.bf16.msra.mxu1 %v6389_v39  ;;  %v6407_v55 = vld [vmem:[#allocation8 + $0x260] ss:$8 sps:$4 sm:$0xff]  }
 0xa3f   :  { %3890 = vmatprep.subr.bf16.mxu1 %v6394_v42  ;;  %v6449_v42 = vld [vmem:[%s7752_s17 + $0x140] sm:$0xff]  }
 0xa42   :  { %3891 = vmatpush1.bf16.msra.mxu1 %v6392_v43  ;;  %v6437_v43 = vld [vmem:[%s7751_s16] sm:$0xff]  }
 0xa43   :  { %3892 = vmatprep.subr.bf16.mxu1 %v6397_v60  ;;  %v6450_v60 = vld [vmem:[%s7752_s17 + $0x100] sm:$0xff]  }
 0xa45   :  { %3681 = vmatmul.mubr.bf16.gmra.mrb[60].mxu1 %v3194_v52  ;;  %v6415_v52 = vld [vmem:[#allocation8 + $0x284] ss:$8 sps:$4 sm:$0xff]  }
 0xa46   :  { %3893 = vmatpush1.bf16.msra.mxu1 %v6395_v61  ;;  %3920 = vmatprep.mubr.bf16.mxu1 %v3692_v18  ;;  %v6431_v18 = vld [vmem:[#allocation8 + $0x2e0] ss:$8 sps:$4 sm:$0xff]  }
 0xa47   :  { %3894 = vmatprep.subr.bf16.mxu1 %v6400_v62  ;;  %v6451_v61 = vld [vmem:[%s7752_s17 + $0x148] sm:$0xff]  }
 0xa48   :  { %v6452_v62 = vld [vmem:[%s7752_s17 + $0x108] sm:$0xff]  }
 0xa4a   :  { %3895 = vmatpush1.bf16.msra.mxu1 %v6398_v63  ;;  %v6438_v63 = vld [vmem:[%s7751_s16 + $0x8] sm:$0xff]  }
 0xa4b   :  { %3896 = vmatprep.subr.bf16.mxu1 %v6403_v40  ;;  %v6439_v40 = vld [vmem:[%s7751_s16 + $0x10] sm:$0xff]  }
 0xa4e   :  { %3897 = vmatpush1.bf16.msra.mxu1 %v6401_v44  ;;  %v6440_v44 = vld [vmem:[%s7751_s16 + $0x18] sm:$0xff]  }
 0xa4f   :  { %3898 = vmatprep.subr.bf16.mxu1 %v6406_v45  ;;  %v6441_v45 = vld [vmem:[%s7751_s16 + $0x20] sm:$0xff]  }
 0xa52   :  { %3899 = vmatpush1.bf16.msra.mxu1 %v6404_v49  ;;  %v6442_v49 = vld [vmem:[%s7751_s16 + $0x28] sm:$0xff]  }
 0xa53   :  { %3900 = vmatprep.subr.bf16.mxu1 %v6409_v54  ;;  %v6443_v54 = vld [vmem:[%s7751_s16 + $0x30] sm:$0xff]  }
 0xa56   :  { %3901 = vmatpush1.bf16.msra.mxu1 %v6407_v55  ;;  %v6444_v55 = vld [vmem:[%s7751_s16 + $0x38] sm:$0xff]  }
 0xa57   :  { %3902 = vmatprep.subr.bf16.mxu1 %v6412_v48  ;;  %v6445_v48 = vld [vmem:[%s7751_s16 + $0x40] sm:$0xff]  }
 0xa5a   :  { %3903 = vmatpush1.bf16.msra.mxu1 %v6410_v50  ;;  %v6446_v50 = vld [vmem:[%s7751_s16 + $0x48] sm:$0xff]  }
 0xa5b   :  { %3904 = vmatprep.subr.bf16.mxu1 %v6415_v52  ;;  %v6447_v52 = vld [vmem:[%s7751_s16 + $0x50] sm:$0xff]  }
 0xa5e   :  { %3905 = vmatpush1.bf16.msra.mxu1 %v6413_v0  ;;  %v6448_v0 = vld [vmem:[%s7751_s16 + $0x58] sm:$0xff]  }
 0xa5f   :  { %3906 = vmatprep.subr.bf16.mxu1 %v6418_v1  ;;  %v6455_v1 = vld [vmem:[%s7752_s17 + $0xc8] sm:$0xff]  }
 0xa62   :  { %3907 = vmatpush1.bf16.msra.mxu1 %v6416_v2  ;;  %v6456_v2 = vld [vmem:[%s7752_s17 + $0x88] sm:$0xff]  }
 0xa63   :  { %3908 = vmatprep.subr.bf16.mxu1 %v6421_v3  ;;  %v6457_v3 = vld [vmem:[%s7752_s17 + $0x150] sm:$0xff]  }
 0xa66   :  { %3909 = vmatpush1.bf16.msra.mxu1 %v6419_v4  ;;  %v6459_v4 = vld [vmem:[%s7752_s17 + $0xd0] sm:$0xff]  }
 0xa67   :  { %3910 = vmatprep.subr.bf16.mxu1 %v6424_v5  ;;  %v6460_v5 = vld [vmem:[%s7752_s17 + $0x90] sm:$0xff]  }
 0xa6a   :  { %3911 = vmatpush1.bf16.msra.mxu1 %v6422_v6  ;;  %v6461_v6 = vld [vmem:[%s7752_s17 + $0xd8] sm:$0xff]  }
 0xa6b   :  { %3912 = vmatprep.subr.bf16.mxu1 %v6427_v7  ;;  %v6462_v7 = vld [vmem:[%s7752_s17 + $0x98] sm:$0xff]  }
 0xa6e   :  { %3913 = vmatpush1.bf16.msra.mxu1 %v6425_v9  ;;  %v6463_v9 = vld [vmem:[%s7752_s17 + $0xe0] sm:$0xff]  }
 0xa6f   :  { %3914 = vmatprep.subr.bf16.mxu1 %v6430_v11  ;;  %v6464_v11 = vld [vmem:[%s7752_s17 + $0xa0] sm:$0xff]  }
 0xa72   :  { %3915 = vmatpush1.bf16.msra.mxu1 %v6428_v16  ;;  %v6465_v16 = vld [vmem:[%s7752_s17 + $0x158] sm:$0xff]  }
 0xa73   :  { %3916 = vmatprep.subr.bf16.mxu1 %v6433_v17  ;;  %v6466_v17 = vld [vmem:[%s7752_s17 + $0x118] sm:$0xff]  }
 0xa76   :  { %3917 = vmatpush1.bf16.msra.mxu1 %v6431_v18  ;;  %v6467_v18 = vld [vmem:[%s7752_s17 + $0xe8] sm:$0xff]  }
 0xa77   :  { %3918 = vmatprep.subr.bf16.mxu1 %v6436_v20  ;;  %v6468_v20 = vld [vmem:[%s7752_s17 + $0xa8] sm:$0xff]  }
 0xa7a   :  { %3919 = vmatpush1.bf16.msra.mxu1 %v6434_v21  ;;  %v6469_v21 = vld [vmem:[%s7752_s17 + $0xf0] sm:$0xff]  }
 0xa7b   :  { %5619 = vmatprep.subr.bf16.mxu1 %v6453_v24  ;;  %v6470_v24 = vld [vmem:[%s7752_s17 + $0xb0] sm:$0xff]  }
 0xa7d   :  { %3921 = vmatmul.mubr.bf16.vlgmr.msra.gmra.mrb[56].mxu1 %v3691_v15  ;;  %v3958_v15 = vrot.slane %v3949_v8, %v6908_v53  ;;  %v6472_v8 = vld [vmem:[%s7752_s17 + $0xb8] sm:$0xff]  }
 0xa7e   :  { %3930 = vmatprep.mubr.bf16.mxu1 %v3694_v10  ;;  %5620 = vmatpush3.bf16.msra.mxu1 %v6454_v29  ;;  %v6471_v29 = vld [vmem:[%s7752_s17 + $0xf8] sm:$0xff]  }
 0xa7f   :  { %5621 = vmatprep.subr.bf16.mxu1 %v6455_v1 }
 0xa82   :  { %5622 = vmatpush3.bf16.msra.mxu1 %v6456_v2 }
 0xa83   :  { %5623 = vmatprep.subr.bf16.mxu1 %v6459_v4  ;;  %v6483_v4 = vld [vmem:[%s7752_s17 + $0x58] sm:$0xff]  }
 0xa85   :  { %3931 = vmatmul.mubr.bf16.gmra.mrb[60].mxu1 %v3693_v27 }
 0xa86   :  { %5624 = vmatpush3.bf16.msra.mxu1 %v6460_v5 }
 0xa87   :  { %5625 = vmatprep.subr.bf16.mxu1 %v6461_v6  ;;  %v6484_v6 = vld [vmem:[%s7752_s17 + $0x18] sm:$0xff]  }
 0xa8a   :  { %5626 = vmatpush3.bf16.msra.mxu1 %v6462_v7 }
 0xa8b   :  { %5627 = vmatprep.subr.bf16.mxu1 %v6463_v9  ;;  %v6485_v9 = vld [vmem:[%s7752_s17 + $0x60] sm:$0xff]  }
 0xa8e   :  { %5628 = vmatpush3.bf16.msra.mxu1 %v6464_v11 }
 0xa8f   :  { %5629 = vmatprep.subr.bf16.mxu1 %v6467_v18 }
 0xa92   :  { %5630 = vmatpush3.bf16.msra.mxu1 %v6468_v20  ;;  %v6486_v20 = vld [vmem:[%s7752_s17 + $0x20] sm:$0xff]  }
 0xa93   :  { %5631 = vmatprep.subr.bf16.mxu1 %v6469_v21  ;;  %v6487_v21 = vld [vmem:[%s7752_s17 + $0x68] sm:$0xff]  }
 0xa96   :  { %5632 = vmatpush3.bf16.msra.mxu1 %v6470_v24 }
 0xa97   :  { %5633 = vmatprep.subr.bf16.mxu1 %v6471_v29  ;;  %v6488_v29 = vld [vmem:[%s7752_s17 + $0x28] sm:$0xff]  }
 0xa9a   :  { %5634 = vmatpush3.bf16.msra.mxu1 %v6472_v8 }
 0xb50   :  { %v3922_v23 = vpop.f32.mrb[56].mxu1 }
 0xb51   :  { %v3961_v25 = vadd.f32 %v3954_v12, %v3922_v23  ;;  %v3924_v26 = vpop.f32.mrb[57].mxu1  ;;  %v6474_v23 = vld [vmem:[%s7752_s17 + $0x120] sm:$0xff]  }
 0xb52   :  { %v3962_v27 = vadd.f32 %v3958_v15, %v3924_v26  ;;  %v3926_v28 = vpop.f32.mrb[58].mxu1  ;;  %v6482_v26 = vld [vmem:[%s7752_s17 + $0x128] sm:$0xff]  }
 0xb53   :  { %v3963_v10 = vadd.f32 %v3954_v12, %v3926_v28  ;;  %v3928_v13 = vpop.f32.mrb[59].mxu1  ;;  %v3969_v30 = vmax.f32 %v3961_v25, 0.0  ;;  %v6481_v25 = vld [vmem:[%s7752_s17 + $0x168] sm:$0xff]   ;;  %v6490_v28 = vld [vmem:[%s7752_s17 + $0x130] sm:$0xff]  }
 0xb54   :  { %v3964_v14 = vadd.f32 %v3958_v15, %v3928_v13  ;;  %v3970_v32 = vmax.f32 %v3962_v27, 0.0  ;;  %v6489_v27 = vld [vmem:[%s7752_s17 + $0x170] sm:$0xff]   ;;  %v6496_v13 = vld [vmem:[%s7752_s17 + $0x138] sm:$0xff]  }
 0xb55   :  { %v3971_v31 = vmax.f32 %v3963_v10, 0.0  ;;  %v6495_v10 = vld [vmem:[%s7752_s17 + $0x178] sm:$0xff]  }
 0xb56   :  { %v3972_v33 = vmax.f32 %v3964_v14, 0.0 }
 0xb57   :  { %v3977_v34 = vpack.c.bf16 %v3971_v31, %v3969_v30 }
 0xb58   :  { %v3978_v35 = vpack.c.bf16 %v3972_v33, %v3970_v32  ;;  %v3932_v19 = vpop.f32.mrb[60].mxu1 }
 0xb59   :  { %v3965_v36 = vadd.f32 %v3954_v12, %v3932_v19  ;;  %v3934_v37 = vpop.f32.mrb[61].mxu1 }
 0xb5a   :  { %v3966_v51 = vadd.f32 %v3958_v15, %v3934_v37  ;;  %v3936_v38 = vpop.f32.mrb[62].mxu1  ;;  %4101 = vmatprep.subr.bf16.mxu0 %v3978_v35 }
 0xb5b   :  { %v3967_v53 = vadd.f32 %v3954_v12, %v3936_v38  ;;  %v3938_v41 = vpop.f32.mrb[63].mxu1  ;;  %4102 = vmatpush1.bf16.msra.mxu0 %v3977_v34  ;;  %v3973_v47 = vmax.f32 %v3965_v36, 0.0  ;;  %v6473_v12 = vld [vmem:[%s7752_s17 + $0x160] sm:$0xff]  }
 0xb5c   :  { %v3968_v46 = vadd.f32 %v3958_v15, %v3938_v41  ;;  %v3974_v57 = vmax.f32 %v3966_v51, 0.0  ;;  %v6475_v15 = vld [vmem:[%s7752_s17 + $0x40] sm:$0xff]  }
 0xb5d   :  { %v3975_v56 = vmax.f32 %v3967_v53, 0.0  ;;  %5659 = vmatprep.subr.bf16.mxu1 %v6475_v15 }
 0xb5e   :  { %v3976_v58 = vmax.f32 %v3968_v46, 0.0 }
 0xb5f   :  { %v3979_v59 = vpack.c.bf16 %v3975_v56, %v3973_v47 }
 0xb60   :  { %v3980_v39 = vpack.c.bf16 %v3976_v58, %v3974_v57 }
 0xb62   :  { %4103 = vmatprep.subr.bf16.mxu0 %v3980_v39 }
 0xb63   :  { %4104 = vmatpush1.bf16.msra.mxu0 %v3979_v59 }
 0xb64   :  { %5699 = vmatprep.subr.bf16.mxu0 %v6449_v42 }
 0xb66   :  { %5484 = vmatmul.mubr.msk.bf16.vlgmr.msra.gmra.mrb[40].mxu0 %vm306_vm1, %v6437_v43 }
 0xb67   :  { %4143 = vmatprep.mubr.bf16.mxu0 %v6653_v22  ;;  %5700 = vmatpush3.bf16.msra.mxu0 %v6450_v60 }
 0xb68   :  { %5701 = vmatprep.subr.bf16.mxu0 %v6451_v61 }
 0xb6b   :  { %5702 = vmatpush3.bf16.msra.mxu0 %v6452_v62 }
 0xb6c   :  { %5703 = vmatprep.subr.bf16.mxu0 %v6457_v3 }
 0xb6e   :  { %5485 = vmatmul.mubr.msk.bf16.gmra.mrb[44].mxu0 %vm306_vm1, %v6438_v63 }
 0xb6f   :  { %4153 = vmatprep.mubr.bf16.mxu0 %v6653_v22 }
 0xb76   :  { %5486 = vmatmul.mubr.msk.bf16.gmra.mrb[48].mxu0 %vm306_vm1, %v6439_v40 }
 0xb77   :  { %4163 = vmatprep.mubr.bf16.mxu0 %v6653_v22 }
 0xb7e   :  { %5487 = vmatmul.mubr.msk.bf16.gmra.mrb[52].mxu0 %vm306_vm1, %v6440_v44 }
 0xb7f   :  { %4173 = vmatprep.mubr.bf16.mxu0 %v6653_v22 }
 0xb86   :  { %5488 = vmatmul.mubr.msk.bf16.gmra.mrb[56].mxu0 %vm306_vm1, %v6441_v45 }
 0xb87   :  { %4183 = vmatprep.mubr.bf16.mxu0 %v6653_v22 }
 0xb8e   :  { %5489 = vmatmul.mubr.msk.bf16.gmra.mrb[60].mxu0 %vm306_vm1, %v6442_v49  ;;  %v6476_v49 = vld [vmem:[%s7752_s17] sm:$0xff]  }
 0xb8f   :  { %4193 = vmatprep.mubr.bf16.mxu0 %v6653_v22 }
 0xb96   :  { %5490 = vmatmul.mubr.msk.bf16.gmra.mrb[64].mxu0 %vm306_vm1, %v6443_v54  ;;  %v6477_v54 = vld [vmem:[%s7752_s17 + $0x48] sm:$0xff]  }
 0xb97   :  { %4203 = vmatprep.mubr.bf16.mxu0 %v6653_v22 }
 0xb9e   :  { %5491 = vmatmul.mubr.msk.bf16.gmra.mrb[68].mxu0 %vm306_vm1, %v6444_v55 }
 0xb9f   :  { %4213 = vmatprep.mubr.bf16.mxu0 %v6653_v22 }
 0xba6   :  { %5492 = vmatmul.mubr.msk.bf16.gmra.mrb[72].mxu0 %vm306_vm1, %v6445_v48  ;;  %v6478_v48 = vld [vmem:[%s7752_s17 + $0x8] sm:$0xff]  }
 0xba7   :  { %4223 = vmatprep.mubr.bf16.mxu0 %v6653_v22 }
 0xbae   :  { %5493 = vmatmul.mubr.msk.bf16.gmra.mrb[76].mxu0 %vm306_vm1, %v6446_v50 }
 0xbaf   :  { %4233 = vmatprep.mubr.bf16.mxu0 %v6653_v22 }
 0xbb6   :  { %5494 = vmatmul.mubr.msk.bf16.gmra.mrb[80].mxu0 %vm306_vm1, %v6447_v52  ;;  %v6479_v52 = vld [vmem:[%s7752_s17 + $0x50] sm:$0xff]  }
 0xbb7   :  { %4243 = vmatprep.mubr.bf16.mxu0 %v6653_v22  ;;  %v6458_v22 = vld [vmem:[%s7752_s17 + $0x110] sm:$0xff]  }
 0xbb8   :  { %5704 = vmatpush3.bf16.msra.mxu0 %v6458_v22  ;;  %v6480_v22 = vld [vmem:[%s7752_s17 + $0x10] sm:$0xff]  }
 0xbb9   :  { %5705 = vmatprep.subr.bf16.mxu0 %v6465_v16 }
 0xbbc   :  { %5706 = vmatpush3.bf16.msra.mxu0 %v6466_v17 }
 0xbbd   :  { %5707 = vmatprep.subr.bf16.mxu0 %v6473_v12  ;;  %v6491_v12 = vld [vmem:[%s7752_s17 + $0x70] sm:$0xff]  }
 0xbbe   :  { %5495 = vmatmul.mubr.msk.bf16.gmra.mrb[84].mxu0 %vm306_vm1, %v6448_v0 }
 0xbc0   :  { %5708 = vmatpush3.bf16.msra.mxu0 %v6474_v23 }
 0xbc1   :  { %5709 = vmatprep.subr.bf16.mxu0 %v6481_v25 }
 0xbc4   :  { %5710 = vmatpush3.bf16.msra.mxu0 %v6482_v26 }
 0xbc5   :  { %5711 = vmatprep.subr.bf16.mxu0 %v6489_v27  ;;  %v6492_v27 = vld [vmem:[%s7752_s17 + $0x30] sm:$0xff]  }
 0xbc8   :  { %5712 = vmatpush3.bf16.msra.mxu0 %v6490_v28  ;;  %v6493_v28 = vld [vmem:[%s7752_s17 + $0x78] sm:$0xff]  }
 0xbc9   :  { %5713 = vmatprep.subr.bf16.mxu0 %v6495_v10 }
 0xbcc   :  { %5714 = vmatpush3.bf16.msra.mxu0 %v6496_v13  ;;  %v6494_v13 = vld [vmem:[%s7752_s17 + $0x38] sm:$0xff]  }
 0xc39   :  { %v7570_v14 = vpop.f32.mrb[40].mxu0 }
 0xc3a   :  { %v7572_v30 = vpop.f32.mrb[41].mxu0 }
 0xc3b   :  { %v7574_v31 = vpop.f32.mrb[42].mxu0 }
 0xc3c   :  { %v4254_v32 = vpack.c.bf16 %v7574_v31, %v7570_v14  ;;  %v7578_v33 = vpop.f32.mrb[43].mxu0 }
 0xc3d   :  { %v4255_v34 = vpack.c.bf16 %v7578_v33, %v7572_v30 }
 0xc41   :  { %v7582_v35 = vpop.f32.mrb[44].mxu0 }
 0xc42   :  { %v7584_v19 = vpop.f32.mrb[45].mxu0 }
 0xc43   :  { %v7586_v36 = vpop.f32.mrb[46].mxu0 }
 0xc44   :  { %v4256_v37 = vpack.c.bf16 %v7586_v36, %v7582_v35  ;;  %v7590_v51 = vpop.f32.mrb[47].mxu0 }
 0xc45   :  { %v4257_v38 = vpack.c.bf16 %v7590_v51, %v7584_v19 }
 0xc49   :  { %v7594_v53 = vpop.f32.mrb[48].mxu0 }
 0xc4a   :  { %v7596_v41 = vpop.f32.mrb[49].mxu0 }
 0xc4b   :  { %v7598_v46 = vpop.f32.mrb[50].mxu0 }
 0xc4c   :  { %v4258_v47 = vpack.c.bf16 %v7598_v46, %v7594_v53  ;;  %v7602_v56 = vpop.f32.mrb[51].mxu0 }
 0xc4d   :  { %v4259_v57 = vpack.c.bf16 %v7602_v56, %v7596_v41 }
 0xc51   :  { %v7606_v58 = vpop.f32.mrb[52].mxu0 }
 0xc52   :  { %v7608_v59 = vpop.f32.mrb[53].mxu0 }
 0xc53   :  { %v7610_v39 = vpop.f32.mrb[54].mxu0 }
 0xc54   :  { %v4260_v42 = vpack.c.bf16 %v7610_v39, %v7606_v58  ;;  %v7614_v43 = vpop.f32.mrb[55].mxu0 }
 0xc55   :  { %v4261_v60 = vpack.c.bf16 %v7614_v43, %v7608_v59 }
 0xc59   :  { %v4175_v61 = vpop.f32.mrb[56].mxu0 }
 0xc5a   :  { %v4177_v62 = vpop.f32.mrb[57].mxu0 }
 0xc5b   :  { %v4179_v63 = vpop.f32.mrb[58].mxu0 }
 0xc5c   :  { %v4294_v40 = vpack.c.bf16 %v4179_v63, %v4175_v61  ;;  %v4181_v44 = vpop.f32.mrb[59].mxu0 }
 0xc5d   :  { %v4295_v45 = vpack.c.bf16 %v4181_v44, %v4177_v62 }
 0xc5f   :  { %4463 = vmatprep.mubr.bf16.mxu1 %v4295_v45 }
 0xc60   :  { %4464 = vmatmul.mubr.bf16.vlgmr.msra.gmra.mrb[64].mxu1 %v4294_v40 }
 0xc61   :  { %v4185_v55 = vpop.f32.mrb[60].mxu0  ;;  %5660 = vmatpush3.bf16.msra.mxu1 %v6476_v49 }
 0xc62   :  { %v4187_v50 = vpop.f32.mrb[61].mxu0  ;;  %5661 = vmatprep.subr.bf16.mxu1 %v6477_v54 }
 0xc63   :  { %v4189_v0 = vpop.f32.mrb[62].mxu0 }
 0xc64   :  { %v4296_v1 = vpack.c.bf16 %v4189_v0, %v4185_v55  ;;  %v4191_v2 = vpop.f32.mrb[63].mxu0 }
 0xc65   :  { %v4297_v3 = vpack.c.bf16 %v4191_v2, %v4187_v50  ;;  %5662 = vmatpush3.bf16.msra.mxu1 %v6478_v48 }
 0xc66   :  { %5663 = vmatprep.subr.bf16.mxu1 %v6479_v52 }
 0xc67   :  { %4471 = vmatprep.mubr.bf16.mxu1 %v4297_v3 }
 0xc68   :  { %4472 = vmatmul.mubr.bf16.gmra.mrb[68].mxu1 %v4296_v1 }
 0xc69   :  { %v4195_v5 = vpop.f32.mrb[64].mxu0  ;;  %5664 = vmatpush3.bf16.msra.mxu1 %v6480_v22 }
 0xc6a   :  { %v4197_v7 = vpop.f32.mrb[65].mxu0  ;;  %5665 = vmatprep.subr.bf16.mxu1 %v6483_v4 }
 0xc6b   :  { %v4199_v11 = vpop.f32.mrb[66].mxu0 }
 0xc6c   :  { %v4298_v16 = vpack.c.bf16 %v4199_v11, %v4195_v5  ;;  %v4201_v17 = vpop.f32.mrb[67].mxu0 }
 0xc6d   :  { %v4299_v18 = vpack.c.bf16 %v4201_v17, %v4197_v7  ;;  %5666 = vmatpush3.bf16.msra.mxu1 %v6484_v6 }
 0xc6e   :  { %5667 = vmatprep.subr.bf16.mxu1 %v6485_v9 }
 0xc6f   :  { %4479 = vmatprep.mubr.bf16.mxu1 %v4299_v18 }
 0xc70   :  { %4480 = vmatmul.mubr.bf16.gmra.mrb[72].mxu1 %v4298_v16 }
 0xc71   :  { %v4205_v24 = vpop.f32.mrb[68].mxu0  ;;  %5668 = vmatpush3.bf16.msra.mxu1 %v6486_v20 }
 0xc72   :  { %v4207_v8 = vpop.f32.mrb[69].mxu0  ;;  %5669 = vmatprep.subr.bf16.mxu1 %v6487_v21 }
 0xc73   :  { %v4209_v15 = vpop.f32.mrb[70].mxu0 }
 0xc74   :  { %v4300_v23 = vpack.c.bf16 %v4209_v15, %v4205_v24  ;;  %v4211_v25 = vpop.f32.mrb[71].mxu0 }
 0xc75   :  { %v4301_v26 = vpack.c.bf16 %v4211_v25, %v4207_v8  ;;  %5670 = vmatpush3.bf16.msra.mxu1 %v6488_v29 }
 0xc76   :  { %5671 = vmatprep.subr.bf16.mxu1 %v6491_v12 }
 0xc77   :  { %4487 = vmatprep.mubr.bf16.mxu1 %v4301_v26 }
 0xc78   :  { %4488 = vmatmul.mubr.bf16.gmra.mrb[76].mxu1 %v4300_v23 }
 0xc79   :  { %5672 = vmatpush3.bf16.msra.mxu1 %v6492_v27  ;;  %4624 = vmatprep.mubr.bf16.mxu1 %v4255_v34  ;;  %v4215_v10 = vpop.f32.mrb[72].mxu0  ;;  %v7698_v27 = vld [vmem:[%s7753_s18] ss:$0 sm:$0xff]  ;;  %s6654_s18 = smov [#allocation10]  }
 0xc7a   :  { %v4217_v61 = vpop.f32.mrb[73].mxu0  ;;  %5673 = vmatprep.subr.bf16.mxu1 %v6493_v28  ;;  %s4943_s22 = sshll.u32 %s6654_s18, 4  ;;  %s4944_s22 = int_to_ptr.vmem [resolvable:$true] %s4943_s22 }
 0xc7b   :  { %v4219_v62 = vpop.f32.mrb[74].mxu0  ;;  %s6617_s4 = scalar_lea.vmem %s4944_s22, 1024  ;;  %p6622_p5 = scmp.lt.s32.totalorder %s4944_s22, %s4944_s22 }
 0xc7c   :  { %v4657_v63 = vpack.c.bf16 %v4219_v62, %v4215_v10  ;;  %v4221_v40 = vpop.f32.mrb[75].mxu0  ;;  %p6618_p4 = scmp.ne.s32.totalorder %s4944_s22, %s6617_s4  ;;  %p6623_p6 = scmp.lt.s32.totalorder %s6617_s4, %s6617_s4 }
 0xc7d   :  { %5674 = vmatpush3.bf16.msra.mxu1 %v6494_v13  ;;  %v4658_v44 = vpack.c.bf16 %v4221_v40, %v4217_v61 }
 0xc7e   :  { %p6624_p7 = por %p6623_p6, %p6622_p5 }
 0xc7f   :  { %4826 = vmatprep.mubr.bf16.mxu0 %v4658_v44 }
 0xc80   :  { %4625 = vmatmul.mubr.bf16.vlgmr.msra.gmra.mrb[80].mxu1 %v4254_v32  ;;  %4827 = vmatmul.mubr.bf16.vlgmr.msra.gmra.mrb[88].mxu0 %v4657_v63  ;;  %p6625_p8 = pnand %p6624_p7, %p6618_p4 }
 0xc81   :  { %4632 = vmatprep.mubr.bf16.mxu1 %v4257_v38  ;;  %v4225_v30 = vpop.f32.mrb[76].mxu0 }
 0xc82   :  { %v4227_v33 = vpop.f32.mrb[77].mxu0 }
 0xc83   :  { %v4229_v34 = vpop.f32.mrb[78].mxu0 }
 0xc84   :  { %v4659_v45 = vpack.c.bf16 %v4229_v34, %v4225_v30  ;;  %v4231_v49 = vpop.f32.mrb[79].mxu0 }
 0xc85   :  { %v4660_v54 = vpack.c.bf16 %v4231_v49, %v4227_v33 }
 0xc87   :  { %4834 = vmatprep.mubr.bf16.mxu0 %v4660_v54 }
 0xc88   :  { %4633 = vmatmul.mubr.bf16.gmra.mrb[84].mxu1 %v4256_v37  ;;  %4835 = vmatmul.mubr.bf16.gmra.mrb[92].mxu0 %v4659_v45 }
 0xc89   :  { %4640 = vmatprep.mubr.bf16.mxu1 %v4259_v57  ;;  %v4235_v14 = vpop.f32.mrb[80].mxu0 }
 0xc8a   :  { %v4237_v31 = vpop.f32.mrb[81].mxu0 }
 0xc8b   :  { %v4239_v32 = vpop.f32.mrb[82].mxu0 }
 0xc8c   :  { %v4661_v19 = vpack.c.bf16 %v4239_v32, %v4235_v14  ;;  %v4241_v51 = vpop.f32.mrb[83].mxu0 }
 0xc8d   :  { %v4662_v38 = vpack.c.bf16 %v4241_v51, %v4237_v31 }
 0xc8f   :  { %4842 = vmatprep.mubr.bf16.mxu0 %v4662_v38 }
 0xc90   :  { %4641 = vmatmul.mubr.bf16.gmra.mrb[88].mxu1 %v4258_v47  ;;  %4843 = vmatmul.mubr.bf16.gmra.mrb[96].mxu0 %v4661_v19 }
 0xc91   :  { %4648 = vmatprep.mubr.bf16.mxu1 %v4261_v60  ;;  %v4245_v35 = vpop.f32.mrb[84].mxu0 }
 0xc92   :  { %v4247_v36 = vpop.f32.mrb[85].mxu0 }
 0xc93   :  { %v4249_v37 = vpop.f32.mrb[86].mxu0 }
 0xc94   :  { %v4663_v41 = vpack.c.bf16 %v4249_v37, %v4245_v35  ;;  %v4251_v56 = vpop.f32.mrb[87].mxu0 }
 0xc95   :  { %v4664_v57 = vpack.c.bf16 %v4251_v56, %v4247_v36 }
 0xc97   :  { %4850 = vmatprep.mubr.bf16.mxu0 %v4664_v57 }
 0xc98   :  { %4649 = vmatmul.mubr.bf16.gmra.mrb[92].mxu1 %v4260_v42  ;;  %4851 = vmatmul.mubr.bf16.gmra.mrb[100].mxu0 %v4663_v41 }
 0xd33   :  { %v5635_v55 = vpop.f32.mrb[64].mxu1 }
 0xd34   :  { %v5636_v53 = vpop.f32.mrb[65].mxu1 }
 0xd35   :  { %v5637_v46 = vadd.f32 %v5636_v53, %v5635_v55  ;;  %v5638_v47 = vpop.f32.mrb[66].mxu1 }
 0xd36   :  { %v5639_v48 = vpop.f32.mrb[67].mxu1 }
 0xd37   :  { %v5640_v50 = vadd.f32 %v5639_v48, %v5638_v47 }
 0xd3b   :  { %v5641_v59 = vpop.f32.mrb[68].mxu1 }
 0xd3c   :  { %v5642_v43 = vpop.f32.mrb[69].mxu1 }
 0xd3d   :  { %v5643_v60 = vadd.f32 %v5642_v43, %v5641_v59  ;;  %v5644_v52 = vpop.f32.mrb[70].mxu1 }
 0xd3e   :  { %v5645_v0 = vpop.f32.mrb[71].mxu1 }
 0xd3f   :  { %v5646_v1 = vadd.f32 %v5645_v0, %v5644_v52 }
 0xd43   :  { %v5647_v2 = vpop.f32.mrb[72].mxu1 }
 0xd44   :  { %v5648_v3 = vpop.f32.mrb[73].mxu1 }
 0xd45   :  { %v7687_v22 = vadd.f32 %v5648_v3, %v5647_v2  ;;  %v5650_v4 = vpop.f32.mrb[74].mxu1 }
 0xd46   :  { %v5651_v58 = vpop.f32.mrb[75].mxu1 }
 0xd47   :  { %v7689_v39 = vadd.f32 %v5651_v58, %v5650_v4 }
 0xd4b   :  { %v5653_v42 = vpop.f32.mrb[76].mxu1 }
 0xd4c   :  { %v5654_v5 = vpop.f32.mrb[77].mxu1 }
 0xd4d   :  { %v7691_v6 = vadd.f32 %v5654_v5, %v5653_v42  ;;  %v5656_v7 = vpop.f32.mrb[78].mxu1 }
 0xd4e   :  { %v5657_v9 = vpop.f32.mrb[79].mxu1 }
 0xd4f   :  { %v7693_v11 = vadd.f32 %v5657_v9, %v5656_v7 }
 0xd53   :  { %v5675_v16 = vpop.f32.mrb[80].mxu1  ;;  %v5715_v17 = vpop.f32.mrb[88].mxu0 }
 0xd54   :  { %v5676_v18 = vpop.f32.mrb[81].mxu1  ;;  %v5716_v20 = vpop.f32.mrb[89].mxu0 }
 0xd55   :  { %v5677_v21 = vadd.f32 %v5676_v18, %v5675_v16  ;;  %v5678_v24 = vpop.f32.mrb[82].mxu1  ;;  %v5717_v29 = vadd.f32 %v5716_v20, %v5715_v17  ;;  %v5718_v8 = vpop.f32.mrb[90].mxu0 }
 0xd56   :  { %v5679_v12 = vpop.f32.mrb[83].mxu1  ;;  %v5719_v15 = vpop.f32.mrb[91].mxu0 }
 0xd57   :  { %v4627_v23 = vadd.f32 %v5677_v21, %v5637_v46  ;;  %v5680_v25 = vadd.f32 %v5679_v12, %v5678_v24  ;;  %v5720_v26 = vadd.f32 %v5719_v15, %v5718_v8 }
 0xd59   :  { %v4630_v28 = vadd.f32 %v5680_v25, %v5640_v50  ;;  %v4859_v10 = vadd.f32 %v5717_v29, %v4627_v23 }
 0xd5b   :  { %v4874_v13 = vadd.f32 %v7698_v27, %v4859_v10  ;;  %v4860_v61 = vadd.f32 %v5720_v26, %v4630_v28  ;;  %v5681_v62 = vpop.f32.mrb[84].mxu1  ;;  %v5721_v63 = vpop.f32.mrb[92].mxu0 }
 0xd5c   :  { %v5682_v40 = vpop.f32.mrb[85].mxu1  ;;  %v5722_v44 = vpop.f32.mrb[93].mxu0 }
 0xd5d   :  { %v4882_v30 = vsub.f32 0.0, %v4874_v13  ;;  %v4875_v33 = vadd.f32 %v7698_v27, %v4860_v61  ;;  %v5683_v34 = vadd.f32 %v5682_v40, %v5681_v62  ;;  %v5684_v45 = vpop.f32.mrb[86].mxu1  ;;  %v5723_v49 = vadd.f32 %v5722_v44, %v5721_v63  ;;  %v5724_v54 = vpop.f32.mrb[94].mxu0 }
 0xd5e   :  { %v5685_v14 = vpop.f32.mrb[87].mxu1  ;;  %v5725_v31 = vpop.f32.mrb[95].mxu0 }
 0xd5f   :  { %v4890_v32 = vmul.f32 1.442695, %v4882_v30  ;;  %v4883_v19 = vsub.f32 0.0, %v4875_v33  ;;  %v4635_v51 = vadd.f32 %v5683_v34, %v5643_v60  ;;  %v5686_v38 = vadd.f32 %v5685_v14, %v5684_v45 }
 0xd60   :  { %v5726_v35 = vadd.f32 %v5725_v31, %v5724_v54 }
 0xd61   :  { %6497 = vpow2.f32 %v4890_v32  ;;  %v4892_v36 = vmul.f32 1.442695, %v4883_v19  ;;  %v4638_v37 = vadd.f32 %v5686_v38, %v5646_v1  ;;  %v4861_v41 = vadd.f32 %v5723_v49, %v4635_v51 }
 0xd63   :  { %6499 = vpow2.f32 %v4892_v36  ;;  %v4876_v56 = vadd.f32 %v7698_v27, %v4861_v41  ;;  %v4862_v57 = vadd.f32 %v5726_v35, %v4638_v37  ;;  %v5687_v55 = vpop.f32.mrb[88].mxu1  ;;  %v5727_v53 = vpop.f32.mrb[96].mxu0 }
 0xd64   :  { %v5688_v46 = vpop.f32.mrb[89].mxu1  ;;  %v5728_v47 = vpop.f32.mrb[97].mxu0 }
 0xd65   :  { %v4884_v48 = vsub.f32 0.0, %v4876_v56  ;;  %v4877_v50 = vadd.f32 %v7698_v27, %v4862_v57  ;;  %v5689_v59 = vadd.f32 %v5688_v46, %v5687_v55  ;;  %v5690_v43 = vpop.f32.mrb[90].mxu1  ;;  %v5729_v60 = vadd.f32 %v5728_v47, %v5727_v53  ;;  %v5730_v52 = vpop.f32.mrb[98].mxu0 }
 0xd66   :  { %v5691_v0 = vpop.f32.mrb[91].mxu1  ;;  %v5731_v2 = vpop.f32.mrb[99].mxu0 }
 0xd67   :  { %v4894_v3 = vmul.f32 1.442695, %v4884_v48  ;;  %v4885_v1 = vsub.f32 0.0, %v4877_v50  ;;  %v4643_v4 = vadd.f32 %v5689_v59, %v7687_v22  ;;  %v5692_v58 = vadd.f32 %v5691_v0, %v5690_v43 }
 0xd68   :  { %v5732_v42 = vadd.f32 %v5731_v2, %v5730_v52 }
 0xd69   :  { %6501 = vpow2.f32 %v4894_v3  ;;  %v4896_v5 = vmul.f32 1.442695, %v4885_v1  ;;  %v4646_v7 = vadd.f32 %v5692_v58, %v7689_v39  ;;  %v4863_v9 = vadd.f32 %v5729_v60, %v4643_v4 }
 0xd6b   :  { %v6498_v16 = vpop.eup %6497  ;;  %6503 = vpow2.f32 %v4896_v5  ;;  %v4878_v17 = vadd.f32 %v7698_v27, %v4863_v9  ;;  %v4864_v18 = vadd.f32 %v5732_v42, %v4646_v7  ;;  %v5693_v20 = vpop.f32.mrb[92].mxu1 }
 0xd6c   :  { %v5733_v21 = vpop.f32.mrb[100].mxu0  ;;  %v4906_v24 = vadd.f32 1.0, %v6498_v16  ;;  %v5694_v29 = vpop.f32.mrb[93].mxu1 }
 0xd6d   :  { %v5734_v8 = vpop.f32.mrb[101].mxu0  ;;  %v6500_v12 = vpop.eup %6499  ;;  %v4886_v15 = vsub.f32 0.0, %v4878_v17  ;;  %v4879_v22 = vadd.f32 %v7698_v27, %v4864_v18  ;;  %v5695_v23 = vadd.f32 %v5694_v29, %v5693_v20 }
 0xd6e   :  { %v5696_v25 = vpop.f32.mrb[94].mxu1  ;;  %v5735_v26 = vadd.f32 %v5734_v8, %v5733_v21  ;;  %v5736_v28 = vpop.f32.mrb[102].mxu0  ;;  %6505 = vrcp.f32 %v4906_v24  ;;  %v4907_v39 = vadd.f32 1.0, %v6500_v12 }
 0xd6f   :  { %v5697_v10 = vpop.f32.mrb[95].mxu1  ;;  %v5737_v13 = vpop.f32.mrb[103].mxu0  ;;  %v4898_v61 = vmul.f32 1.442695, %v4886_v15  ;;  %v4887_v62 = vsub.f32 0.0, %v4879_v22  ;;  %v4651_v63 = vadd.f32 %v5695_v23, %v7691_v6 }
 0xd70   :  { %v5698_v40 = vadd.f32 %v5697_v10, %v5696_v25  ;;  %6507 = vrcp.f32 %v4907_v39  ;;  %v5738_v44 = vadd.f32 %v5737_v13, %v5736_v28 }
 0xd71   :  { %6509 = vpow2.f32 %v4898_v61  ;;  %v4900_v30 = vmul.f32 1.442695, %v4887_v62  ;;  %v4865_v34 = vadd.f32 %v5735_v26, %v4651_v63 }
 0xd72   :  { %v4654_v33 = vadd.f32 %v5698_v40, %v7693_v11 }
 0xd73   :  { %v6502_v45 = vpop.eup %6501  ;;  %6511 = vpow2.f32 %v4900_v30  ;;  %v4880_v49 = vadd.f32 %v7698_v27, %v4865_v34 }
 0xd74   :  { %v4866_v54 = vadd.f32 %v5738_v44, %v4654_v33  ;;  %v4908_v14 = vadd.f32 1.0, %v6502_v45 }
 0xd75   :  { %v6504_v31 = vpop.eup %6503  ;;  %v4888_v32 = vsub.f32 0.0, %v4880_v49 }
 0xd76   :  { %v4881_v19 = vadd.f32 %v7698_v27, %v4866_v54  ;;  %6513 = vrcp.f32 %v4908_v14  ;;  %v4909_v6 = vadd.f32 1.0, %v6504_v31 }
 0xd77   :  { %v4902_v51 = vmul.f32 1.442695, %v4888_v32 }
 0xd78   :  { %v4889_v38 = vsub.f32 0.0, %v4881_v19  ;;  %v6506_v35 = vpop.eup %6505  ;;  %6515 = vrcp.f32 %v4909_v6 }
 0xd79   :  { %4930 = vst.msk [vmem:[#allocation10] sm:$0xff] %vm306_vm1, %v6506_v35  ;;  %6517 = vpow2.f32 %v4902_v51 }
 0xd7a   :  { %v4904_v11 = vmul.f32 1.442695, %v4889_v38  ;;  %v6508_v36 = vpop.eup %6507 }
 0xd7b   :  { %v6510_v37 = vpop.eup %6509  ;;  %4931 = vst.msk [vmem:[#allocation10 + $0x8] sm:$0xff] %vm306_vm1, %v6508_v36 }
 0xd7c   :  { %6519 = vpow2.f32 %v4904_v11  ;;  %v4910_v41 = vadd.f32 1.0, %v6510_v37 }
 0xd7d   :  { %v6512_v56 = vpop.eup %6511 }
 0xd7e   :  { %6521 = vrcp.f32 %v4910_v41  ;;  %v4911_v57 = vadd.f32 1.0, %v6512_v56 }
 0xd80   :  { %v6514_v27 = vpop.eup %6513  ;;  %6523 = vrcp.f32 %v4911_v57 }
 0xd81   :  { %4932 = vst.msk [vmem:[#allocation10 + $0x10] sm:$0xff] %vm306_vm1, %v6514_v27 }
 0xd82   :  { %v6516_v55 = vpop.eup %6515 }
 0xd83   :  { %v6518_v53 = vpop.eup %6517  ;;  %4933 = vst.msk [vmem:[#allocation10 + $0x18] sm:$0xff] %vm306_vm1, %v6516_v55 }
 0xd84   :  { %v4912_v46 = vadd.f32 1.0, %v6518_v53 }
 0xd86   :  { %v6520_v47 = vpop.eup %6519  ;;  %6525 = vrcp.f32 %v4912_v46 }
 0xd87   :  { %v4913_v48 = vadd.f32 1.0, %v6520_v47 }
 0xd88   :  { %v6522_v50 = vpop.eup %6521 }
 0xd89   :  { %6527 = vrcp.f32 %v4913_v48  ;;  %4934 = vst.msk [vmem:[#allocation10 + $0x20] sm:$0xff] %vm306_vm1, %v6522_v50 }
 0xd8a   :  { %v6524_v59 = vpop.eup %6523 }
 0xd8b   :  { %4935 = vst.msk [vmem:[#allocation10 + $0x28] sm:$0xff] %vm306_vm1, %v6524_v59 }
 0xd90   :  { %v6526_v43 = vpop.eup %6525 }
 0xd91   :  { %4936 = vst.msk [vmem:[#allocation10 + $0x30] sm:$0xff] %vm306_vm1, %v6526_v43 }
 0xd93   :  { %v6528_v60 = vpop.eup %6527 }
 0xd94   :  { %4937 = vst.msk [vmem:[#allocation10 + $0x38] sm:$0xff] %vm306_vm1, %v6528_v60 }
 0xd95   :  { %6628 = shalt.err (!%p6625_p8)
}
 0xd96   :  { %s7768_s8 = sld [smem:[#allocation19_spill]] }
 0xd9c   :  { %s6629_s30 = scalar_lea.hbm %s7768_s8, 1024 }
 0xd9d   :  { %p6630_p9 = scmp.ne.s32.totalorder %s7768_s8, %s6629_s30  ;;  %p6633_p10 = scmp.lt.u32.totalorder %s6629_s30, %s7768_s8 }
 0xd9f   :  { %p6635_p11 = pnand %p6633_p10, %p6630_p9 }
 0xda1   :  { %6638 = shalt.err (!%p6635_p11)
}
 0xda2   :  { %4949 = dma.vmem_to_hbm [thread:$0]  %s4944_s22, 1024, %s7768_s8, [#allocation4], %s6649_s27, %s6649_s27, %s6650_s28  }
 0xda3   :  { %6645 = dma.done.wait [#allocation4], 1024  }
 0xda4   :  { %6646 = vsyncadd [#allocation4], 4294966272 }
 0xda5   :  { %4953 = vsyncpa [#allocation3], 1 }
 0xda6   :  { %4954 = vsyncpa [#allocation6], 1 }
 0xda7   :  { %4955 = vsyncpa [#allocation9], 1 }
 0xda8   :  { %4956 = vsyncpa [#allocation4], 1 }

</bundles_post_ra>
